<compile_context>
chip_gen: v6e
topology: v6e:2x2x1
jax: 0.10.0
libtpu: 0.0.40
codegen_flags: <defaults>
</compile_context>

<pallas_src>
import functools

import jax
import jax.numpy as jnp
from jax.experimental import pallas as pl
from jax.experimental.pallas import tpu as pltpu


# --------------------- fused LSTM + output-head kernel -----------------------
def fused_lstm_head_kernel(x_ref, h0_ref, wih_ref, whh_ref, b_ref,
                           wout_ref, bout_ref, gamma_ref, beta_ref,
                           out_ref, *, seq_len, batch_p, hidden_p, vocab, vocab_p):
    """Single kernel invocation: whole sequence, recurrence + Linear + LayerNorm.

    Shapes (all padded):
      x_ref    : (T*Bp, Dp)  time-major flattened embeddings
      h0_ref   : (Bp, Hp)    h0 == c0 == `output`
      wih_ref  : (Dp, 4*Hp)  gate order i, f, g, o (each gate a 128-lane block)
      whh_ref  : (Hp, 4*Hp)
      b_ref    : (1, 4*Hp)   b_ih + b_hh
      wout_ref : (Hp, Vp)
      bout/gamma/beta : (1, Vp)
      out_ref  : (Bp, T*Vp)  batch-first: row b, lanes [t*Vp:(t+1)*Vp] == logits[b, t]
    """
    Hp = hidden_p

    # Hoist all weight loads out of the unrolled loop.
    w_ih = wih_ref[...]
    w_hh = whh_ref[...]
    bias = b_ref[...]
    w_out = wout_ref[...]
    b_out = bout_ref[...]
    gamma = gamma_ref[...]
    beta = beta_ref[...]

    # ---- hoisted input projection: ONE large MXU matmul over all timesteps ----
    # (T*Bp, Dp) @ (Dp, 4*Hp) + bias, rows in time-major (t, b) order.
    gates_x = jnp.dot(x_ref[...], w_ih, preferred_element_type=jnp.float32) + bias

    # LayerNorm column mask over the *true* vocab (padded columns are zero).
    col = jax.lax.broadcasted_iota(jnp.int32, (batch_p, vocab_p), 1)
    ln_mask = (col < vocab).astype(jnp.float32)
    inv_v = 1.0 / float(vocab)

    h = h0_ref[...]
    c = h0_ref[...]

    # ---- recurrence: statically unrolled over T; only h @ W_hh on the critical path ----
    for t in range(seq_len):
        g = gates_x[t * batch_p:(t + 1) * batch_p, :] + jnp.dot(
            h, w_hh, preferred_element_type=jnp.float32)          # (Bp, 4*Hp)
        # lane-block-aligned gate slices (Hp is a multiple of 128) -> free views
        i_g = jax.nn.sigmoid(g[:, 0 * Hp:1 * Hp])
        f_g = jax.nn.sigmoid(g[:, 1 * Hp:2 * Hp])
        g_g = jnp.tanh(g[:, 2 * Hp:3 * Hp])
        o_g = jax.nn.sigmoid(g[:, 3 * Hp:4 * Hp])
        c = f_g * c + i_g * g_g
        h = o_g * jnp.tanh(c)

        # ---- fused output head on this timestep's h: Linear(H->V) + LayerNorm(V) ----
        y = jnp.dot(h, w_out, preferred_element_type=jnp.float32) + b_out   # (Bp, Vp)
        mean = jnp.sum(y * ln_mask, axis=-1, keepdims=True) * inv_v
        diff = (y - mean) * ln_mask
        var = jnp.sum(diff * diff, axis=-1, keepdims=True) * inv_v
        y_n = (y - mean) * jax.lax.rsqrt(var + 1e-5)
        out_t = y_n * gamma + beta
        # TODO(synk): Dropout(0.2) is identity here (eval mode); training parity would
        #             need pltpu.prng_seed + pltpu.prng_random_bits masking.

        # lane-aligned static slice store, directly in batch-first (B, T, V) layout
        out_ref[:, t * vocab_p:(t + 1) * vocab_p] = out_t


# --------------------------------- wrapper ------------------------------------
def _round_up(n, m):
    return ((n + m - 1) // m) * m


@jax.jit
def pretraining_forward(x, output, params):
    B, T = x.shape
    V, D = params["emb"].shape
    H = params["w_hh"].shape[0]

    Bp = _round_up(B, 8)       # sublane alignment
    Dp = _round_up(D, 128)     # lane alignment (contraction dim, zero-padded)
    Hp = _round_up(H, 128)     # lane alignment: each gate = one whole 128-lane block
    Vp = _round_up(V, 128)     # lane-dense output stores

    f32 = jnp.float32

    # Embedding lookup (plain JAX gather), produced directly time-major; only the
    # tiny int32 id matrix is transposed -- no activation-tensor transposes.
    x_emb_tm = jnp.take(params["emb"], x.T, axis=0).astype(f32)          # (T, B, D)
    x_p = (jnp.zeros((T, Bp, Dp), f32)
           .at[:, :B, :D].set(x_emb_tm)
           .reshape(T * Bp, Dp))                                         # time-major flat

    h0_p = jnp.zeros((Bp, Hp), f32).at[:B, :H].set(output)

    # Gate-block-aligned padding: (.., 4, H) -> (.., 4, Hp) -> (.., 4*Hp).
    wih_p = (jnp.zeros((Dp, 4, Hp), f32)
             .at[:D, :, :H].set(params["w_ih"].reshape(D, 4, H))
             .reshape(Dp, 4 * Hp))
    whh_p = (jnp.zeros((Hp, 4, Hp), f32)
             .at[:H, :, :H].set(params["w_hh"].reshape(H, 4, H))
             .reshape(Hp, 4 * Hp))
    b_p = (jnp.zeros((4, Hp), f32)
           .at[:, :H].set((params["b_ih"] + params["b_hh"]).reshape(4, H))
           .reshape(1, 4 * Hp))

    wout_p = jnp.zeros((Hp, Vp), f32).at[:H, :V].set(params["w_out"])
    bout_p = jnp.zeros((1, Vp), f32).at[:, :V].set(params["b_out"].reshape(1, V))
    gamma_p = jnp.zeros((1, Vp), f32).at[:, :V].set(params["ln_gamma"].reshape(1, V))
    beta_p = jnp.zeros((1, Vp), f32).at[:, :V].set(params["ln_beta"].reshape(1, V))

    kernel = functools.partial(
        fused_lstm_head_kernel,
        seq_len=T, batch_p=Bp, hidden_p=Hp, vocab=V, vocab_p=Vp)

    out2 = pl.pallas_call(
        kernel,
        out_shape=jax.ShapeDtypeStruct((Bp, T * Vp), f32),
        grid_spec=pltpu.PrefetchScalarGridSpec(
            num_scalar_prefetch=0,
            grid=(1,),   # recurrence collapsed into one invocation (no per-step grid overhead)
            in_specs=[
                pl.BlockSpec((T * Bp, Dp), lambda i: (0, 0)),       # x (time-major flat)
                pl.BlockSpec((Bp, Hp), lambda i: (0, 0)),           # h0 (= c0)
                pl.BlockSpec((Dp, 4 * Hp), lambda i: (0, 0)),       # W_ih
                pl.BlockSpec((Hp, 4 * Hp), lambda i: (0, 0)),       # W_hh
                pl.BlockSpec((1, 4 * Hp), lambda i: (0, 0)),        # bias
                pl.BlockSpec((Hp, Vp), lambda i: (0, 0)),           # W_out
                pl.BlockSpec((1, Vp), lambda i: (0, 0)),            # b_out
                pl.BlockSpec((1, Vp), lambda i: (0, 0)),            # ln gamma
                pl.BlockSpec((1, Vp), lambda i: (0, 0)),            # ln beta
            ],
            out_specs=pl.BlockSpec((Bp, T * Vp), lambda i: (0, 0)),
        ),
        compiler_params=pltpu.CompilerParams(
            dimension_semantics=("arbitrary",)),
    )(x_p, h0_p, wih_p, whh_p, b_p, wout_p, bout_p, gamma_p, beta_p)

    # (Bp, T*Vp) row-major is exactly (Bp, T, Vp) row-major: free reshape, then unpad.
    return out2.reshape(Bp, T, Vp)[:B, :, :V]


# --------------------------------- params -------------------------------------
def init_params(key, input_dim, hidden_dim, vocab_size):
    ks = jax.random.split(key, 8)
    s = 0.1
    return {
        "emb":     jax.random.normal(ks[0], (vocab_size, input_dim), jnp.float32) * s,
        # PyTorch LSTM stores weight_ih as (4H, D); we keep the transposed (D, 4H)
        # so the kernel does x @ W_ih.  Gate order: i, f, g, o.
        "w_ih":    jax.random.normal(ks[1], (input_dim, 4 * hidden_dim), jnp.float32) * s,
        "w_hh":    jax.random.normal(ks[2], (hidden_dim, 4 * hidden_dim), jnp.float32) * s,
        "b_ih":    jax.random.normal(ks[3], (4 * hidden_dim,), jnp.float32) * s,
        "b_hh":    jax.random.normal(ks[4], (4 * hidden_dim,), jnp.float32) * s,
        "w_out":   jax.random.normal(ks[5], (hidden_dim, vocab_size), jnp.float32) * s,
        "b_out":   jax.random.normal(ks[6], (1, vocab_size), jnp.float32) * s,
        "ln_gamma": jnp.ones((1, vocab_size), jnp.float32),
        "ln_beta":  jnp.zeros((1, vocab_size), jnp.float32),
    }


if __name__ == "__main__":
    B, T = 2, 8
    INPUT_DIM, HIDDEN_DIM, VOCAB = 16, 32, 64

    key = jax.random.PRNGKey(0)
    k_tok, k_h0, k_par = jax.random.split(key, 3)

    x = jax.random.randint(k_tok, (B, T), 0, VOCAB, dtype=jnp.int32)       # token ids
    output = jax.random.normal(k_h0, (B, HIDDEN_DIM), jnp.float32) * 0.1    # h0 / c0
    params = init_params(k_par, INPUT_DIM, HIDDEN_DIM, VOCAB)

    logits = pretraining_forward(x, output, params)
    jax.block_until_ready(logits)
    assert logits.shape == (B, T, VOCAB)
    print("KERNEL_OK")
</pallas_src>

<mosaic_0001>
module attributes {stable_mosaic.version = 11 : i64} {
  func.func @fused_lstm_head_kernel(%arg0: i32, %arg1: memref<64x128xf32, #tpu.memory_space<vmem>>, %arg2: memref<8x128xf32, #tpu.memory_space<vmem>>, %arg3: memref<128x512xf32, #tpu.memory_space<vmem>>, %arg4: memref<128x512xf32, #tpu.memory_space<vmem>>, %arg5: memref<1x512xf32, #tpu.memory_space<vmem>>, %arg6: memref<128x128xf32, #tpu.memory_space<vmem>>, %arg7: memref<1x128xf32, #tpu.memory_space<vmem>>, %arg8: memref<1x128xf32, #tpu.memory_space<vmem>>, %arg9: memref<1x128xf32, #tpu.memory_space<vmem>>, %arg10: memref<8x1024xf32, #tpu.memory_space<vmem>>) attributes {dimension_semantics = [#tpu.dimension_semantics<arbitrary>], iteration_bounds = array<i64: 1>, scalar_prefetch = 0 : i64, scratch_operands = 0 : i64, tpu.core_type = #tpu.core_type<tc>, window_params = [{pipeline_mode = #tpu.pipeline_mode<synchronous>, transform_indices = @transform_0, window_bounds = array<i64: 64, 128>}, {pipeline_mode = #tpu.pipeline_mode<synchronous>, transform_indices = @transform_1, window_bounds = array<i64: 8, 128>}, {pipeline_mode = #tpu.pipeline_mode<synchronous>, transform_indices = @transform_2, window_bounds = array<i64: 128, 512>}, {pipeline_mode = #tpu.pipeline_mode<synchronous>, transform_indices = @transform_3, window_bounds = array<i64: 128, 512>}, {pipeline_mode = #tpu.pipeline_mode<synchronous>, transform_indices = @transform_4, window_bounds = array<i64: 1, 512>}, {pipeline_mode = #tpu.pipeline_mode<synchronous>, transform_indices = @transform_5, window_bounds = array<i64: 128, 128>}, {pipeline_mode = #tpu.pipeline_mode<synchronous>, transform_indices = @transform_6, window_bounds = array<i64: 1, 128>}, {pipeline_mode = #tpu.pipeline_mode<synchronous>, transform_indices = @transform_7, window_bounds = array<i64: 1, 128>}, {pipeline_mode = #tpu.pipeline_mode<synchronous>, transform_indices = @transform_8, window_bounds = array<i64: 1, 128>}, {pipeline_mode = #tpu.pipeline_mode<synchronous>, transform_indices = @transform_9, window_bounds = array<i64: 8, 1024>}]} {
    %c0 = arith.constant 0 : index
    %c0_0 = arith.constant 0 : index
    %0 = vector.load %arg3[%c0, %c0_0] : memref<128x512xf32, #tpu.memory_space<vmem>>, vector<128x512xf32>
    %c0_1 = arith.constant 0 : index
    %c0_2 = arith.constant 0 : index
    %1 = vector.load %arg4[%c0_1, %c0_2] : memref<128x512xf32, #tpu.memory_space<vmem>>, vector<128x512xf32>
    %c0_3 = arith.constant 0 : index
    %c0_4 = arith.constant 0 : index
    %2 = vector.load %arg5[%c0_3, %c0_4] : memref<1x512xf32, #tpu.memory_space<vmem>>, vector<1x512xf32>
    %c0_5 = arith.constant 0 : index
    %c0_6 = arith.constant 0 : index
    %3 = vector.load %arg6[%c0_5, %c0_6] : memref<128x128xf32, #tpu.memory_space<vmem>>, vector<128x128xf32>
    %c0_7 = arith.constant 0 : index
    %c0_8 = arith.constant 0 : index
    %4 = vector.load %arg7[%c0_7, %c0_8] : memref<1x128xf32, #tpu.memory_space<vmem>>, vector<1x128xf32>
    %c0_9 = arith.constant 0 : index
    %c0_10 = arith.constant 0 : index
    %5 = vector.load %arg8[%c0_9, %c0_10] : memref<1x128xf32, #tpu.memory_space<vmem>>, vector<1x128xf32>
    %c0_11 = arith.constant 0 : index
    %c0_12 = arith.constant 0 : index
    %6 = vector.load %arg9[%c0_11, %c0_12] : memref<1x128xf32, #tpu.memory_space<vmem>>, vector<1x128xf32>
    %c0_13 = arith.constant 0 : index
    %c0_14 = arith.constant 0 : index
    %7 = vector.load %arg1[%c0_13, %c0_14] : memref<64x128xf32, #tpu.memory_space<vmem>>, vector<64x128xf32>
    %cst = arith.constant dense<0.000000e+00> : vector<64x512xf32>
    %8 = tpu.matmul %7, %0, %cst {dimension_numbers = #tpu.dot_dimension_numbers<[1], [0], [0], [1], [0, 0, 1, 1], [], []>} : vector<64x128xf32>, vector<128x512xf32>, vector<64x512xf32> -> vector<64x512xf32>
    %9 = vector.broadcast %2 : vector<1x512xf32> to vector<64x512xf32>
    %10 = arith.addf %8, %9 : vector<64x512xf32>
    %11 = tpu.iota {dimensions = array<i32: 1>} : vector<8x128xi32>
    %c64_i32 = arith.constant 64 : i32
    %12 = vector.broadcast %c64_i32 : i32 to vector<8x128xi32>
    %13 = arith.cmpi slt, %11, %12 : vector<8x128xi32>
    %14 = arith.extui %13 : vector<8x128xi1> to vector<8x128xi32>
    %15 = arith.sitofp %14 : vector<8x128xi32> to vector<8x128xf32>
    %c0_15 = arith.constant 0 : index
    %c0_16 = arith.constant 0 : index
    %16 = vector.load %arg2[%c0_15, %c0_16] : memref<8x128xf32, #tpu.memory_space<vmem>>, vector<8x128xf32>
    %c0_17 = arith.constant 0 : index
    %c0_18 = arith.constant 0 : index
    %17 = vector.load %arg2[%c0_17, %c0_18] : memref<8x128xf32, #tpu.memory_space<vmem>>, vector<8x128xf32>
    %18 = vector.extract_strided_slice %10 {offsets = [0, 0], sizes = [8, 512], strides = [1, 1]} : vector<64x512xf32> to vector<8x512xf32>
    %cst_19 = arith.constant dense<0.000000e+00> : vector<8x512xf32>
    %19 = tpu.matmul %16, %1, %cst_19 {dimension_numbers = #tpu.dot_dimension_numbers<[1], [0], [0], [1], [0, 0, 1, 1], [], []>} : vector<8x128xf32>, vector<128x512xf32>, vector<8x512xf32> -> vector<8x512xf32>
    %20 = arith.addf %18, %19 : vector<8x512xf32>
    %21 = vector.extract_strided_slice %20 {offsets = [0, 0], sizes = [8, 128], strides = [1, 1]} : vector<8x512xf32> to vector<8x128xf32>
    %22 = arith.negf %21 : vector<8x128xf32>
    %23 = math.exp %22 : vector<8x128xf32>
    %cst_20 = arith.constant 1.000000e+00 : f32
    %24 = vector.broadcast %cst_20 : f32 to vector<8x128xf32>
    %25 = arith.addf %24, %23 : vector<8x128xf32>
    %26 = arith.divf %24, %25 : vector<8x128xf32>
    %27 = vector.extract_strided_slice %20 {offsets = [0, 128], sizes = [8, 128], strides = [1, 1]} : vector<8x512xf32> to vector<8x128xf32>
    %28 = arith.negf %27 : vector<8x128xf32>
    %29 = math.exp %28 : vector<8x128xf32>
    %cst_21 = arith.constant 1.000000e+00 : f32
    %30 = vector.broadcast %cst_21 : f32 to vector<8x128xf32>
    %31 = arith.addf %30, %29 : vector<8x128xf32>
    %32 = arith.divf %30, %31 : vector<8x128xf32>
    %33 = vector.extract_strided_slice %20 {offsets = [0, 256], sizes = [8, 128], strides = [1, 1]} : vector<8x512xf32> to vector<8x128xf32>
    %34 = math.tanh %33 : vector<8x128xf32>
    %35 = vector.extract_strided_slice %20 {offsets = [0, 384], sizes = [8, 128], strides = [1, 1]} : vector<8x512xf32> to vector<8x128xf32>
    %36 = arith.negf %35 : vector<8x128xf32>
    %37 = math.exp %36 : vector<8x128xf32>
    %cst_22 = arith.constant 1.000000e+00 : f32
    %38 = vector.broadcast %cst_22 : f32 to vector<8x128xf32>
    %39 = arith.addf %38, %37 : vector<8x128xf32>
    %40 = arith.divf %38, %39 : vector<8x128xf32>
    %41 = arith.mulf %32, %17 : vector<8x128xf32>
    %42 = arith.mulf %26, %34 : vector<8x128xf32>
    %43 = arith.addf %41, %42 : vector<8x128xf32>
    %44 = math.tanh %43 : vector<8x128xf32>
    %45 = arith.mulf %40, %44 : vector<8x128xf32>
    %cst_23 = arith.constant dense<0.000000e+00> : vector<8x128xf32>
    %46 = tpu.matmul %45, %3, %cst_23 {dimension_numbers = #tpu.dot_dimension_numbers<[1], [0], [0], [1], [0, 0, 1, 1], [], []>} : vector<8x128xf32>, vector<128x128xf32>, vector<8x128xf32> -> vector<8x128xf32>
    %47 = vector.broadcast %4 : vector<1x128xf32> to vector<8x128xf32>
    %48 = arith.addf %46, %47 : vector<8x128xf32>
    %49 = arith.mulf %48, %15 : vector<8x128xf32>
    %cst_24 = arith.constant dense<0.000000e+00> : vector<8xf32>
    %50 = vector.multi_reduction <add>, %49, %cst_24 [1] : vector<8x128xf32> to vector<8xf32>
    %51 = vector.shape_cast %50 : vector<8xf32> to vector<8x1xf32>
    %cst_25 = arith.constant 1.562500e-02 : f32
    %52 = vector.broadcast %cst_25 : f32 to vector<8x1xf32>
    %53 = arith.mulf %51, %52 : vector<8x1xf32>
    %54 = vector.broadcast %53 : vector<8x1xf32> to vector<8x128xf32>
    %55 = arith.subf %48, %54 : vector<8x128xf32>
    %56 = arith.mulf %55, %15 : vector<8x128xf32>
    %57 = arith.mulf %56, %56 : vector<8x128xf32>
    %cst_26 = arith.constant dense<0.000000e+00> : vector<8xf32>
    %58 = vector.multi_reduction <add>, %57, %cst_26 [1] : vector<8x128xf32> to vector<8xf32>
    %59 = vector.shape_cast %58 : vector<8xf32> to vector<8x1xf32>
    %cst_27 = arith.constant 1.562500e-02 : f32
    %60 = vector.broadcast %cst_27 : f32 to vector<8x1xf32>
    %61 = arith.mulf %59, %60 : vector<8x1xf32>
    %62 = vector.broadcast %53 : vector<8x1xf32> to vector<8x128xf32>
    %63 = arith.subf %48, %62 : vector<8x128xf32>
    %cst_28 = arith.constant 9.99999974E-6 : f32
    %64 = vector.broadcast %cst_28 : f32 to vector<8x1xf32>
    %65 = arith.addf %61, %64 : vector<8x1xf32>
    %66 = math.rsqrt %65 : vector<8x1xf32>
    %67 = vector.broadcast %66 : vector<8x1xf32> to vector<8x128xf32>
    %68 = arith.mulf %63, %67 : vector<8x128xf32>
    %69 = vector.broadcast %5 : vector<1x128xf32> to vector<8x128xf32>
    %70 = arith.mulf %68, %69 : vector<8x128xf32>
    %71 = vector.broadcast %6 : vector<1x128xf32> to vector<8x128xf32>
    %72 = arith.addf %70, %71 : vector<8x128xf32>
    %c0_29 = arith.constant 0 : index
    %c0_30 = arith.constant 0 : index
    %73 = vector.load %arg10[%c0_29, %c0_30] : memref<8x1024xf32, #tpu.memory_space<vmem>>, vector<8x128xf32>
    tpu.vector_store %arg10[%c0_29, %c0_30], %72 {strides = array<i32>} : memref<8x1024xf32, #tpu.memory_space<vmem>>, vector<8x128xf32>,
    %74 = vector.extract_strided_slice %10 {offsets = [8, 0], sizes = [8, 512], strides = [1, 1]} : vector<64x512xf32> to vector<8x512xf32>
    %cst_31 = arith.constant dense<0.000000e+00> : vector<8x512xf32>
    %75 = tpu.matmul %45, %1, %cst_31 {dimension_numbers = #tpu.dot_dimension_numbers<[1], [0], [0], [1], [0, 0, 1, 1], [], []>} : vector<8x128xf32>, vector<128x512xf32>, vector<8x512xf32> -> vector<8x512xf32>
    %76 = arith.addf %74, %75 : vector<8x512xf32>
    %77 = vector.extract_strided_slice %76 {offsets = [0, 0], sizes = [8, 128], strides = [1, 1]} : vector<8x512xf32> to vector<8x128xf32>
    %78 = arith.negf %77 : vector<8x128xf32>
    %79 = math.exp %78 : vector<8x128xf32>
    %cst_32 = arith.constant 1.000000e+00 : f32
    %80 = vector.broadcast %cst_32 : f32 to vector<8x128xf32>
    %81 = arith.addf %80, %79 : vector<8x128xf32>
    %82 = arith.divf %80, %81 : vector<8x128xf32>
    %83 = vector.extract_strided_slice %76 {offsets = [0, 128], sizes = [8, 128], strides = [1, 1]} : vector<8x512xf32> to vector<8x128xf32>
    %84 = arith.negf %83 : vector<8x128xf32>
    %85 = math.exp %84 : vector<8x128xf32>
    %cst_33 = arith.constant 1.000000e+00 : f32
    %86 = vector.broadcast %cst_33 : f32 to vector<8x128xf32>
    %87 = arith.addf %86, %85 : vector<8x128xf32>
    %88 = arith.divf %86, %87 : vector<8x128xf32>
    %89 = vector.extract_strided_slice %76 {offsets = [0, 256], sizes = [8, 128], strides = [1, 1]} : vector<8x512xf32> to vector<8x128xf32>
    %90 = math.tanh %89 : vector<8x128xf32>
    %91 = vector.extract_strided_slice %76 {offsets = [0, 384], sizes = [8, 128], strides = [1, 1]} : vector<8x512xf32> to vector<8x128xf32>
    %92 = arith.negf %91 : vector<8x128xf32>
    %93 = math.exp %92 : vector<8x128xf32>
    %cst_34 = arith.constant 1.000000e+00 : f32
    %94 = vector.broadcast %cst_34 : f32 to vector<8x128xf32>
    %95 = arith.addf %94, %93 : vector<8x128xf32>
    %96 = arith.divf %94, %95 : vector<8x128xf32>
    %97 = arith.mulf %88, %43 : vector<8x128xf32>
    %98 = arith.mulf %82, %90 : vector<8x128xf32>
    %99 = arith.addf %97, %98 : vector<8x128xf32>
    %100 = math.tanh %99 : vector<8x128xf32>
    %101 = arith.mulf %96, %100 : vector<8x128xf32>
    %cst_35 = arith.constant dense<0.000000e+00> : vector<8x128xf32>
    %102 = tpu.matmul %101, %3, %cst_35 {dimension_numbers = #tpu.dot_dimension_numbers<[1], [0], [0], [1], [0, 0, 1, 1], [], []>} : vector<8x128xf32>, vector<128x128xf32>, vector<8x128xf32> -> vector<8x128xf32>
    %103 = vector.broadcast %4 : vector<1x128xf32> to vector<8x128xf32>
    %104 = arith.addf %102, %103 : vector<8x128xf32>
    %105 = arith.mulf %104, %15 : vector<8x128xf32>
    %cst_36 = arith.constant dense<0.000000e+00> : vector<8xf32>
    %106 = vector.multi_reduction <add>, %105, %cst_36 [1] : vector<8x128xf32> to vector<8xf32>
    %107 = vector.shape_cast %106 : vector<8xf32> to vector<8x1xf32>
    %cst_37 = arith.constant 1.562500e-02 : f32
    %108 = vector.broadcast %cst_37 : f32 to vector<8x1xf32>
    %109 = arith.mulf %107, %108 : vector<8x1xf32>
    %110 = vector.broadcast %109 : vector<8x1xf32> to vector<8x128xf32>
    %111 = arith.subf %104, %110 : vector<8x128xf32>
    %112 = arith.mulf %111, %15 : vector<8x128xf32>
    %113 = arith.mulf %112, %112 : vector<8x128xf32>
    %cst_38 = arith.constant dense<0.000000e+00> : vector<8xf32>
    %114 = vector.multi_reduction <add>, %113, %cst_38 [1] : vector<8x128xf32> to vector<8xf32>
    %115 = vector.shape_cast %114 : vector<8xf32> to vector<8x1xf32>
    %cst_39 = arith.constant 1.562500e-02 : f32
    %116 = vector.broadcast %cst_39 : f32 to vector<8x1xf32>
    %117 = arith.mulf %115, %116 : vector<8x1xf32>
    %118 = vector.broadcast %109 : vector<8x1xf32> to vector<8x128xf32>
    %119 = arith.subf %104, %118 : vector<8x128xf32>
    %cst_40 = arith.constant 9.99999974E-6 : f32
    %120 = vector.broadcast %cst_40 : f32 to vector<8x1xf32>
    %121 = arith.addf %117, %120 : vector<8x1xf32>
    %122 = math.rsqrt %121 : vector<8x1xf32>
    %123 = vector.broadcast %122 : vector<8x1xf32> to vector<8x128xf32>
    %124 = arith.mulf %119, %123 : vector<8x128xf32>
    %125 = vector.broadcast %5 : vector<1x128xf32> to vector<8x128xf32>
    %126 = arith.mulf %124, %125 : vector<8x128xf32>
    %127 = vector.broadcast %6 : vector<1x128xf32> to vector<8x128xf32>
    %128 = arith.addf %126, %127 : vector<8x128xf32>
    %c0_41 = arith.constant 0 : index
    %c128 = arith.constant 128 : index
    %129 = vector.load %arg10[%c0_41, %c128] : memref<8x1024xf32, #tpu.memory_space<vmem>>, vector<8x128xf32>
    tpu.vector_store %arg10[%c0_41, %c128], %128 {strides = array<i32>} : memref<8x1024xf32, #tpu.memory_space<vmem>>, vector<8x128xf32>,
    %130 = vector.extract_strided_slice %10 {offsets = [16, 0], sizes = [8, 512], strides = [1, 1]} : vector<64x512xf32> to vector<8x512xf32>
    %cst_42 = arith.constant dense<0.000000e+00> : vector<8x512xf32>
    %131 = tpu.matmul %101, %1, %cst_42 {dimension_numbers = #tpu.dot_dimension_numbers<[1], [0], [0], [1], [0, 0, 1, 1], [], []>} : vector<8x128xf32>, vector<128x512xf32>, vector<8x512xf32> -> vector<8x512xf32>
    %132 = arith.addf %130, %131 : vector<8x512xf32>
    %133 = vector.extract_strided_slice %132 {offsets = [0, 0], sizes = [8, 128], strides = [1, 1]} : vector<8x512xf32> to vector<8x128xf32>
    %134 = arith.negf %133 : vector<8x128xf32>
    %135 = math.exp %134 : vector<8x128xf32>
    %cst_43 = arith.constant 1.000000e+00 : f32
    %136 = vector.broadcast %cst_43 : f32 to vector<8x128xf32>
    %137 = arith.addf %136, %135 : vector<8x128xf32>
    %138 = arith.divf %136, %137 : vector<8x128xf32>
    %139 = vector.extract_strided_slice %132 {offsets = [0, 128], sizes = [8, 128], strides = [1, 1]} : vector<8x512xf32> to vector<8x128xf32>
    %140 = arith.negf %139 : vector<8x128xf32>
    %141 = math.exp %140 : vector<8x128xf32>
    %cst_44 = arith.constant 1.000000e+00 : f32
    %142 = vector.broadcast %cst_44 : f32 to vector<8x128xf32>
    %143 = arith.addf %142, %141 : vector<8x128xf32>
    %144 = arith.divf %142, %143 : vector<8x128xf32>
    %145 = vector.extract_strided_slice %132 {offsets = [0, 256], sizes = [8, 128], strides = [1, 1]} : vector<8x512xf32> to vector<8x128xf32>
    %146 = math.tanh %145 : vector<8x128xf32>
    %147 = vector.extract_strided_slice %132 {offsets = [0, 384], sizes = [8, 128], strides = [1, 1]} : vector<8x512xf32> to vector<8x128xf32>
    %148 = arith.negf %147 : vector<8x128xf32>
    %149 = math.exp %148 : vector<8x128xf32>
    %cst_45 = arith.constant 1.000000e+00 : f32
    %150 = vector.broadcast %cst_45 : f32 to vector<8x128xf32>
    %151 = arith.addf %150, %149 : vector<8x128xf32>
    %152 = arith.divf %150, %151 : vector<8x128xf32>
    %153 = arith.mulf %144, %99 : vector<8x128xf32>
    %154 = arith.mulf %138, %146 : vector<8x128xf32>
    %155 = arith.addf %153, %154 : vector<8x128xf32>
    %156 = math.tanh %155 : vector<8x128xf32>
    %157 = arith.mulf %152, %156 : vector<8x128xf32>
    %cst_46 = arith.constant dense<0.000000e+00> : vector<8x128xf32>
    %158 = tpu.matmul %157, %3, %cst_46 {dimension_numbers = #tpu.dot_dimension_numbers<[1], [0], [0], [1], [0, 0, 1, 1], [], []>} : vector<8x128xf32>, vector<128x128xf32>, vector<8x128xf32> -> vector<8x128xf32>
    %159 = vector.broadcast %4 : vector<1x128xf32> to vector<8x128xf32>
    %160 = arith.addf %158, %159 : vector<8x128xf32>
    %161 = arith.mulf %160, %15 : vector<8x128xf32>
    %cst_47 = arith.constant dense<0.000000e+00> : vector<8xf32>
    %162 = vector.multi_reduction <add>, %161, %cst_47 [1] : vector<8x128xf32> to vector<8xf32>
    %163 = vector.shape_cast %162 : vector<8xf32> to vector<8x1xf32>
    %cst_48 = arith.constant 1.562500e-02 : f32
    %164 = vector.broadcast %cst_48 : f32 to vector<8x1xf32>
    %165 = arith.mulf %163, %164 : vector<8x1xf32>
    %166 = vector.broadcast %165 : vector<8x1xf32> to vector<8x128xf32>
    %167 = arith.subf %160, %166 : vector<8x128xf32>
    %168 = arith.mulf %167, %15 : vector<8x128xf32>
    %169 = arith.mulf %168, %168 : vector<8x128xf32>
    %cst_49 = arith.constant dense<0.000000e+00> : vector<8xf32>
    %170 = vector.multi_reduction <add>, %169, %cst_49 [1] : vector<8x128xf32> to vector<8xf32>
    %171 = vector.shape_cast %170 : vector<8xf32> to vector<8x1xf32>
    %cst_50 = arith.constant 1.562500e-02 : f32
    %172 = vector.broadcast %cst_50 : f32 to vector<8x1xf32>
    %173 = arith.mulf %171, %172 : vector<8x1xf32>
    %174 = vector.broadcast %165 : vector<8x1xf32> to vector<8x128xf32>
    %175 = arith.subf %160, %174 : vector<8x128xf32>
    %cst_51 = arith.constant 9.99999974E-6 : f32
    %176 = vector.broadcast %cst_51 : f32 to vector<8x1xf32>
    %177 = arith.addf %173, %176 : vector<8x1xf32>
    %178 = math.rsqrt %177 : vector<8x1xf32>
    %179 = vector.broadcast %178 : vector<8x1xf32> to vector<8x128xf32>
    %180 = arith.mulf %175, %179 : vector<8x128xf32>
    %181 = vector.broadcast %5 : vector<1x128xf32> to vector<8x128xf32>
    %182 = arith.mulf %180, %181 : vector<8x128xf32>
    %183 = vector.broadcast %6 : vector<1x128xf32> to vector<8x128xf32>
    %184 = arith.addf %182, %183 : vector<8x128xf32>
    %c0_52 = arith.constant 0 : index
    %c256 = arith.constant 256 : index
    %185 = vector.load %arg10[%c0_52, %c256] : memref<8x1024xf32, #tpu.memory_space<vmem>>, vector<8x128xf32>
    tpu.vector_store %arg10[%c0_52, %c256], %184 {strides = array<i32>} : memref<8x1024xf32, #tpu.memory_space<vmem>>, vector<8x128xf32>,
    %186 = vector.extract_strided_slice %10 {offsets = [24, 0], sizes = [8, 512], strides = [1, 1]} : vector<64x512xf32> to vector<8x512xf32>
    %cst_53 = arith.constant dense<0.000000e+00> : vector<8x512xf32>
    %187 = tpu.matmul %157, %1, %cst_53 {dimension_numbers = #tpu.dot_dimension_numbers<[1], [0], [0], [1], [0, 0, 1, 1], [], []>} : vector<8x128xf32>, vector<128x512xf32>, vector<8x512xf32> -> vector<8x512xf32>
    %188 = arith.addf %186, %187 : vector<8x512xf32>
    %189 = vector.extract_strided_slice %188 {offsets = [0, 0], sizes = [8, 128], strides = [1, 1]} : vector<8x512xf32> to vector<8x128xf32>
    %190 = arith.negf %189 : vector<8x128xf32>
    %191 = math.exp %190 : vector<8x128xf32>
    %cst_54 = arith.constant 1.000000e+00 : f32
    %192 = vector.broadcast %cst_54 : f32 to vector<8x128xf32>
    %193 = arith.addf %192, %191 : vector<8x128xf32>
    %194 = arith.divf %192, %193 : vector<8x128xf32>
    %195 = vector.extract_strided_slice %188 {offsets = [0, 128], sizes = [8, 128], strides = [1, 1]} : vector<8x512xf32> to vector<8x128xf32>
    %196 = arith.negf %195 : vector<8x128xf32>
    %197 = math.exp %196 : vector<8x128xf32>
    %cst_55 = arith.constant 1.000000e+00 : f32
    %198 = vector.broadcast %cst_55 : f32 to vector<8x128xf32>
    %199 = arith.addf %198, %197 : vector<8x128xf32>
    %200 = arith.divf %198, %199 : vector<8x128xf32>
    %201 = vector.extract_strided_slice %188 {offsets = [0, 256], sizes = [8, 128], strides = [1, 1]} : vector<8x512xf32> to vector<8x128xf32>
    %202 = math.tanh %201 : vector<8x128xf32>
    %203 = vector.extract_strided_slice %188 {offsets = [0, 384], sizes = [8, 128], strides = [1, 1]} : vector<8x512xf32> to vector<8x128xf32>
    %204 = arith.negf %203 : vector<8x128xf32>
    %205 = math.exp %204 : vector<8x128xf32>
    %cst_56 = arith.constant 1.000000e+00 : f32
    %206 = vector.broadcast %cst_56 : f32 to vector<8x128xf32>
    %207 = arith.addf %206, %205 : vector<8x128xf32>
    %208 = arith.divf %206, %207 : vector<8x128xf32>
    %209 = arith.mulf %200, %155 : vector<8x128xf32>
    %210 = arith.mulf %194, %202 : vector<8x128xf32>
    %211 = arith.addf %209, %210 : vector<8x128xf32>
    %212 = math.tanh %211 : vector<8x128xf32>
    %213 = arith.mulf %208, %212 : vector<8x128xf32>
    %cst_57 = arith.constant dense<0.000000e+00> : vector<8x128xf32>
    %214 = tpu.matmul %213, %3, %cst_57 {dimension_numbers = #tpu.dot_dimension_numbers<[1], [0], [0], [1], [0, 0, 1, 1], [], []>} : vector<8x128xf32>, vector<128x128xf32>, vector<8x128xf32> -> vector<8x128xf32>
    %215 = vector.broadcast %4 : vector<1x128xf32> to vector<8x128xf32>
    %216 = arith.addf %214, %215 : vector<8x128xf32>
    %217 = arith.mulf %216, %15 : vector<8x128xf32>
    %cst_58 = arith.constant dense<0.000000e+00> : vector<8xf32>
    %218 = vector.multi_reduction <add>, %217, %cst_58 [1] : vector<8x128xf32> to vector<8xf32>
    %219 = vector.shape_cast %218 : vector<8xf32> to vector<8x1xf32>
    %cst_59 = arith.constant 1.562500e-02 : f32
    %220 = vector.broadcast %cst_59 : f32 to vector<8x1xf32>
    %221 = arith.mulf %219, %220 : vector<8x1xf32>
    %222 = vector.broadcast %221 : vector<8x1xf32> to vector<8x128xf32>
    %223 = arith.subf %216, %222 : vector<8x128xf32>
    %224 = arith.mulf %223, %15 : vector<8x128xf32>
    %225 = arith.mulf %224, %224 : vector<8x128xf32>
    %cst_60 = arith.constant dense<0.000000e+00> : vector<8xf32>
    %226 = vector.multi_reduction <add>, %225, %cst_60 [1] : vector<8x128xf32> to vector<8xf32>
    %227 = vector.shape_cast %226 : vector<8xf32> to vector<8x1xf32>
    %cst_61 = arith.constant 1.562500e-02 : f32
    %228 = vector.broadcast %cst_61 : f32 to vector<8x1xf32>
    %229 = arith.mulf %227, %228 : vector<8x1xf32>
    %230 = vector.broadcast %221 : vector<8x1xf32> to vector<8x128xf32>
    %231 = arith.subf %216, %230 : vector<8x128xf32>
    %cst_62 = arith.constant 9.99999974E-6 : f32
    %232 = vector.broadcast %cst_62 : f32 to vector<8x1xf32>
    %233 = arith.addf %229, %232 : vector<8x1xf32>
    %234 = math.rsqrt %233 : vector<8x1xf32>
    %235 = vector.broadcast %234 : vector<8x1xf32> to vector<8x128xf32>
    %236 = arith.mulf %231, %235 : vector<8x128xf32>
    %237 = vector.broadcast %5 : vector<1x128xf32> to vector<8x128xf32>
    %238 = arith.mulf %236, %237 : vector<8x128xf32>
    %239 = vector.broadcast %6 : vector<1x128xf32> to vector<8x128xf32>
    %240 = arith.addf %238, %239 : vector<8x128xf32>
    %c0_63 = arith.constant 0 : index
    %c384 = arith.constant 384 : index
    %241 = vector.load %arg10[%c0_63, %c384] : memref<8x1024xf32, #tpu.memory_space<vmem>>, vector<8x128xf32>
    tpu.vector_store %arg10[%c0_63, %c384], %240 {strides = array<i32>} : memref<8x1024xf32, #tpu.memory_space<vmem>>, vector<8x128xf32>,
    %242 = vector.extract_strided_slice %10 {offsets = [32, 0], sizes = [8, 512], strides = [1, 1]} : vector<64x512xf32> to vector<8x512xf32>
    %cst_64 = arith.constant dense<0.000000e+00> : vector<8x512xf32>
    %243 = tpu.matmul %213, %1, %cst_64 {dimension_numbers = #tpu.dot_dimension_numbers<[1], [0], [0], [1], [0, 0, 1, 1], [], []>} : vector<8x128xf32>, vector<128x512xf32>, vector<8x512xf32> -> vector<8x512xf32>
    %244 = arith.addf %242, %243 : vector<8x512xf32>
    %245 = vector.extract_strided_slice %244 {offsets = [0, 0], sizes = [8, 128], strides = [1, 1]} : vector<8x512xf32> to vector<8x128xf32>
    %246 = arith.negf %245 : vector<8x128xf32>
    %247 = math.exp %246 : vector<8x128xf32>
    %cst_65 = arith.constant 1.000000e+00 : f32
    %248 = vector.broadcast %cst_65 : f32 to vector<8x128xf32>
    %249 = arith.addf %248, %247 : vector<8x128xf32>
    %250 = arith.divf %248, %249 : vector<8x128xf32>
    %251 = vector.extract_strided_slice %244 {offsets = [0, 128], sizes = [8, 128], strides = [1, 1]} : vector<8x512xf32> to vector<8x128xf32>
    %252 = arith.negf %251 : vector<8x128xf32>
    %253 = math.exp %252 : vector<8x128xf32>
    %cst_66 = arith.constant 1.000000e+00 : f32
    %254 = vector.broadcast %cst_66 : f32 to vector<8x128xf32>
    %255 = arith.addf %254, %253 : vector<8x128xf32>
    %256 = arith.divf %254, %255 : vector<8x128xf32>
    %257 = vector.extract_strided_slice %244 {offsets = [0, 256], sizes = [8, 128], strides = [1, 1]} : vector<8x512xf32> to vector<8x128xf32>
    %258 = math.tanh %257 : vector<8x128xf32>
    %259 = vector.extract_strided_slice %244 {offsets = [0, 384], sizes = [8, 128], strides = [1, 1]} : vector<8x512xf32> to vector<8x128xf32>
    %260 = arith.negf %259 : vector<8x128xf32>
    %261 = math.exp %260 : vector<8x128xf32>
    %cst_67 = arith.constant 1.000000e+00 : f32
    %262 = vector.broadcast %cst_67 : f32 to vector<8x128xf32>
    %263 = arith.addf %262, %261 : vector<8x128xf32>
    %264 = arith.divf %262, %263 : vector<8x128xf32>
    %265 = arith.mulf %256, %211 : vector<8x128xf32>
    %266 = arith.mulf %250, %258 : vector<8x128xf32>
    %267 = arith.addf %265, %266 : vector<8x128xf32>
    %268 = math.tanh %267 : vector<8x128xf32>
    %269 = arith.mulf %264, %268 : vector<8x128xf32>
    %cst_68 = arith.constant dense<0.000000e+00> : vector<8x128xf32>
    %270 = tpu.matmul %269, %3, %cst_68 {dimension_numbers = #tpu.dot_dimension_numbers<[1], [0], [0], [1], [0, 0, 1, 1], [], []>} : vector<8x128xf32>, vector<128x128xf32>, vector<8x128xf32> -> vector<8x128xf32>
    %271 = vector.broadcast %4 : vector<1x128xf32> to vector<8x128xf32>
    %272 = arith.addf %270, %271 : vector<8x128xf32>
    %273 = arith.mulf %272, %15 : vector<8x128xf32>
    %cst_69 = arith.constant dense<0.000000e+00> : vector<8xf32>
    %274 = vector.multi_reduction <add>, %273, %cst_69 [1] : vector<8x128xf32> to vector<8xf32>
    %275 = vector.shape_cast %274 : vector<8xf32> to vector<8x1xf32>
    %cst_70 = arith.constant 1.562500e-02 : f32
    %276 = vector.broadcast %cst_70 : f32 to vector<8x1xf32>
    %277 = arith.mulf %275, %276 : vector<8x1xf32>
    %278 = vector.broadcast %277 : vector<8x1xf32> to vector<8x128xf32>
    %279 = arith.subf %272, %278 : vector<8x128xf32>
    %280 = arith.mulf %279, %15 : vector<8x128xf32>
    %281 = arith.mulf %280, %280 : vector<8x128xf32>
    %cst_71 = arith.constant dense<0.000000e+00> : vector<8xf32>
    %282 = vector.multi_reduction <add>, %281, %cst_71 [1] : vector<8x128xf32> to vector<8xf32>
    %283 = vector.shape_cast %282 : vector<8xf32> to vector<8x1xf32>
    %cst_72 = arith.constant 1.562500e-02 : f32
    %284 = vector.broadcast %cst_72 : f32 to vector<8x1xf32>
    %285 = arith.mulf %283, %284 : vector<8x1xf32>
    %286 = vector.broadcast %277 : vector<8x1xf32> to vector<8x128xf32>
    %287 = arith.subf %272, %286 : vector<8x128xf32>
    %cst_73 = arith.constant 9.99999974E-6 : f32
    %288 = vector.broadcast %cst_73 : f32 to vector<8x1xf32>
    %289 = arith.addf %285, %288 : vector<8x1xf32>
    %290 = math.rsqrt %289 : vector<8x1xf32>
    %291 = vector.broadcast %290 : vector<8x1xf32> to vector<8x128xf32>
    %292 = arith.mulf %287, %291 : vector<8x128xf32>
    %293 = vector.broadcast %5 : vector<1x128xf32> to vector<8x128xf32>
    %294 = arith.mulf %292, %293 : vector<8x128xf32>
    %295 = vector.broadcast %6 : vector<1x128xf32> to vector<8x128xf32>
    %296 = arith.addf %294, %295 : vector<8x128xf32>
    %c0_74 = arith.constant 0 : index
    %c512 = arith.constant 512 : index
    %297 = vector.load %arg10[%c0_74, %c512] : memref<8x1024xf32, #tpu.memory_space<vmem>>, vector<8x128xf32>
    tpu.vector_store %arg10[%c0_74, %c512], %296 {strides = array<i32>} : memref<8x1024xf32, #tpu.memory_space<vmem>>, vector<8x128xf32>,
    %298 = vector.extract_strided_slice %10 {offsets = [40, 0], sizes = [8, 512], strides = [1, 1]} : vector<64x512xf32> to vector<8x512xf32>
    %cst_75 = arith.constant dense<0.000000e+00> : vector<8x512xf32>
    %299 = tpu.matmul %269, %1, %cst_75 {dimension_numbers = #tpu.dot_dimension_numbers<[1], [0], [0], [1], [0, 0, 1, 1], [], []>} : vector<8x128xf32>, vector<128x512xf32>, vector<8x512xf32> -> vector<8x512xf32>
    %300 = arith.addf %298, %299 : vector<8x512xf32>
    %301 = vector.extract_strided_slice %300 {offsets = [0, 0], sizes = [8, 128], strides = [1, 1]} : vector<8x512xf32> to vector<8x128xf32>
    %302 = arith.negf %301 : vector<8x128xf32>
    %303 = math.exp %302 : vector<8x128xf32>
    %cst_76 = arith.constant 1.000000e+00 : f32
    %304 = vector.broadcast %cst_76 : f32 to vector<8x128xf32>
    %305 = arith.addf %304, %303 : vector<8x128xf32>
    %306 = arith.divf %304, %305 : vector<8x128xf32>
    %307 = vector.extract_strided_slice %300 {offsets = [0, 128], sizes = [8, 128], strides = [1, 1]} : vector<8x512xf32> to vector<8x128xf32>
    %308 = arith.negf %307 : vector<8x128xf32>
    %309 = math.exp %308 : vector<8x128xf32>
    %cst_77 = arith.constant 1.000000e+00 : f32
    %310 = vector.broadcast %cst_77 : f32 to vector<8x128xf32>
    %311 = arith.addf %310, %309 : vector<8x128xf32>
    %312 = arith.divf %310, %311 : vector<8x128xf32>
    %313 = vector.extract_strided_slice %300 {offsets = [0, 256], sizes = [8, 128], strides = [1, 1]} : vector<8x512xf32> to vector<8x128xf32>
    %314 = math.tanh %313 : vector<8x128xf32>
    %315 = vector.extract_strided_slice %300 {offsets = [0, 384], sizes = [8, 128], strides = [1, 1]} : vector<8x512xf32> to vector<8x128xf32>
    %316 = arith.negf %315 : vector<8x128xf32>
    %317 = math.exp %316 : vector<8x128xf32>
    %cst_78 = arith.constant 1.000000e+00 : f32
    %318 = vector.broadcast %cst_78 : f32 to vector<8x128xf32>
    %319 = arith.addf %318, %317 : vector<8x128xf32>
    %320 = arith.divf %318, %319 : vector<8x128xf32>
    %321 = arith.mulf %312, %267 : vector<8x128xf32>
    %322 = arith.mulf %306, %314 : vector<8x128xf32>
    %323 = arith.addf %321, %322 : vector<8x128xf32>
    %324 = math.tanh %323 : vector<8x128xf32>
    %325 = arith.mulf %320, %324 : vector<8x128xf32>
    %cst_79 = arith.constant dense<0.000000e+00> : vector<8x128xf32>
    %326 = tpu.matmul %325, %3, %cst_79 {dimension_numbers = #tpu.dot_dimension_numbers<[1], [0], [0], [1], [0, 0, 1, 1], [], []>} : vector<8x128xf32>, vector<128x128xf32>, vector<8x128xf32> -> vector<8x128xf32>
    %327 = vector.broadcast %4 : vector<1x128xf32> to vector<8x128xf32>
    %328 = arith.addf %326, %327 : vector<8x128xf32>
    %329 = arith.mulf %328, %15 : vector<8x128xf32>
    %cst_80 = arith.constant dense<0.000000e+00> : vector<8xf32>
    %330 = vector.multi_reduction <add>, %329, %cst_80 [1] : vector<8x128xf32> to vector<8xf32>
    %331 = vector.shape_cast %330 : vector<8xf32> to vector<8x1xf32>
    %cst_81 = arith.constant 1.562500e-02 : f32
    %332 = vector.broadcast %cst_81 : f32 to vector<8x1xf32>
    %333 = arith.mulf %331, %332 : vector<8x1xf32>
    %334 = vector.broadcast %333 : vector<8x1xf32> to vector<8x128xf32>
    %335 = arith.subf %328, %334 : vector<8x128xf32>
    %336 = arith.mulf %335, %15 : vector<8x128xf32>
    %337 = arith.mulf %336, %336 : vector<8x128xf32>
    %cst_82 = arith.constant dense<0.000000e+00> : vector<8xf32>
    %338 = vector.multi_reduction <add>, %337, %cst_82 [1] : vector<8x128xf32> to vector<8xf32>
    %339 = vector.shape_cast %338 : vector<8xf32> to vector<8x1xf32>
    %cst_83 = arith.constant 1.562500e-02 : f32
    %340 = vector.broadcast %cst_83 : f32 to vector<8x1xf32>
    %341 = arith.mulf %339, %340 : vector<8x1xf32>
    %342 = vector.broadcast %333 : vector<8x1xf32> to vector<8x128xf32>
    %343 = arith.subf %328, %342 : vector<8x128xf32>
    %cst_84 = arith.constant 9.99999974E-6 : f32
    %344 = vector.broadcast %cst_84 : f32 to vector<8x1xf32>
    %345 = arith.addf %341, %344 : vector<8x1xf32>
    %346 = math.rsqrt %345 : vector<8x1xf32>
    %347 = vector.broadcast %346 : vector<8x1xf32> to vector<8x128xf32>
    %348 = arith.mulf %343, %347 : vector<8x128xf32>
    %349 = vector.broadcast %5 : vector<1x128xf32> to vector<8x128xf32>
    %350 = arith.mulf %348, %349 : vector<8x128xf32>
    %351 = vector.broadcast %6 : vector<1x128xf32> to vector<8x128xf32>
    %352 = arith.addf %350, %351 : vector<8x128xf32>
    %c0_85 = arith.constant 0 : index
    %c640 = arith.constant 640 : index
    %353 = vector.load %arg10[%c0_85, %c640] : memref<8x1024xf32, #tpu.memory_space<vmem>>, vector<8x128xf32>
    tpu.vector_store %arg10[%c0_85, %c640], %352 {strides = array<i32>} : memref<8x1024xf32, #tpu.memory_space<vmem>>, vector<8x128xf32>,
    %354 = vector.extract_strided_slice %10 {offsets = [48, 0], sizes = [8, 512], strides = [1, 1]} : vector<64x512xf32> to vector<8x512xf32>
    %cst_86 = arith.constant dense<0.000000e+00> : vector<8x512xf32>
    %355 = tpu.matmul %325, %1, %cst_86 {dimension_numbers = #tpu.dot_dimension_numbers<[1], [0], [0], [1], [0, 0, 1, 1], [], []>} : vector<8x128xf32>, vector<128x512xf32>, vector<8x512xf32> -> vector<8x512xf32>
    %356 = arith.addf %354, %355 : vector<8x512xf32>
    %357 = vector.extract_strided_slice %356 {offsets = [0, 0], sizes = [8, 128], strides = [1, 1]} : vector<8x512xf32> to vector<8x128xf32>
    %358 = arith.negf %357 : vector<8x128xf32>
    %359 = math.exp %358 : vector<8x128xf32>
    %cst_87 = arith.constant 1.000000e+00 : f32
    %360 = vector.broadcast %cst_87 : f32 to vector<8x128xf32>
    %361 = arith.addf %360, %359 : vector<8x128xf32>
    %362 = arith.divf %360, %361 : vector<8x128xf32>
    %363 = vector.extract_strided_slice %356 {offsets = [0, 128], sizes = [8, 128], strides = [1, 1]} : vector<8x512xf32> to vector<8x128xf32>
    %364 = arith.negf %363 : vector<8x128xf32>
    %365 = math.exp %364 : vector<8x128xf32>
    %cst_88 = arith.constant 1.000000e+00 : f32
    %366 = vector.broadcast %cst_88 : f32 to vector<8x128xf32>
    %367 = arith.addf %366, %365 : vector<8x128xf32>
    %368 = arith.divf %366, %367 : vector<8x128xf32>
    %369 = vector.extract_strided_slice %356 {offsets = [0, 256], sizes = [8, 128], strides = [1, 1]} : vector<8x512xf32> to vector<8x128xf32>
    %370 = math.tanh %369 : vector<8x128xf32>
    %371 = vector.extract_strided_slice %356 {offsets = [0, 384], sizes = [8, 128], strides = [1, 1]} : vector<8x512xf32> to vector<8x128xf32>
    %372 = arith.negf %371 : vector<8x128xf32>
    %373 = math.exp %372 : vector<8x128xf32>
    %cst_89 = arith.constant 1.000000e+00 : f32
    %374 = vector.broadcast %cst_89 : f32 to vector<8x128xf32>
    %375 = arith.addf %374, %373 : vector<8x128xf32>
    %376 = arith.divf %374, %375 : vector<8x128xf32>
    %377 = arith.mulf %368, %323 : vector<8x128xf32>
    %378 = arith.mulf %362, %370 : vector<8x128xf32>
    %379 = arith.addf %377, %378 : vector<8x128xf32>
    %380 = math.tanh %379 : vector<8x128xf32>
    %381 = arith.mulf %376, %380 : vector<8x128xf32>
    %cst_90 = arith.constant dense<0.000000e+00> : vector<8x128xf32>
    %382 = tpu.matmul %381, %3, %cst_90 {dimension_numbers = #tpu.dot_dimension_numbers<[1], [0], [0], [1], [0, 0, 1, 1], [], []>} : vector<8x128xf32>, vector<128x128xf32>, vector<8x128xf32> -> vector<8x128xf32>
    %383 = vector.broadcast %4 : vector<1x128xf32> to vector<8x128xf32>
    %384 = arith.addf %382, %383 : vector<8x128xf32>
    %385 = arith.mulf %384, %15 : vector<8x128xf32>
    %cst_91 = arith.constant dense<0.000000e+00> : vector<8xf32>
    %386 = vector.multi_reduction <add>, %385, %cst_91 [1] : vector<8x128xf32> to vector<8xf32>
    %387 = vector.shape_cast %386 : vector<8xf32> to vector<8x1xf32>
    %cst_92 = arith.constant 1.562500e-02 : f32
    %388 = vector.broadcast %cst_92 : f32 to vector<8x1xf32>
    %389 = arith.mulf %387, %388 : vector<8x1xf32>
    %390 = vector.broadcast %389 : vector<8x1xf32> to vector<8x128xf32>
    %391 = arith.subf %384, %390 : vector<8x128xf32>
    %392 = arith.mulf %391, %15 : vector<8x128xf32>
    %393 = arith.mulf %392, %392 : vector<8x128xf32>
    %cst_93 = arith.constant dense<0.000000e+00> : vector<8xf32>
    %394 = vector.multi_reduction <add>, %393, %cst_93 [1] : vector<8x128xf32> to vector<8xf32>
    %395 = vector.shape_cast %394 : vector<8xf32> to vector<8x1xf32>
    %cst_94 = arith.constant 1.562500e-02 : f32
    %396 = vector.broadcast %cst_94 : f32 to vector<8x1xf32>
    %397 = arith.mulf %395, %396 : vector<8x1xf32>
    %398 = vector.broadcast %389 : vector<8x1xf32> to vector<8x128xf32>
    %399 = arith.subf %384, %398 : vector<8x128xf32>
    %cst_95 = arith.constant 9.99999974E-6 : f32
    %400 = vector.broadcast %cst_95 : f32 to vector<8x1xf32>
    %401 = arith.addf %397, %400 : vector<8x1xf32>
    %402 = math.rsqrt %401 : vector<8x1xf32>
    %403 = vector.broadcast %402 : vector<8x1xf32> to vector<8x128xf32>
    %404 = arith.mulf %399, %403 : vector<8x128xf32>
    %405 = vector.broadcast %5 : vector<1x128xf32> to vector<8x128xf32>
    %406 = arith.mulf %404, %405 : vector<8x128xf32>
    %407 = vector.broadcast %6 : vector<1x128xf32> to vector<8x128xf32>
    %408 = arith.addf %406, %407 : vector<8x128xf32>
    %c0_96 = arith.constant 0 : index
    %c768 = arith.constant 768 : index
    %409 = vector.load %arg10[%c0_96, %c768] : memref<8x1024xf32, #tpu.memory_space<vmem>>, vector<8x128xf32>
    tpu.vector_store %arg10[%c0_96, %c768], %408 {strides = array<i32>} : memref<8x1024xf32, #tpu.memory_space<vmem>>, vector<8x128xf32>,
    %410 = vector.extract_strided_slice %10 {offsets = [56, 0], sizes = [8, 512], strides = [1, 1]} : vector<64x512xf32> to vector<8x512xf32>
    %cst_97 = arith.constant dense<0.000000e+00> : vector<8x512xf32>
    %411 = tpu.matmul %381, %1, %cst_97 {dimension_numbers = #tpu.dot_dimension_numbers<[1], [0], [0], [1], [0, 0, 1, 1], [], []>} : vector<8x128xf32>, vector<128x512xf32>, vector<8x512xf32> -> vector<8x512xf32>
    %412 = arith.addf %410, %411 : vector<8x512xf32>
    %413 = vector.extract_strided_slice %412 {offsets = [0, 0], sizes = [8, 128], strides = [1, 1]} : vector<8x512xf32> to vector<8x128xf32>
    %414 = arith.negf %413 : vector<8x128xf32>
    %415 = math.exp %414 : vector<8x128xf32>
    %cst_98 = arith.constant 1.000000e+00 : f32
    %416 = vector.broadcast %cst_98 : f32 to vector<8x128xf32>
    %417 = arith.addf %416, %415 : vector<8x128xf32>
    %418 = arith.divf %416, %417 : vector<8x128xf32>
    %419 = vector.extract_strided_slice %412 {offsets = [0, 128], sizes = [8, 128], strides = [1, 1]} : vector<8x512xf32> to vector<8x128xf32>
    %420 = arith.negf %419 : vector<8x128xf32>
    %421 = math.exp %420 : vector<8x128xf32>
    %cst_99 = arith.constant 1.000000e+00 : f32
    %422 = vector.broadcast %cst_99 : f32 to vector<8x128xf32>
    %423 = arith.addf %422, %421 : vector<8x128xf32>
    %424 = arith.divf %422, %423 : vector<8x128xf32>
    %425 = vector.extract_strided_slice %412 {offsets = [0, 256], sizes = [8, 128], strides = [1, 1]} : vector<8x512xf32> to vector<8x128xf32>
    %426 = math.tanh %425 : vector<8x128xf32>
    %427 = vector.extract_strided_slice %412 {offsets = [0, 384], sizes = [8, 128], strides = [1, 1]} : vector<8x512xf32> to vector<8x128xf32>
    %428 = arith.negf %427 : vector<8x128xf32>
    %429 = math.exp %428 : vector<8x128xf32>
    %cst_100 = arith.constant 1.000000e+00 : f32
    %430 = vector.broadcast %cst_100 : f32 to vector<8x128xf32>
    %431 = arith.addf %430, %429 : vector<8x128xf32>
    %432 = arith.divf %430, %431 : vector<8x128xf32>
    %433 = arith.mulf %424, %379 : vector<8x128xf32>
    %434 = arith.mulf %418, %426 : vector<8x128xf32>
    %435 = arith.addf %433, %434 : vector<8x128xf32>
    %436 = math.tanh %435 : vector<8x128xf32>
    %437 = arith.mulf %432, %436 : vector<8x128xf32>
    %cst_101 = arith.constant dense<0.000000e+00> : vector<8x128xf32>
    %438 = tpu.matmul %437, %3, %cst_101 {dimension_numbers = #tpu.dot_dimension_numbers<[1], [0], [0], [1], [0, 0, 1, 1], [], []>} : vector<8x128xf32>, vector<128x128xf32>, vector<8x128xf32> -> vector<8x128xf32>
    %439 = vector.broadcast %4 : vector<1x128xf32> to vector<8x128xf32>
    %440 = arith.addf %438, %439 : vector<8x128xf32>
    %441 = arith.mulf %440, %15 : vector<8x128xf32>
    %cst_102 = arith.constant dense<0.000000e+00> : vector<8xf32>
    %442 = vector.multi_reduction <add>, %441, %cst_102 [1] : vector<8x128xf32> to vector<8xf32>
    %443 = vector.shape_cast %442 : vector<8xf32> to vector<8x1xf32>
    %cst_103 = arith.constant 1.562500e-02 : f32
    %444 = vector.broadcast %cst_103 : f32 to vector<8x1xf32>
    %445 = arith.mulf %443, %444 : vector<8x1xf32>
    %446 = vector.broadcast %445 : vector<8x1xf32> to vector<8x128xf32>
    %447 = arith.subf %440, %446 : vector<8x128xf32>
    %448 = arith.mulf %447, %15 : vector<8x128xf32>
    %449 = arith.mulf %448, %448 : vector<8x128xf32>
    %cst_104 = arith.constant dense<0.000000e+00> : vector<8xf32>
    %450 = vector.multi_reduction <add>, %449, %cst_104 [1] : vector<8x128xf32> to vector<8xf32>
    %451 = vector.shape_cast %450 : vector<8xf32> to vector<8x1xf32>
    %cst_105 = arith.constant 1.562500e-02 : f32
    %452 = vector.broadcast %cst_105 : f32 to vector<8x1xf32>
    %453 = arith.mulf %451, %452 : vector<8x1xf32>
    %454 = vector.broadcast %445 : vector<8x1xf32> to vector<8x128xf32>
    %455 = arith.subf %440, %454 : vector<8x128xf32>
    %cst_106 = arith.constant 9.99999974E-6 : f32
    %456 = vector.broadcast %cst_106 : f32 to vector<8x1xf32>
    %457 = arith.addf %453, %456 : vector<8x1xf32>
    %458 = math.rsqrt %457 : vector<8x1xf32>
    %459 = vector.broadcast %458 : vector<8x1xf32> to vector<8x128xf32>
    %460 = arith.mulf %455, %459 : vector<8x128xf32>
    %461 = vector.broadcast %5 : vector<1x128xf32> to vector<8x128xf32>
    %462 = arith.mulf %460, %461 : vector<8x128xf32>
    %463 = vector.broadcast %6 : vector<1x128xf32> to vector<8x128xf32>
    %464 = arith.addf %462, %463 : vector<8x128xf32>
    %c0_107 = arith.constant 0 : index
    %c896 = arith.constant 896 : index
    %465 = vector.load %arg10[%c0_107, %c896] : memref<8x1024xf32, #tpu.memory_space<vmem>>, vector<8x128xf32>
    tpu.vector_store %arg10[%c0_107, %c896], %464 {strides = array<i32>} : memref<8x1024xf32, #tpu.memory_space<vmem>>, vector<8x128xf32>,
    return
  }
  func.func @transform_0(%arg0: i32) -> (i32, i32) {
    %c0_i32 = arith.constant 0 : i32
    %c0_i32_0 = arith.constant 0 : i32
    %c0_i32_1 = arith.constant 0 : i32
    return %c0_i32, %c0_i32_0 : i32, i32
  }
  func.func @transform_1(%arg0: i32) -> (i32, i32) {
    %c0_i32 = arith.constant 0 : i32
    %c0_i32_0 = arith.constant 0 : i32
    %c0_i32_1 = arith.constant 0 : i32
    return %c0_i32, %c0_i32_0 : i32, i32
  }
  func.func @transform_2(%arg0: i32) -> (i32, i32) {
    %c0_i32 = arith.constant 0 : i32
    %c0_i32_0 = arith.constant 0 : i32
    %c0_i32_1 = arith.constant 0 : i32
    return %c0_i32, %c0_i32_0 : i32, i32
  }
  func.func @transform_3(%arg0: i32) -> (i32, i32) {
    %c0_i32 = arith.constant 0 : i32
    %c0_i32_0 = arith.constant 0 : i32
    %c0_i32_1 = arith.constant 0 : i32
    return %c0_i32, %c0_i32_0 : i32, i32
  }
  func.func @transform_4(%arg0: i32) -> (i32, i32) {
    %c0_i32 = arith.constant 0 : i32
    %c0_i32_0 = arith.constant 0 : i32
    %c0_i32_1 = arith.constant 0 : i32
    return %c0_i32, %c0_i32_0 : i32, i32
  }
  func.func @transform_5(%arg0: i32) -> (i32, i32) {
    %c0_i32 = arith.constant 0 : i32
    %c0_i32_0 = arith.constant 0 : i32
    %c0_i32_1 = arith.constant 0 : i32
    return %c0_i32, %c0_i32_0 : i32, i32
  }
  func.func @transform_6(%arg0: i32) -> (i32, i32) {
    %c0_i32 = arith.constant 0 : i32
    %c0_i32_0 = arith.constant 0 : i32
    %c0_i32_1 = arith.constant 0 : i32
    return %c0_i32, %c0_i32_0 : i32, i32
  }
  func.func @transform_7(%arg0: i32) -> (i32, i32) {
    %c0_i32 = arith.constant 0 : i32
    %c0_i32_0 = arith.constant 0 : i32
    %c0_i32_1 = arith.constant 0 : i32
    return %c0_i32, %c0_i32_0 : i32, i32
  }
  func.func @transform_8(%arg0: i32) -> (i32, i32) {
    %c0_i32 = arith.constant 0 : i32
    %c0_i32_0 = arith.constant 0 : i32
    %c0_i32_1 = arith.constant 0 : i32
    return %c0_i32, %c0_i32_0 : i32, i32
  }
  func.func @transform_9(%arg0: i32) -> (i32, i32) {
    %c0_i32 = arith.constant 0 : i32
    %c0_i32_0 = arith.constant 0 : i32
    %c0_i32_1 = arith.constant 0 : i32
    return %c0_i32, %c0_i32_0 : i32, i32
  }
}

</mosaic_0001>

<bundles_post_ra>
// kernel: pretraining_forward.1
= control target key start
LH: loop header
LB: loop body
LE: loop exit
PB: predicated region body
PF: predicated region fallthrough
CT: control target
= control target key end

     0   :  { %v5551_v3 = vmov 0.0   ;;  %vm3233_vm0 = vmmov 0   ;;  %s5541_s2 = inlined_call_operand.vmem [shape: f32[128,512], index: 2, kind: input, shape index: {}]   ;;  %s5542_s0 = inlined_call_operand.vmem [shape: f32[64,128], index: 0, kind: input, shape index: {}]   ;;  %s5543_s3 = inlined_call_operand.vmem [shape: f32[128,512], index: 3, kind: input, shape index: {}]   ;;  %s5544_s1 = inlined_call_operand.vmem [shape: f32[8,128], index: 1, kind: input, shape index: {}]   ;;  %s5545_s5 = inlined_call_operand.vmem [shape: f32[128,128], index: 5, kind: input, shape index: {}]   ;;  %s5546_s4 = inlined_call_operand.vmem [shape: f32[1,512], index: 4, kind: input, shape index: {}]   ;;  %s5547_s6 = inlined_call_operand.vmem [shape: f32[1,128], index: 6, kind: input, shape index: {}]   ;;  %s5548_s7 = inlined_call_operand.vmem [shape: f32[1,128], index: 7, kind: input, shape index: {}]   ;;  %s5549_s8 = inlined_call_operand.vmem [shape: f32[1,128], index: 8, kind: input, shape index: {}]   ;;  %s5550_s9 = inlined_call_operand.vmem [shape: f32[8,1024], index: 9, kind: output, shape index: {}]  }
   0x1   :  { %v93_v0 = vld [vmem:[%s5541_s2 + $0x1e8] sm:$0xff]  ;;  %v95_v1 = vld [vmem:[%s5541_s2 + $0x1f8] sm:$0xff]  ;;  %v92_v2 = vld [vmem:[%s5541_s2 + $0x1e0] sm:$0xff]  ;;  %273 = vmatprep.mubr.f32.mxu0 %v5551_v3  ;;  %386 = vmatprep.mubr.f32.mxu1 %v5551_v3 }
   0x2   :  { %209 = vmatprep.subr.mxu0 %v93_v0  ;;  %322 = vmatprep.subr.mxu1 %v95_v1  ;;  %v94_v4 = vld [vmem:[%s5541_s2 + $0x1f0] sm:$0xff]  ;;  %v89_v5 = vld [vmem:[%s5541_s2 + $0x1c8] sm:$0xff]  ;;  %v91_v6 = vld [vmem:[%s5541_s2 + $0x1d8] sm:$0xff] }
   0x3   :  { %210 = vmatpush1.msra.mxu0 %v92_v2  ;;  %323 = vmatpush1.msra.mxu1 %v94_v4  ;;  %v88_v7 = vld [vmem:[%s5541_s2 + $0x1c0] sm:$0xff]  ;;  %v90_v8 = vld [vmem:[%s5541_s2 + $0x1d0] sm:$0xff]  ;;  %v85_v9 = vld [vmem:[%s5541_s2 + $0x1a8] sm:$0xff] }
   0x4   :  { %211 = vmatprep.subr.mxu0 %v89_v5  ;;  %324 = vmatprep.subr.mxu1 %v91_v6  ;;  %v87_v10 = vld [vmem:[%s5541_s2 + $0x1b8] sm:$0xff]  ;;  %v84_v11 = vld [vmem:[%s5541_s2 + $0x1a0] sm:$0xff]  ;;  %v86_v12 = vld [vmem:[%s5541_s2 + $0x1b0] sm:$0xff] }
   0x5   :  { %212 = vmatpush1.msra.mxu0 %v88_v7  ;;  %325 = vmatpush1.msra.mxu1 %v90_v8  ;;  %v81_v13 = vld [vmem:[%s5541_s2 + $0x188] sm:$0xff]  ;;  %v83_v14 = vld [vmem:[%s5541_s2 + $0x198] sm:$0xff]  ;;  %v80_v15 = vld [vmem:[%s5541_s2 + $0x180] sm:$0xff] }
   0x6   :  { %213 = vmatprep.subr.mxu0 %v85_v9  ;;  %326 = vmatprep.subr.mxu1 %v87_v10  ;;  %v82_v16 = vld [vmem:[%s5541_s2 + $0x190] sm:$0xff]  ;;  %v77_v17 = vld [vmem:[%s5541_s2 + $0x168] sm:$0xff]  ;;  %v79_v18 = vld [vmem:[%s5541_s2 + $0x178] sm:$0xff] }
   0x7   :  { %214 = vmatpush1.msra.mxu0 %v84_v11  ;;  %327 = vmatpush1.msra.mxu1 %v86_v12  ;;  %v76_v19 = vld [vmem:[%s5541_s2 + $0x160] sm:$0xff]  ;;  %v78_v20 = vld [vmem:[%s5541_s2 + $0x170] sm:$0xff]  ;;  %v73_v21 = vld [vmem:[%s5541_s2 + $0x148] sm:$0xff] }
   0x8   :  { %215 = vmatprep.subr.mxu0 %v81_v13  ;;  %328 = vmatprep.subr.mxu1 %v83_v14  ;;  %v75_v22 = vld [vmem:[%s5541_s2 + $0x158] sm:$0xff]  ;;  %v72_v23 = vld [vmem:[%s5541_s2 + $0x140] sm:$0xff]  ;;  %v74_v24 = vld [vmem:[%s5541_s2 + $0x150] sm:$0xff] }
   0x9   :  { %216 = vmatpush1.msra.mxu0 %v80_v15  ;;  %329 = vmatpush1.msra.mxu1 %v82_v16  ;;  %v69_v25 = vld [vmem:[%s5541_s2 + $0x128] sm:$0xff]  ;;  %v71_v26 = vld [vmem:[%s5541_s2 + $0x138] sm:$0xff]  ;;  %v68_v27 = vld [vmem:[%s5541_s2 + $0x120] sm:$0xff] }
   0xa   :  { %217 = vmatprep.subr.mxu0 %v77_v17  ;;  %330 = vmatprep.subr.mxu1 %v79_v18  ;;  %v70_v28 = vld [vmem:[%s5541_s2 + $0x130] sm:$0xff]  ;;  %v65_v29 = vld [vmem:[%s5541_s2 + $0x108] sm:$0xff]  ;;  %v67_v30 = vld [vmem:[%s5541_s2 + $0x118] sm:$0xff] }
   0xb   :  { %218 = vmatpush1.msra.mxu0 %v76_v19  ;;  %331 = vmatpush1.msra.mxu1 %v78_v20  ;;  %v64_v31 = vld [vmem:[%s5541_s2 + $0x100] sm:$0xff]  ;;  %v66_v32 = vld [vmem:[%s5541_s2 + $0x110] sm:$0xff]  ;;  %v61_v33 = vld [vmem:[%s5541_s2 + $0xe8] sm:$0xff] }
   0xc   :  { %219 = vmatprep.subr.mxu0 %v73_v21  ;;  %332 = vmatprep.subr.mxu1 %v75_v22  ;;  %v63_v34 = vld [vmem:[%s5541_s2 + $0xf8] sm:$0xff]  ;;  %v60_v35 = vld [vmem:[%s5541_s2 + $0xe0] sm:$0xff]  ;;  %v62_v36 = vld [vmem:[%s5541_s2 + $0xf0] sm:$0xff] }
   0xd   :  { %220 = vmatpush1.msra.mxu0 %v72_v23  ;;  %333 = vmatpush1.msra.mxu1 %v74_v24  ;;  %v57_v37 = vld [vmem:[%s5541_s2 + $0xc8] sm:$0xff]  ;;  %v59_v38 = vld [vmem:[%s5541_s2 + $0xd8] sm:$0xff]  ;;  %v56_v39 = vld [vmem:[%s5541_s2 + $0xc0] sm:$0xff] }
   0xe   :  { %221 = vmatprep.subr.mxu0 %v69_v25  ;;  %334 = vmatprep.subr.mxu1 %v71_v26  ;;  %v58_v40 = vld [vmem:[%s5541_s2 + $0xd0] sm:$0xff]  ;;  %v53_v41 = vld [vmem:[%s5541_s2 + $0xa8] sm:$0xff]  ;;  %v55_v42 = vld [vmem:[%s5541_s2 + $0xb8] sm:$0xff] }
   0xf   :  { %222 = vmatpush1.msra.mxu0 %v68_v27  ;;  %335 = vmatpush1.msra.mxu1 %v70_v28  ;;  %v52_v43 = vld [vmem:[%s5541_s2 + $0xa0] sm:$0xff]  ;;  %v54_v44 = vld [vmem:[%s5541_s2 + $0xb0] sm:$0xff]  ;;  %v49_v45 = vld [vmem:[%s5541_s2 + $0x88] sm:$0xff] }
  0x10   :  { %223 = vmatprep.subr.mxu0 %v65_v29  ;;  %336 = vmatprep.subr.mxu1 %v67_v30  ;;  %v51_v46 = vld [vmem:[%s5541_s2 + $0x98] sm:$0xff]  ;;  %v48_v47 = vld [vmem:[%s5541_s2 + $0x80] sm:$0xff]  ;;  %v50_v48 = vld [vmem:[%s5541_s2 + $0x90] sm:$0xff] }
  0x11   :  { %224 = vmatpush1.msra.mxu0 %v64_v31  ;;  %337 = vmatpush1.msra.mxu1 %v66_v32  ;;  %v45_v49 = vld [vmem:[%s5541_s2 + $0x68] sm:$0xff]  ;;  %v47_v50 = vld [vmem:[%s5541_s2 + $0x78] sm:$0xff]  ;;  %v44_v51 = vld [vmem:[%s5541_s2 + $0x60] sm:$0xff] }
  0x12   :  { %225 = vmatprep.subr.mxu0 %v61_v33  ;;  %338 = vmatprep.subr.mxu1 %v63_v34  ;;  %v46_v52 = vld [vmem:[%s5541_s2 + $0x70] sm:$0xff]  ;;  %v41_v53 = vld [vmem:[%s5541_s2 + $0x48] sm:$0xff]  ;;  %v43_v54 = vld [vmem:[%s5541_s2 + $0x58] sm:$0xff] }
  0x13   :  { %226 = vmatpush1.msra.mxu0 %v60_v35  ;;  %339 = vmatpush1.msra.mxu1 %v62_v36  ;;  %v40_v55 = vld [vmem:[%s5541_s2 + $0x40] sm:$0xff]  ;;  %v42_v56 = vld [vmem:[%s5541_s2 + $0x50] sm:$0xff]  ;;  %v37_v57 = vld [vmem:[%s5541_s2 + $0x28] sm:$0xff] }
  0x14   :  { %227 = vmatprep.subr.mxu0 %v57_v37  ;;  %340 = vmatprep.subr.mxu1 %v59_v38  ;;  %v39_v58 = vld [vmem:[%s5541_s2 + $0x38] sm:$0xff]  ;;  %v36_v59 = vld [vmem:[%s5541_s2 + $0x20] sm:$0xff]  ;;  %v38_v60 = vld [vmem:[%s5541_s2 + $0x30] sm:$0xff] }
  0x15   :  { %228 = vmatpush1.msra.mxu0 %v56_v39  ;;  %341 = vmatpush1.msra.mxu1 %v58_v40  ;;  %v33_v61 = vld [vmem:[%s5541_s2 + $0x8] sm:$0xff]  ;;  %v35_v62 = vld [vmem:[%s5541_s2 + $0x18] sm:$0xff]  ;;  %v32_v63 = vld [vmem:[%s5541_s2] sm:$0xff] }
  0x16   :  { %229 = vmatprep.subr.mxu0 %v53_v41  ;;  %342 = vmatprep.subr.mxu1 %v55_v42  ;;  %v34_v0 = vld [vmem:[%s5541_s2 + $0x10] sm:$0xff]  ;;  %v180_v1 = vld [vmem:[%s5542_s0] sm:$0xff]  ;;  %v3484_v2 = vld [vmem:[%s5543_s3 + $0x1e8] sm:$0xff] }
  0x17   :  { %230 = vmatpush1.msra.mxu0 %v52_v43  ;;  %343 = vmatpush1.msra.mxu1 %v54_v44  ;;  %5687 = vst [vmem:[#allocation2_spill] sm:$0xff] %v3484_v2  ;;  %v3489_v4 = vld [vmem:[%s5543_s3 + $0x1f8] sm:$0xff]  ;;  %v3494_v5 = vld [vmem:[%s5543_s3 + $0x1e0] sm:$0xff]  ;;  %v3499_v6 = vld [vmem:[%s5543_s3 + $0x1f0] sm:$0xff] }
  0x18   :  { %231 = vmatprep.subr.mxu0 %v49_v45  ;;  %344 = vmatprep.subr.mxu1 %v51_v46  ;;  %5688 = vst [vmem:[#allocation3_spill] sm:$0xff] %v3489_v4  ;;  %5689 = vst [vmem:[#allocation4_spill] sm:$0xff] %v3494_v5  ;;  %v3504_v7 = vld [vmem:[%s5543_s3 + $0x1c8] sm:$0xff]  ;;  %v3509_v8 = vld [vmem:[%s5543_s3 + $0x1d8] sm:$0xff] }
  0x19   :  { %232 = vmatpush1.msra.mxu0 %v48_v47  ;;  %345 = vmatpush1.msra.mxu1 %v50_v48  ;;  %5690 = vst [vmem:[#allocation5_spill] sm:$0xff] %v3504_v7  ;;  %v3518_v9 = vld [vmem:[%s5543_s3 + $0x1c0] sm:$0xff]  ;;  %v3523_v10 = vld [vmem:[%s5543_s3 + $0x1d0] sm:$0xff]  ;;  %v181_v11 = vld [vmem:[%s5542_s0 + $0x8] sm:$0xff] }
  0x1a   :  { %233 = vmatprep.subr.mxu0 %v45_v49  ;;  %346 = vmatprep.subr.mxu1 %v47_v50  ;;  %5691 = vst [vmem:[#allocation6_spill] sm:$0xff] %v3518_v9  ;;  %v3535_v12 = vld [vmem:[%s5543_s3 + $0x1a8] sm:$0xff]  ;;  %v3540_v13 = vld [vmem:[%s5543_s3 + $0x1b8] sm:$0xff]  ;;  %v3547_v14 = vld [vmem:[%s5543_s3 + $0x1a0] sm:$0xff] }
  0x1b   :  { %234 = vmatpush1.msra.mxu0 %v44_v51  ;;  %347 = vmatpush1.msra.mxu1 %v46_v52  ;;  %5692 = vst [vmem:[#allocation7_spill] sm:$0xff] %v3535_v12  ;;  %5693 = vst [vmem:[#allocation8_spill] sm:$0xff] %v3547_v14  ;;  %v3552_v15 = vld [vmem:[%s5543_s3 + $0x1b0] sm:$0xff]  ;;  %v3557_v16 = vld [vmem:[%s5543_s3 + $0x188] sm:$0xff] }
  0x1c   :  { %235 = vmatprep.subr.mxu0 %v41_v53  ;;  %348 = vmatprep.subr.mxu1 %v43_v54  ;;  %5694 = vst [vmem:[#allocation9_spill] sm:$0xff] %v3557_v16  ;;  %v3562_v17 = vld [vmem:[%s5543_s3 + $0x198] sm:$0xff]  ;;  %v3571_v18 = vld [vmem:[%s5543_s3 + $0x180] sm:$0xff]  ;;  %v3576_v19 = vld [vmem:[%s5543_s3 + $0x190] sm:$0xff] }
  0x1d   :  { %236 = vmatpush1.msra.mxu0 %v40_v55  ;;  %349 = vmatpush1.msra.mxu1 %v42_v56  ;;  %5695 = vst [vmem:[#allocation10_spill] sm:$0xff] %v3571_v18  ;;  %v182_v20 = vld [vmem:[%s5542_s0 + $0x10] sm:$0xff]  ;;  %v3588_v21 = vld [vmem:[%s5543_s3 + $0x168] sm:$0xff]  ;;  %v3593_v22 = vld [vmem:[%s5543_s3 + $0x178] sm:$0xff] }
  0x1e   :  { %237 = vmatprep.subr.mxu0 %v37_v57  ;;  %350 = vmatprep.subr.mxu1 %v39_v58  ;;  %5696 = vst [vmem:[#allocation11_spill] sm:$0xff] %v3588_v21  ;;  %v3600_v23 = vld [vmem:[%s5543_s3 + $0x160] sm:$0xff]  ;;  %v3605_v24 = vld [vmem:[%s5543_s3 + $0x170] sm:$0xff]  ;;  %v3610_v25 = vld [vmem:[%s5543_s3 + $0x148] sm:$0xff] }
  0x1f   :  { %238 = vmatpush1.msra.mxu0 %v36_v59  ;;  %351 = vmatpush1.msra.mxu1 %v38_v60  ;;  %5697 = vst [vmem:[#allocation12_spill] sm:$0xff] %v3600_v23  ;;  %5698 = vst [vmem:[#allocation13_spill] sm:$0xff] %v3610_v25  ;;  %v3615_v26 = vld [vmem:[%s5543_s3 + $0x158] sm:$0xff]  ;;  %v3624_v27 = vld [vmem:[%s5543_s3 + $0x140] sm:$0xff] }
  0x20   :  { %239 = vmatprep.subr.mxu0 %v33_v61  ;;  %352 = vmatprep.subr.mxu1 %v35_v62  ;;  %5699 = vst [vmem:[#allocation14_spill] sm:$0xff] %v3624_v27  ;;  %v3629_v28 = vld [vmem:[%s5543_s3 + $0x150] sm:$0xff]  ;;  %v183_v29 = vld [vmem:[%s5542_s0 + $0x18] sm:$0xff]  ;;  %v3641_v30 = vld [vmem:[%s5543_s3 + $0x128] sm:$0xff] }
  0x21   :  { %240 = vmatpush1.msra.mxu0 %v32_v63  ;;  %353 = vmatpush1.msra.mxu1 %v34_v0  ;;  %5700 = vst [vmem:[#allocation15_spill] sm:$0xff] %v3641_v30  ;;  %v3646_v31 = vld [vmem:[%s5543_s3 + $0x138] sm:$0xff]  ;;  %v3653_v32 = vld [vmem:[%s5543_s3 + $0x120] sm:$0xff]  ;;  %v3658_v33 = vld [vmem:[%s5543_s3 + $0x130] sm:$0xff] }
  0x22   :  { %274 = vmatmul.mubr.f32.vlgmr.msra.gmra.mxu0 %v180_v1  ;;  %387 = vmatmul.mubr.f32.vlgmr.msra.gmra.mxu1 %v180_v1  ;;  %5701 = vst [vmem:[#allocation16_spill] sm:$0xff] %v3653_v32  ;;  %v3663_v34 = vld [vmem:[%s5543_s3 + $0x108] sm:$0xff]  ;;  %v3668_v35 = vld [vmem:[%s5543_s3 + $0x118] sm:$0xff]  ;;  %v3677_v36 = vld [vmem:[%s5543_s3 + $0x100] sm:$0xff] }
  0x23   :  { %441 = vmatprep.subr.mxu0 %v3484_v2  ;;  %512 = vmatprep.subr.mxu1 %v3489_v4  ;;  %5702 = vst [vmem:[#allocation17_spill] sm:$0xff] %v3663_v34  ;;  %5703 = vst [vmem:[#allocation18_spill] sm:$0xff] %v3677_v36  ;;  %v3682_v37 = vld [vmem:[%s5543_s3 + $0x110] sm:$0xff]  ;;  %v184_v38 = vld [vmem:[%s5542_s0 + $0x20] sm:$0xff] }
  0x24   :  { %442 = vmatpush1.msra.mxu0 %v3494_v5  ;;  %513 = vmatpush1.msra.mxu1 %v3499_v6  ;;  %v3694_v39 = vld [vmem:[%s5543_s3 + $0xe8] sm:$0xff]  ;;  %v3699_v40 = vld [vmem:[%s5543_s3 + $0xf8] sm:$0xff]  ;;  %v3706_v41 = vld [vmem:[%s5543_s3 + $0xe0] sm:$0xff] }
  0x25   :  { %443 = vmatprep.subr.mxu0 %v3504_v7  ;;  %514 = vmatprep.subr.mxu1 %v3509_v8  ;;  %5704 = vst [vmem:[#allocation19_spill] sm:$0xff] %v3694_v39  ;;  %5705 = vst [vmem:[#allocation20_spill] sm:$0xff] %v3706_v41  ;;  %v3711_v42 = vld [vmem:[%s5543_s3 + $0xf0] sm:$0xff]  ;;  %v3716_v43 = vld [vmem:[%s5543_s3 + $0xc8] sm:$0xff] }
  0x26   :  { %279 = vmatprep.mubr.f32.mxu0 %v5551_v3  ;;  %392 = vmatprep.mubr.f32.mxu1 %v5551_v3  ;;  %5706 = vst [vmem:[#allocation21_spill] sm:$0xff] %v3716_v43  ;;  %v3721_v44 = vld [vmem:[%s5543_s3 + $0xd8] sm:$0xff]  ;;  %v3730_v45 = vld [vmem:[%s5543_s3 + $0xc0] sm:$0xff]  ;;  %v3735_v46 = vld [vmem:[%s5543_s3 + $0xd0] sm:$0xff] }
  0x27   :  { %444 = vmatpush1.msra.mxu0 %v3518_v9  ;;  %515 = vmatpush1.msra.mxu1 %v3523_v10  ;;  %5707 = vst [vmem:[#allocation22_spill] sm:$0xff] %v3730_v45  ;;  %v185_v47 = vld [vmem:[%s5542_s0 + $0x28] sm:$0xff]  ;;  %v3752_v49 = vld [vmem:[%s5543_s3 + $0xb8] sm:$0xff]  ;;  %v3759_v50 = vld [vmem:[%s5543_s3 + $0xa0] sm:$0xff] }
  0x28   :  { %280 = vmatmul.mubr.f32.gmra.mxu0 %v181_v11  ;;  %393 = vmatmul.mubr.f32.gmra.mxu1 %v181_v11  ;;  %v3747_v48 = vld [vmem:[%s5543_s3 + $0xa8] sm:$0xff]  ;;  %5709 = vst [vmem:[#allocation24_spill] sm:$0xff] %v3759_v50  ;;  %v3764_v51 = vld [vmem:[%s5543_s3 + $0xb0] sm:$0xff]  ;;  %v3774_v53 = vld [vmem:[%s5543_s3 + $0x98] sm:$0xff] }
  0x29   :  { %445 = vmatprep.subr.mxu0 %v3535_v12  ;;  %516 = vmatprep.subr.mxu1 %v3540_v13  ;;  %5708 = vst [vmem:[#allocation23_spill] sm:$0xff] %v3747_v48  ;;  %v3769_v52 = vld [vmem:[%s5543_s3 + $0x88] sm:$0xff]  ;;  %v3783_v54 = vld [vmem:[%s5543_s3 + $0x80] sm:$0xff]  ;;  %v3788_v55 = vld [vmem:[%s5543_s3 + $0x90] sm:$0xff] }
  0x2a   :  { %446 = vmatpush1.msra.mxu0 %v3547_v14  ;;  %517 = vmatpush1.msra.mxu1 %v3552_v15  ;;  %5710 = vst [vmem:[#allocation25_spill] sm:$0xff] %v3769_v52  ;;  %5711 = vst [vmem:[#allocation26_spill] sm:$0xff] %v3783_v54  ;;  %v186_v56 = vld [vmem:[%s5542_s0 + $0x30] sm:$0xff]  ;;  %v3800_v57 = vld [vmem:[%s5543_s3 + $0x68] sm:$0xff] }
  0x2b   :  { %447 = vmatprep.subr.mxu0 %v3557_v16  ;;  %518 = vmatprep.subr.mxu1 %v3562_v17  ;;  %5712 = vst [vmem:[#allocation27_spill] sm:$0xff] %v3800_v57  ;;  %v3805_v58 = vld [vmem:[%s5543_s3 + $0x78] sm:$0xff]  ;;  %v3812_v59 = vld [vmem:[%s5543_s3 + $0x60] sm:$0xff]  ;;  %v3817_v60 = vld [vmem:[%s5543_s3 + $0x70] sm:$0xff] }
  0x2c   :  { %285 = vmatprep.mubr.f32.mxu0 %v5551_v3  ;;  %398 = vmatprep.mubr.f32.mxu1 %v5551_v3  ;;  %5713 = vst [vmem:[#allocation28_spill] sm:$0xff] %v3812_v59  ;;  %v3822_v61 = vld [vmem:[%s5543_s3 + $0x48] sm:$0xff]  ;;  %v3827_v62 = vld [vmem:[%s5543_s3 + $0x58] sm:$0xff]  ;;  %v3836_v63 = vld [vmem:[%s5543_s3 + $0x40] sm:$0xff] }
  0x2d   :  { %448 = vmatpush1.msra.mxu0 %v3571_v18  ;;  %519 = vmatpush1.msra.mxu1 %v3576_v19  ;;  %5714 = vst [vmem:[#allocation29_spill] sm:$0xff] %v3822_v61  ;;  %5715 = vst [vmem:[#allocation30_spill] sm:$0xff] %v3836_v63  ;;  %v3841_v0 = vld [vmem:[%s5543_s3 + $0x50] sm:$0xff]  ;;  %v187_v1 = vld [vmem:[%s5542_s0 + $0x38] sm:$0xff] }
  0x2e   :  { %286 = vmatmul.mubr.f32.gmra.mxu0 %v182_v20  ;;  %399 = vmatmul.mubr.f32.gmra.mxu1 %v182_v20  ;;  %5716 = vst [vmem:[#allocation31_spill] sm:$0xff] %v3841_v0  ;;  %v3853_v11 = vld [vmem:[%s5543_s3 + $0x28] sm:$0xff]  ;;  %v3858_v20 = vld [vmem:[%s5543_s3 + $0x38] sm:$0xff] }
  0x2f   :  { %449 = vmatprep.subr.mxu0 %v3588_v21  ;;  %520 = vmatprep.subr.mxu1 %v3593_v22  ;;  %5717 = vst [vmem:[#allocation32_spill] sm:$0xff] %v3853_v11  ;;  %5718 = vst [vmem:[#allocation33_spill] sm:$0xff] %v3858_v20 }
  0x30   :  { %450 = vmatpush1.msra.mxu0 %v3600_v23  ;;  %521 = vmatpush1.msra.mxu1 %v3605_v24 }
  0x31   :  { %451 = vmatprep.subr.mxu0 %v3610_v25  ;;  %522 = vmatprep.subr.mxu1 %v3615_v26 }
  0x32   :  { %291 = vmatprep.mubr.f32.mxu0 %v5551_v3  ;;  %404 = vmatprep.mubr.f32.mxu1 %v5551_v3 }
  0x33   :  { %452 = vmatpush1.msra.mxu0 %v3624_v27  ;;  %523 = vmatpush1.msra.mxu1 %v3629_v28 }
  0x34   :  { %292 = vmatmul.mubr.f32.gmra.mxu0 %v183_v29  ;;  %405 = vmatmul.mubr.f32.gmra.mxu1 %v183_v29  ;;  %v3865_v29 = vld [vmem:[%s5543_s3 + $0x20] sm:$0xff] }
  0x35   :  { %453 = vmatprep.subr.mxu0 %v3641_v30  ;;  %524 = vmatprep.subr.mxu1 %v3646_v31  ;;  %5719 = vst [vmem:[#allocation34_spill] sm:$0xff] %v3865_v29 }
  0x36   :  { %454 = vmatpush1.msra.mxu0 %v3653_v32  ;;  %525 = vmatpush1.msra.mxu1 %v3658_v33 }
  0x37   :  { %455 = vmatprep.subr.mxu0 %v3663_v34  ;;  %526 = vmatprep.subr.mxu1 %v3668_v35 }
  0x38   :  { %297 = vmatprep.mubr.f32.mxu0 %v5551_v3  ;;  %410 = vmatprep.mubr.f32.mxu1 %v5551_v3 }
  0x39   :  { %456 = vmatpush1.msra.mxu0 %v3677_v36  ;;  %527 = vmatpush1.msra.mxu1 %v3682_v37 }
  0x3a   :  { %298 = vmatmul.mubr.f32.gmra.mxu0 %v184_v38  ;;  %411 = vmatmul.mubr.f32.gmra.mxu1 %v184_v38  ;;  %v3870_v38 = vld [vmem:[%s5543_s3 + $0x30] sm:$0xff] }
  0x3b   :  { %457 = vmatprep.subr.mxu0 %v3694_v39  ;;  %528 = vmatprep.subr.mxu1 %v3699_v40  ;;  %5720 = vst [vmem:[#allocation35_spill] sm:$0xff] %v3870_v38 }
  0x3c   :  { %458 = vmatpush1.msra.mxu0 %v3706_v41  ;;  %529 = vmatpush1.msra.mxu1 %v3711_v42 }
  0x3d   :  { %459 = vmatprep.subr.mxu0 %v3716_v43  ;;  %530 = vmatprep.subr.mxu1 %v3721_v44 }
  0x3e   :  { %303 = vmatprep.mubr.f32.mxu0 %v5551_v3  ;;  %416 = vmatprep.mubr.f32.mxu1 %v5551_v3 }
  0x3f   :  { %460 = vmatpush1.msra.mxu0 %v3730_v45  ;;  %531 = vmatpush1.msra.mxu1 %v3735_v46 }
  0x40   :  { %304 = vmatmul.mubr.f32.gmra.mxu0 %v185_v47  ;;  %417 = vmatmul.mubr.f32.gmra.mxu1 %v185_v47  ;;  %v3875_v47 = vld [vmem:[%s5543_s3 + $0x8] sm:$0xff] }
  0x41   :  { %461 = vmatprep.subr.mxu0 %v3747_v48  ;;  %532 = vmatprep.subr.mxu1 %v3752_v49  ;;  %5721 = vst [vmem:[#allocation36_spill] sm:$0xff] %v3875_v47 }
  0x42   :  { %462 = vmatpush1.msra.mxu0 %v3759_v50  ;;  %533 = vmatpush1.msra.mxu1 %v3764_v51 }
  0x43   :  { %463 = vmatprep.subr.mxu0 %v3769_v52  ;;  %534 = vmatprep.subr.mxu1 %v3774_v53 }
  0x44   :  { %309 = vmatprep.mubr.f32.mxu0 %v5551_v3  ;;  %422 = vmatprep.mubr.f32.mxu1 %v5551_v3 }
  0x45   :  { %464 = vmatpush1.msra.mxu0 %v3783_v54  ;;  %535 = vmatpush1.msra.mxu1 %v3788_v55 }
  0x46   :  { %310 = vmatmul.mubr.f32.gmra.mxu0 %v186_v56  ;;  %423 = vmatmul.mubr.f32.gmra.mxu1 %v186_v56  ;;  %v3880_v56 = vld [vmem:[%s5543_s3 + $0x18] sm:$0xff] }
  0x47   :  { %465 = vmatprep.subr.mxu0 %v3800_v57  ;;  %536 = vmatprep.subr.mxu1 %v3805_v58  ;;  %5722 = vst [vmem:[#allocation37_spill] sm:$0xff] %v3880_v56 }
  0x48   :  { %466 = vmatpush1.msra.mxu0 %v3812_v59  ;;  %537 = vmatpush1.msra.mxu1 %v3817_v60 }
  0x49   :  { %467 = vmatprep.subr.mxu0 %v3822_v61  ;;  %538 = vmatprep.subr.mxu1 %v3827_v62 }
  0x4a   :  { %315 = vmatprep.mubr.f32.mxu0 %v5551_v3  ;;  %428 = vmatprep.mubr.f32.mxu1 %v5551_v3  ;;  %v3887_v3 = vld [vmem:[%s5543_s3] sm:$0xff] }
  0x4b   :  { %468 = vmatpush1.msra.mxu0 %v3836_v63  ;;  %539 = vmatpush1.msra.mxu1 %v3841_v0  ;;  %5723 = vst [vmem:[#allocation38_spill] sm:$0xff] %v3887_v3  ;;  %v5725_v0 = vmov 0.0  }
  0x4c   :  { %316 = vmatmul.mubr.f32.gmra.mxu0 %v187_v1  ;;  %429 = vmatmul.mubr.f32.gmra.mxu1 %v187_v1  ;;  %v3894_v1 = vld [vmem:[%s5543_s3 + $0x10] sm:$0xff] }
  0x4d   :  { %469 = vmatprep.subr.mxu0 %v3853_v11  ;;  %540 = vmatprep.subr.mxu1 %v3858_v20  ;;  %5724 = vst [vmem:[#allocation39_spill] sm:$0xff] %v3894_v1  ;;  %v3901_v20 = vld [vmem:[%s5544_s1] sm:$0xff] }
  0x4e   :  { %470 = vmatpush1.msra.mxu0 %v3865_v29  ;;  %541 = vmatpush1.msra.mxu1 %v3870_v38 }
  0x4f   :  { %471 = vmatprep.subr.mxu0 %v3875_v47  ;;  %542 = vmatprep.subr.mxu1 %v3880_v56 }
  0x50   :  { %472 = vmatpush1.msra.mxu0 %v3887_v3  ;;  %505 = vmatprep.mubr.f32.mxu0 %v5725_v0 }
  0x51   :  { %543 = vmatpush1.msra.mxu1 %v3894_v1  ;;  %576 = vmatprep.mubr.f32.mxu1 %v5725_v0 }
  0x52   :  { %506 = vmatmul.mubr.f32.vlgmr.msra.gmra.mxu0 %v3901_v20  ;;  %577 = vmatmul.mubr.f32.vlgmr.msra.gmra.mxu1 %v3901_v20 }
  0x53   :  { %2675 = vmatprep.subr.mxu0 %v5725_v0  ;;  %715 = vmatprep.subr.mxu1 %v3484_v2 }
  0x54   :  { %716 = vmatpush1.msra.mxu1 %v3494_v5  ;;  %779 = vmatprep.mubr.f32.mxu1 %v5725_v0 }
  0x55   :  { %717 = vmatprep.subr.mxu1 %v3504_v7  ;;  %2707 = vmatprep.mubr.msk.f32.mxu0 %vm3233_vm0, %v5725_v0 }
  0x56   :  { %718 = vmatpush1.msra.mxu1 %v3518_v9 }
  0x57   :  { %719 = vmatprep.subr.mxu1 %v3535_v12 }
  0x58   :  { %720 = vmatpush1.msra.mxu1 %v3547_v14 }
  0x59   :  { %721 = vmatprep.subr.mxu1 %v3557_v16 }
  0x5a   :  { %722 = vmatpush1.msra.mxu1 %v3571_v18 }
  0x5b   :  { %723 = vmatprep.subr.mxu1 %v3588_v21 }
  0x5c   :  { %724 = vmatpush1.msra.mxu1 %v3600_v23  ;;  %v160_v23 = vld [vmem:[%s5546_s4] sm:$0xf] }
  0x5d   :  { %725 = vmatprep.subr.mxu1 %v3610_v25 }
  0x5e   :  { %726 = vmatpush1.msra.mxu1 %v3624_v27 }
  0x5f   :  { %727 = vmatprep.subr.mxu1 %v3641_v30 }
  0x60   :  { %728 = vmatpush1.msra.mxu1 %v3653_v32 }
  0x61   :  { %729 = vmatprep.subr.mxu1 %v3663_v34 }
  0x62   :  { %730 = vmatpush1.msra.mxu1 %v3677_v36  ;;  %v5600_v36 = vlaneseq }
  0x63   :  { %731 = vmatprep.subr.mxu1 %v3694_v39  ;;  %v4052_v39 = vld [vmem:[%s5545_s5] sm:$0xff] }
  0x64   :  { %732 = vmatpush1.msra.mxu1 %v3706_v41  ;;  %v4045_v41 = vld [vmem:[%s5545_s5 + $0x8] sm:$0xff]  ;;  %5727 = vst [vmem:[#allocation41_spill] sm:$0xff] %v4052_v39  ;;  %v190_v34 = vshrl.u32 %v5600_v36, 7 }
  0x65   :  { %733 = vmatprep.subr.mxu1 %v3716_v43  ;;  %v4038_v43 = vld [vmem:[%s5545_s5 + $0x10] sm:$0xff]  ;;  %5726 = vst [vmem:[#allocation40_spill] sm:$0xff] %v4045_v41 }
  0x66   :  { %734 = vmatpush1.msra.mxu1 %v3730_v45  ;;  %v4031_v45 = vld [vmem:[%s5545_s5 + $0x18] sm:$0xff]  ;;  %v191_v27 = vsub.s32 0, %v190_v34  ;;  %v199_v25 = vsub.s32 2, %v190_v34  ;;  %v195_v16 = vsub.s32 1, %v190_v34  ;;  %v203_v14 = vsub.s32 3, %v190_v34 }
  0x67   :  { %735 = vmatprep.subr.mxu1 %v3747_v48  ;;  %v4024_v48 = vld [vmem:[%s5545_s5 + $0x20] sm:$0xff] }
  0x68   :  { %736 = vmatpush1.msra.mxu1 %v3759_v50  ;;  %v4017_v50 = vld [vmem:[%s5545_s5 + $0x28] sm:$0xff]  ;;  %v4070_v12 = vrot.slane %v160_v23, %v199_v25  ;;  %v196_v7 = vrot.slane %v160_v23, %v195_v16 }
  0x69   :  { %737 = vmatprep.subr.mxu1 %v3769_v52  ;;  %v4010_v52 = vld [vmem:[%s5545_s5 + $0x30] sm:$0xff] }
  0x6a   :  { %738 = vmatpush1.msra.mxu1 %v3783_v54  ;;  %v4001_v54 = vld [vmem:[%s5545_s5 + $0x38] sm:$0xff] }
  0x6b   :  { %739 = vmatprep.subr.mxu1 %v3800_v57  ;;  %v3947_v57 = vld [vmem:[%s5545_s5 + $0x78] sm:$0xff] }
  0x6c   :  { %740 = vmatpush1.msra.mxu1 %v3812_v59  ;;  %2676 = vmatpush3.msra.mxu0 %v3947_v57  ;;  %v3996_v59 = vld [vmem:[%s5545_s5 + $0x40] sm:$0xff] }
  0x6d   :  { %741 = vmatprep.subr.mxu1 %v3822_v61  ;;  %2677 = vmatprep.subr.mxu0 %v5725_v0  ;;  %v3989_v61 = vld [vmem:[%s5545_s5 + $0x48] sm:$0xff] }
  0x6e   :  { %742 = vmatpush1.msra.mxu1 %v3836_v63  ;;  %v3982_v63 = vld [vmem:[%s5545_s5 + $0x50] sm:$0xff] }
  0x6f   :  { %743 = vmatprep.subr.mxu1 %v3853_v11  ;;  %v3954_v11 = vld [vmem:[%s5545_s5 + $0x70] sm:$0xff] }
  0x70   :  { %744 = vmatpush1.msra.mxu1 %v3865_v29  ;;  %2678 = vmatpush3.msra.mxu0 %v3954_v11  ;;  %v3975_v29 = vld [vmem:[%s5545_s5 + $0x58] sm:$0xff] }
  0x71   :  { %745 = vmatprep.subr.mxu1 %v3875_v47  ;;  %2679 = vmatprep.subr.mxu0 %v5725_v0  ;;  %v3968_v47 = vld [vmem:[%s5545_s5 + $0x60] sm:$0xff] }
  0x72   :  { %746 = vmatpush1.msra.mxu1 %v3887_v3  ;;  %v3961_v3 = vld [vmem:[%s5545_s5 + $0x68] sm:$0xff] }
  0x73   :  { %2710 = vmatprep.subr.mxu1 %v5725_v0  ;;  %2680 = vmatpush3.msra.mxu0 %v3961_v3 }
  0x74   :  { %2681 = vmatprep.subr.mxu0 %v5725_v0 }
  0x75   :  { %2682 = vmatpush3.msra.mxu0 %v3968_v47 }
  0x76   :  { %2683 = vmatprep.subr.mxu0 %v5725_v0 }
  0x77   :  { %2684 = vmatpush3.msra.mxu0 %v3975_v29 }
  0x78   :  { %2685 = vmatprep.subr.mxu0 %v5725_v0 }
  0x79   :  { %2686 = vmatpush3.msra.mxu0 %v3982_v63 }
  0x7a   :  { %2687 = vmatprep.subr.mxu0 %v5725_v0 }
  0x7b   :  { %2688 = vmatpush3.msra.mxu0 %v3989_v61 }
  0x7c   :  { %2689 = vmatprep.subr.mxu0 %v5725_v0 }
  0x7d   :  { %2690 = vmatpush3.msra.mxu0 %v3996_v59 }
  0x7e   :  { %2691 = vmatprep.subr.mxu0 %v5725_v0 }
  0x7f   :  { %2692 = vmatpush3.msra.mxu0 %v4001_v54 }
  0x80   :  { %2693 = vmatprep.subr.mxu0 %v5725_v0 }
  0x81   :  { %2694 = vmatpush3.msra.mxu0 %v4010_v52 }
  0x82   :  { %2695 = vmatprep.subr.mxu0 %v5725_v0 }
  0x83   :  { %2696 = vmatpush3.msra.mxu0 %v4017_v50 }
  0x84   :  { %2697 = vmatprep.subr.mxu0 %v5725_v0 }
  0x85   :  { %2698 = vmatpush3.msra.mxu0 %v4024_v48 }
  0x86   :  { %2699 = vmatprep.subr.mxu0 %v5725_v0 }
  0x87   :  { %2700 = vmatpush3.msra.mxu0 %v4031_v45 }
  0x88   :  { %2701 = vmatprep.subr.mxu0 %v5725_v0 }
  0x89   :  { %2702 = vmatpush3.msra.mxu0 %v4038_v43 }
  0x8a   :  { %2703 = vmatprep.subr.mxu0 %v5725_v0 }
  0x8b   :  { %2704 = vmatpush3.msra.mxu0 %v4045_v41 }
  0x8c   :  { %2705 = vmatprep.subr.mxu0 %v5725_v0 }
  0x8d   :  { %2706 = vmatpush3.msra.mxu0 %v4052_v39  ;;  %v4072_v39 = vrot.slane %v160_v23, %v203_v14 }
  0x8e   :  { %786 = vmatprep.subr.mxu0 %v3489_v4  ;;  %v192_v4 = vrot.slane %v160_v23, %v191_v27 }
  0xe2   :  { %v4059_v32 = vpop.f32.mrf.mxu0  ;;  %v4061_v30 = vpop.f32.mrf.mxu1 }
  0xe4   :  { %v4066_v21 = vpop.f32.mrf.mxu0  ;;  %v4068_v18 = vpop.f32.mrf.mxu1 }
  0xe8   :  { %v281_v36 = vpop.f32.mrf.mxu0  ;;  %v394_v9 = vpop.f32.mrf.mxu1 }
  0xe9   :  { %v4074_v5 = vadd.f32 %v281_v36, %v192_v4  ;;  %v4077_v2 = vadd.f32 %v394_v9, %v4070_v12 }
  0xea   :  { %v283_v1 = vpop.f32.mrf.mxu0  ;;  %v396_v41 = vpop.f32.mrf.mxu1 }
  0xeb   :  { %5728 = vst [vmem:[#allocation42_spill] sm:$0xff] %v4074_v5  ;;  %5729 = vst [vmem:[#allocation43_spill] sm:$0xff] %v4077_v2  ;;  %v4079_v56 = vadd.f32 %v283_v1, %v196_v7  ;;  %v4082_v38 = vadd.f32 %v396_v41, %v4072_v39 }
  0xed   :  { %5730 = vst [vmem:[#allocation44_spill] sm:$0xff] %v4079_v56  ;;  %5731 = vst [vmem:[#allocation45_spill] sm:$0xff] %v4082_v38 }
  0xee   :  { %v287_v27 = vpop.f32.mrf.mxu0  ;;  %v400_v25 = vpop.f32.mrf.mxu1 }
  0xef   :  { %v4084_v34 = vadd.f32 %v287_v27, %v192_v4  ;;  %v4087_v16 = vadd.f32 %v400_v25, %v4070_v12 }
  0xf0   :  { %v289_v14 = vpop.f32.mrf.mxu0  ;;  %v402_v23 = vpop.f32.mrf.mxu1 }
  0xf1   :  { %5732 = vst [vmem:[#allocation46_spill] sm:$0xff] %v4084_v34  ;;  %5733 = vst [vmem:[#allocation47_spill] sm:$0xff] %v4087_v16  ;;  %v4089_v36 = vadd.f32 %v289_v14, %v196_v7  ;;  %v4092_v9 = vadd.f32 %v402_v23, %v4072_v39 }
  0xf3   :  { %5734 = vst [vmem:[#allocation48_spill] sm:$0xff] %v4089_v36  ;;  %5735 = vst [vmem:[#allocation49_spill] sm:$0xff] %v4092_v9 }
  0xf4   :  { %v293_v2 = vpop.f32.mrf.mxu0  ;;  %v406_v1 = vpop.f32.mrf.mxu1 }
  0xf5   :  { %v4094_v5 = vadd.f32 %v293_v2, %v192_v4  ;;  %v4097_v41 = vadd.f32 %v406_v1, %v4070_v12 }
  0xf6   :  { %v295_v38 = vpop.f32.mrf.mxu0  ;;  %v408_v27 = vpop.f32.mrf.mxu1 }
  0xf7   :  { %5736 = vst [vmem:[#allocation50_spill] sm:$0xff] %v4094_v5  ;;  %5737 = vst [vmem:[#allocation51_spill] sm:$0xff] %v4097_v41  ;;  %v4099_v34 = vadd.f32 %v295_v38, %v196_v7  ;;  %v4102_v25 = vadd.f32 %v408_v27, %v4072_v39 }
  0xf9   :  { %5738 = vst [vmem:[#allocation52_spill] sm:$0xff] %v4099_v34  ;;  %5739 = vst [vmem:[#allocation53_spill] sm:$0xff] %v4102_v25 }
  0xfa   :  { %v299_v16 = vpop.f32.mrf.mxu0  ;;  %v412_v14 = vpop.f32.mrf.mxu1 }
  0xfb   :  { %v4104_v36 = vadd.f32 %v299_v16, %v192_v4  ;;  %v4107_v23 = vadd.f32 %v412_v14, %v4070_v12 }
  0xfc   :  { %v301_v9 = vpop.f32.mrf.mxu0  ;;  %v414_v2 = vpop.f32.mrf.mxu1 }
  0xfd   :  { %5740 = vst [vmem:[#allocation54_spill] sm:$0xff] %v4104_v36  ;;  %5741 = vst [vmem:[#allocation55_spill] sm:$0xff] %v4107_v23  ;;  %v4109_v5 = vadd.f32 %v301_v9, %v196_v7  ;;  %v4112_v1 = vadd.f32 %v414_v2, %v4072_v39 }
  0xff   :  { %5742 = vst [vmem:[#allocation56_spill] sm:$0xff] %v4109_v5  ;;  %5743 = vst [vmem:[#allocation57_spill] sm:$0xff] %v4112_v1 }
 0x100   :  { %v305_v41 = vpop.f32.mrf.mxu0  ;;  %v418_v38 = vpop.f32.mrf.mxu1 }
 0x101   :  { %v4114_v34 = vadd.f32 %v305_v41, %v192_v4  ;;  %v4117_v27 = vadd.f32 %v418_v38, %v4070_v12 }
 0x102   :  { %v307_v25 = vpop.f32.mrf.mxu0  ;;  %v420_v16 = vpop.f32.mrf.mxu1 }
 0x103   :  { %5744 = vst [vmem:[#allocation58_spill] sm:$0xff] %v4114_v34  ;;  %5745 = vst [vmem:[#allocation59_spill] sm:$0xff] %v4117_v27  ;;  %v4119_v36 = vadd.f32 %v307_v25, %v196_v7  ;;  %v4122_v14 = vadd.f32 %v420_v16, %v4072_v39 }
 0x105   :  { %5746 = vst [vmem:[#allocation60_spill] sm:$0xff] %v4119_v36  ;;  %5747 = vst [vmem:[#allocation61_spill] sm:$0xff] %v4122_v14 }
 0x106   :  { %v311_v23 = vpop.f32.mrf.mxu0  ;;  %v424_v9 = vpop.f32.mrf.mxu1 }
 0x107   :  { %v4124_v5 = vadd.f32 %v311_v23, %v192_v4  ;;  %v4127_v2 = vadd.f32 %v424_v9, %v4070_v12 }
 0x108   :  { %v313_v1 = vpop.f32.mrf.mxu0  ;;  %v426_v41 = vpop.f32.mrf.mxu1 }
 0x109   :  { %5748 = vst [vmem:[#allocation62_spill] sm:$0xff] %v4124_v5  ;;  %5749 = vst [vmem:[#allocation63_spill] sm:$0xff] %v4127_v2  ;;  %v4129_v34 = vadd.f32 %v313_v1, %v196_v7  ;;  %v4132_v38 = vadd.f32 %v426_v41, %v4072_v39  ;;  %v276_v1 = vadd.f32 %v4059_v32, %v192_v4 }
 0x10a   :  { %v278_v41 = vadd.f32 %v4066_v21, %v196_v7 }
 0x10b   :  { %5750 = vst [vmem:[#allocation64_spill] sm:$0xff] %v4129_v34  ;;  %5751 = vst [vmem:[#allocation65_spill] sm:$0xff] %v4132_v38 }
 0x10c   :  { %v317_v27 = vpop.f32.mrf.mxu0  ;;  %v430_v25 = vpop.f32.mrf.mxu1 }
 0x10d   :  { %v4134_v36 = vadd.f32 %v317_v27, %v192_v4  ;;  %v4137_v16 = vadd.f32 %v430_v25, %v4070_v12 }
 0x10e   :  { %v319_v14 = vpop.f32.mrf.mxu0  ;;  %v432_v23 = vpop.f32.mrf.mxu1 }
 0x10f   :  { %5752 = vst [vmem:[#allocation66_spill] sm:$0xff] %v4134_v36  ;;  %5753 = vst [vmem:[#allocation67_spill] sm:$0xff] %v4137_v16  ;;  %v4139_v5 = vadd.f32 %v319_v14, %v196_v7  ;;  %v4142_v9 = vadd.f32 %v432_v23, %v4072_v39  ;;  %v391_v14 = vadd.f32 %v4068_v18, %v4072_v39 }
 0x110   :  { %v389_v23 = vadd.f32 %v4061_v30, %v4070_v12 }
 0x111   :  { %5754 = vst [vmem:[#allocation68_spill] sm:$0xff] %v4139_v5  ;;  %5755 = vst [vmem:[#allocation69_spill] sm:$0xff] %v4142_v9 }
 0x112   :  { %v507_v2 = vpop.f32.mrf.mxu0  ;;  %v578_v36 = vpop.f32.mrf.mxu1 }
 0x113   :  { %v583_v38 = vadd.f32 %v507_v2, %v276_v1  ;;  %v585_v9 = vadd.f32 %v578_v36, %v389_v23  ;;  %v5758_v36 = vld [vmem:[#allocation35_spill] sm:$0xff]  ;;  %v5763_v23 = vld [vmem:[#allocation4_spill] sm:$0xff] }
 0x114   :  { %v509_v34 = vpop.f32.mrf.mxu0  ;;  %v580_v16 = vpop.f32.mrf.mxu1 }
 0x115   :  { %v2512_v56 = vmul.f32 -1.442695, %v583_v38  ;;  %v584_v27 = vadd.f32 %v509_v34, %v278_v41  ;;  %v586_v5 = vadd.f32 %v580_v16, %v391_v14  ;;  %v5762_v14 = vld [vmem:[#allocation2_spill] sm:$0xff] }
 0x117   :  { %2957 = vpow2.f32 %v2512_v56  ;;  %v2513_v25 = vmul.f32 -1.442695, %v584_v27  ;;  %v2514_v4 = vmul.f32 -1.442695, %v586_v5  ;;  %v5760_v27 = vld [vmem:[#allocation40_spill] sm:$0xff] }
 0x119   :  { %2959 = vpow2.f32 %v2513_v25  ;;  %v5761_v25 = vld [vmem:[#allocation39_spill] sm:$0xff] }
 0x11a   :  { %2961 = vpow2.f32 %v2514_v4  ;;  %v5764_v4 = vld [vmem:[#allocation41_spill] sm:$0xff] }
 0x124   :  { %v2958_v32 = vpop.eup %2957 }
 0x125   :  { %v590_v7 = vadd.f32 1.0, %v2958_v32  ;;  %v5765_v32 = vld [vmem:[#allocation5_spill] sm:$0xff] }
 0x126   :  { %v2960_v21 = vpop.eup %2959 }
 0x127   :  { %2963 = vrcp.f32 %v590_v7  ;;  %v596_v34 = vadd.f32 1.0, %v2960_v21  ;;  %v2962_v56 = vpop.eup %2961  ;;  %v5766_v7 = vld [vmem:[#allocation6_spill] sm:$0xff]  ;;  %v5767_v21 = vld [vmem:[#allocation7_spill] sm:$0xff] }
 0x128   :  { %2965 = vtanh.f32 %v585_v9  ;;  %v603_v41 = vadd.f32 1.0, %v2962_v56  ;;  %v5759_v9 = vld [vmem:[#allocation37_spill] sm:$0xff]  ;;  %v5769_v56 = vld [vmem:[#allocation8_spill] sm:$0xff] }
 0x129   :  { %2967 = vrcp.f32 %v596_v34  ;;  %v5768_v34 = vld [vmem:[#allocation3_spill] sm:$0xff] }
 0x12a   :  { %2969 = vrcp.f32 %v603_v41  ;;  %v5773_v41 = vld [vmem:[#allocation12_spill] sm:$0xff] }
 0x134   :  { %v2964_v2 = vpop.eup %2963 }
 0x135   :  { %v2966_v38 = vpop.eup %2965 }
 0x136   :  { %v2968_v1 = vpop.eup %2967  ;;  %v607_v18 = vmul.f32 %v2966_v38, %v2964_v2  ;;  %v5770_v2 = vld [vmem:[#allocation9_spill] sm:$0xff]  ;;  %v5771_v38 = vld [vmem:[#allocation10_spill] sm:$0xff] }
 0x137   :  { %v606_v39 = vmul.f32 %v2968_v1, %v3901_v20  ;;  %v2970_v5 = vpop.eup %2969  ;;  %v5757_v20 = vld [vmem:[#allocation33_spill] sm:$0xff]  ;;  %v5772_v1 = vld [vmem:[#allocation11_spill] sm:$0xff] }
 0x139   :  { %v4151_v16 = vadd.f32 %v607_v18, %v606_v39  ;;  %v5774_v18 = vld [vmem:[#allocation13_spill] sm:$0xff]  ;;  %v5775_v39 = vld [vmem:[#allocation14_spill] sm:$0xff] }
 0x13b   :  { %2971 = vtanh.f32 %v4151_v16 }
 0x148   :  { %v2972_v12 = vpop.eup %2971 }
 0x149   :  { %v4154_v30 = vmul.f32 %v2972_v12, %v2970_v5  ;;  %v5776_v5 = vld [vmem:[#allocation15_spill] sm:$0xff]  ;;  %v5777_v12 = vld [vmem:[#allocation16_spill] sm:$0xff] }
 0x14b   :  { %2708 = vmatmul.mubr.f32.vlgmr.msra.gmra.mxu0 %v4154_v30  ;;  %780 = vmatmul.mubr.f32.vlgmr.msra.gmra.mxu1 %v4154_v30 }
 0x14c   :  { %787 = vmatpush1.msra.mxu0 %v3499_v6  ;;  %850 = vmatprep.mubr.f32.mxu0 %v5725_v0  ;;  %v5756_v6 = vld [vmem:[#allocation31_spill] sm:$0xff] }
 0x14d   :  { %788 = vmatprep.subr.mxu0 %v3509_v8  ;;  %2711 = vmatpush3.msra.mxu1 %v3947_v57 }
 0x14e   :  { %789 = vmatpush1.msra.mxu0 %v3523_v10  ;;  %2712 = vmatprep.subr.mxu1 %v5725_v0 }
 0x14f   :  { %790 = vmatprep.subr.mxu0 %v3540_v13  ;;  %2713 = vmatpush3.msra.mxu1 %v3954_v11 }
 0x150   :  { %791 = vmatpush1.msra.mxu0 %v3552_v15  ;;  %2714 = vmatprep.subr.mxu1 %v5725_v0 }
 0x151   :  { %792 = vmatprep.subr.mxu0 %v3562_v17  ;;  %2715 = vmatpush3.msra.mxu1 %v3961_v3 }
 0x152   :  { %793 = vmatpush1.msra.mxu0 %v3576_v19  ;;  %2716 = vmatprep.subr.mxu1 %v5725_v0 }
 0x153   :  { %794 = vmatprep.subr.mxu0 %v3593_v22  ;;  %2717 = vmatpush3.msra.mxu1 %v3968_v47 }
 0x154   :  { %795 = vmatpush1.msra.mxu0 %v3605_v24  ;;  %2718 = vmatprep.subr.mxu1 %v5725_v0 }
 0x155   :  { %796 = vmatprep.subr.mxu0 %v3615_v26  ;;  %2719 = vmatpush3.msra.mxu1 %v3975_v29 }
 0x156   :  { %797 = vmatpush1.msra.mxu0 %v3629_v28  ;;  %2720 = vmatprep.subr.mxu1 %v5725_v0 }
 0x157   :  { %798 = vmatprep.subr.mxu0 %v3646_v31  ;;  %2721 = vmatpush3.msra.mxu1 %v3982_v63 }
 0x158   :  { %799 = vmatpush1.msra.mxu0 %v3658_v33  ;;  %2722 = vmatprep.subr.mxu1 %v5725_v0 }
 0x159   :  { %800 = vmatprep.subr.mxu0 %v3668_v35  ;;  %2723 = vmatpush3.msra.mxu1 %v3989_v61 }
 0x15a   :  { %801 = vmatpush1.msra.mxu0 %v3682_v37  ;;  %2724 = vmatprep.subr.mxu1 %v5725_v0 }
 0x15b   :  { %802 = vmatprep.subr.mxu0 %v3699_v40  ;;  %2725 = vmatpush3.msra.mxu1 %v3996_v59 }
 0x15c   :  { %803 = vmatpush1.msra.mxu0 %v3711_v42  ;;  %2726 = vmatprep.subr.mxu1 %v5725_v0 }
 0x15d   :  { %804 = vmatprep.subr.mxu0 %v3721_v44  ;;  %2727 = vmatpush3.msra.mxu1 %v4001_v54 }
 0x15e   :  { %805 = vmatpush1.msra.mxu0 %v3735_v46  ;;  %2728 = vmatprep.subr.mxu1 %v5725_v0 }
 0x15f   :  { %806 = vmatprep.subr.mxu0 %v3752_v49  ;;  %2729 = vmatpush3.msra.mxu1 %v4010_v52 }
 0x160   :  { %807 = vmatpush1.msra.mxu0 %v3764_v51  ;;  %2730 = vmatprep.subr.mxu1 %v5725_v0 }
 0x161   :  { %808 = vmatprep.subr.mxu0 %v3774_v53  ;;  %2731 = vmatpush3.msra.mxu1 %v4017_v50 }
 0x162   :  { %809 = vmatpush1.msra.mxu0 %v3788_v55  ;;  %2732 = vmatprep.subr.mxu1 %v5725_v0 }
 0x163   :  { %810 = vmatprep.subr.mxu0 %v3805_v58  ;;  %2733 = vmatpush3.msra.mxu1 %v4024_v48 }
 0x164   :  { %811 = vmatpush1.msra.mxu0 %v3817_v60  ;;  %2734 = vmatprep.subr.mxu1 %v5725_v0 }
 0x165   :  { %812 = vmatprep.subr.mxu0 %v3827_v62  ;;  %2735 = vmatpush3.msra.mxu1 %v4031_v45 }
 0x166   :  { %813 = vmatpush1.msra.mxu0 %v5756_v6  ;;  %2736 = vmatprep.subr.mxu1 %v5725_v0 }
 0x167   :  { %814 = vmatprep.subr.mxu0 %v5757_v20  ;;  %2737 = vmatpush3.msra.mxu1 %v4038_v43 }
 0x168   :  { %815 = vmatpush1.msra.mxu0 %v5758_v36  ;;  %2738 = vmatprep.subr.mxu1 %v5725_v0 }
 0x169   :  { %816 = vmatprep.subr.mxu0 %v5759_v9  ;;  %2739 = vmatpush3.msra.mxu1 %v5760_v27 }
 0x16a   :  { %817 = vmatpush1.msra.mxu0 %v5761_v25  ;;  %2740 = vmatprep.subr.mxu1 %v5725_v0 }
 0x16b   :  { %851 = vmatmul.mubr.f32.vlgmr.msra.gmra.mxu0 %v4154_v30  ;;  %971 = vmatprep.subr.mxu0 %v5762_v14  ;;  %v5778_v30 = vld [vmem:[#allocation17_spill] sm:$0xff]  ;;  %v5779_v14 = vld [vmem:[#allocation18_spill] sm:$0xff] }
 0x16c   :  { %972 = vmatpush1.msra.mxu0 %v5763_v23  ;;  %2741 = vmatpush3.msra.mxu1 %v5764_v4  ;;  %v5780_v23 = vld [vmem:[#allocation19_spill] sm:$0xff] }
 0x16d   :  { %973 = vmatprep.subr.mxu0 %v5765_v32  ;;  %2742 = vmatprep.mubr.msk.f32.mxu1 %vm3233_vm0, %v5725_v0  ;;  %v5781_v32 = vld [vmem:[#allocation20_spill] sm:$0xff] }
 0x16e   :  { %974 = vmatpush1.msra.mxu0 %v5766_v7  ;;  %1035 = vmatprep.mubr.f32.mxu0 %v5725_v0  ;;  %v5782_v7 = vld [vmem:[#allocation21_spill] sm:$0xff] }
 0x16f   :  { %975 = vmatprep.subr.mxu0 %v5767_v21  ;;  %1042 = vmatprep.subr.mxu1 %v5768_v34  ;;  %v5783_v21 = vld [vmem:[#allocation22_spill] sm:$0xff]  ;;  %v5784_v34 = vld [vmem:[#allocation23_spill] sm:$0xff] }
 0x170   :  { %976 = vmatpush1.msra.mxu0 %v5769_v56  ;;  %v5785_v56 = vld [vmem:[#allocation24_spill] sm:$0xff] }
 0x171   :  { %977 = vmatprep.subr.mxu0 %v5770_v2  ;;  %v5786_v2 = vld [vmem:[#allocation25_spill] sm:$0xff] }
 0x172   :  { %978 = vmatpush1.msra.mxu0 %v5771_v38  ;;  %v5787_v38 = vld [vmem:[#allocation26_spill] sm:$0xff] }
 0x173   :  { %979 = vmatprep.subr.mxu0 %v5772_v1  ;;  %v5788_v1 = vld [vmem:[#allocation27_spill] sm:$0xff] }
 0x174   :  { %980 = vmatpush1.msra.mxu0 %v5773_v41  ;;  %v5789_v41 = vld [vmem:[#allocation28_spill] sm:$0xff] }
 0x175   :  { %981 = vmatprep.subr.mxu0 %v5774_v18  ;;  %v5790_v18 = vld [vmem:[#allocation29_spill] sm:$0xff] }
 0x176   :  { %982 = vmatpush1.msra.mxu0 %v5775_v39  ;;  %v5791_v39 = vld [vmem:[#allocation30_spill] sm:$0xff] }
 0x177   :  { %983 = vmatprep.subr.mxu0 %v5776_v5  ;;  %v5792_v5 = vld [vmem:[#allocation32_spill] sm:$0xff] }
 0x178   :  { %984 = vmatpush1.msra.mxu0 %v5777_v12  ;;  %v5793_v12 = vld [vmem:[#allocation34_spill] sm:$0xff] }
 0x179   :  { %985 = vmatprep.subr.mxu0 %v5778_v30  ;;  %v5794_v30 = vld [vmem:[#allocation36_spill] sm:$0xff] }
 0x17a   :  { %986 = vmatpush1.msra.mxu0 %v5779_v14  ;;  %v5795_v14 = vld [vmem:[#allocation38_spill] sm:$0xff] }
 0x17b   :  { %987 = vmatprep.subr.mxu0 %v5780_v23  ;;  %v5796_v23 = vlaneseq }
 0x17c   :  { %988 = vmatpush1.msra.mxu0 %v5781_v32 }
 0x17d   :  { %989 = vmatprep.subr.mxu0 %v5782_v7  ;;  %v436_v32 = vand.u32 127, %v5796_v23  ;;  %v5799_v23 = vld [vmem:[#allocation44_spill] sm:$0xff] }
 0x17e   :  { %990 = vmatpush1.msra.mxu0 %v5783_v21 }
 0x17f   :  { %991 = vmatprep.subr.mxu0 %v5784_v34  ;;  %vm437_vm1 = vcmp.lt.s32.totalorder %v436_v32, 64 }
 0x180   :  { %992 = vmatpush1.msra.mxu0 %v5785_v56 }
 0x181   :  { %993 = vmatprep.subr.mxu0 %v5786_v2 }
 0x182   :  { %994 = vmatpush1.msra.mxu0 %v5787_v38  ;;  %v5800_v38 = vld [vmem:[#allocation42_spill] sm:$0xff] }
 0x183   :  { %995 = vmatprep.subr.mxu0 %v5788_v1 }
 0x184   :  { %996 = vmatpush1.msra.mxu0 %v5789_v41  ;;  %v4263_v41 = vld [vmem:[%s5547_s6] ss:$0 sm:$0xff] }
 0x185   :  { %997 = vmatprep.subr.mxu0 %v5790_v18  ;;  %5797 = vst [vmem:[#allocation31_spill] sm:$0xff] %v4263_v41 }
 0x186   :  { %998 = vmatpush1.msra.mxu0 %v5791_v39  ;;  %v4266_v39 = vsel %vm437_vm1, 1.0, %v5725_v0 }
 0x187   :  { %999 = vmatprep.subr.mxu0 %v5792_v5 }
 0x188   :  { %1000 = vmatpush1.msra.mxu0 %v5793_v12 }
 0x189   :  { %1001 = vmatprep.subr.mxu0 %v5794_v30 }
 0x18a   :  { %1002 = vmatpush1.msra.mxu0 %v5795_v14 }
 0x18b   :  { %2745 = vmatprep.subr.mxu0 %v5725_v0 }
 0x20b   :  { %v683_v5 = vpop.f32.mrf.mxu0  ;;  %v781_v18 = vpop.f32.mrf.mxu1 }
 0x20c   :  { %v4269_v12 = vadd.f32 %v4263_v41, %v683_v5  ;;  %v857_v2 = vadd.f32 %v781_v18, %v5800_v38 }
 0x20d   :  { %v2709_v30 = vpop.f32.mrf.mxu0  ;;  %v783_v14 = vpop.f32.mrf.mxu1 }
 0x20e   :  { %5798 = vst [vmem:[#allocation33_spill] sm:$0xff] %v4269_v12  ;;  %v687_v1 = vmul.f32 %v4266_v39, %v4269_v12  ;;  %v858_v32 = vadd.f32 %v783_v14, %v5799_v23  ;;  %v2518_v34 = vmul.f32 -1.442695, %v857_v2  ;;  %v5801_v30 = vld [vmem:[#allocation43_spill] sm:$0xff]  ;;  %v5802_v12 = vld [vmem:[#allocation45_spill] sm:$0xff] }
 0x210   :  { %688 = vadd.xlane.f32.xlu0 %v687_v1  ;;  %v2519_v56 = vmul.f32 -1.442695, %v858_v32  ;;  %v5834_v32 = vld [vmem:[#allocation30_spill] sm:$0xff] }
 0x212   :  { %2973 = vpow2.f32 %v2519_v56 }
 0x213   :  { %2975 = vpow2.f32 %v2518_v34 }
 0x21f   :  { %v2974_v21 = vpop.eup %2973 }
 0x220   :  { %v2976_v7 = vpop.eup %2975  ;;  %v870_v4 = vadd.f32 1.0, %v2974_v21 }
 0x221   :  { %v864_v25 = vadd.f32 1.0, %v2976_v7 }
 0x222   :  { %2977 = vrcp.f32 %v870_v4 }
 0x223   :  { %2979 = vrcp.f32 %v864_v25 }
 0x22b   :  { %v852_v5 = vpop.f32.mrf.mxu0 }
 0x22c   :  { %v859_v41 = vadd.f32 %v852_v5, %v5801_v30  ;;  %v5835_v5 = vld [vmem:[#allocation32_spill] sm:$0xff]  ;;  %v5836_v30 = vld [vmem:[#allocation34_spill] sm:$0xff] }
 0x22d   :  { %v854_v27 = vpop.f32.mrf.mxu0 }
 0x22e   :  { %2981 = vtanh.f32 %v859_v41  ;;  %v860_v14 = vadd.f32 %v854_v27, %v5802_v12  ;;  %v5832_v27 = vld [vmem:[#allocation28_spill] sm:$0xff]  ;;  %v5833_v12 = vld [vmem:[#allocation29_spill] sm:$0xff] }
 0x22f   :  { %v2978_v38 = vpop.eup %2977 }
 0x230   :  { %v2520_v1 = vmul.f32 -1.442695, %v860_v14  ;;  %v2980_v18 = vpop.eup %2979  ;;  %v880_v34 = vmul.f32 %v2978_v38, %v4151_v16  ;;  %v4288_v16 = vld [vmem:[%s5543_s3 + $0x1f0] sm:$0xff] }
 0x231   :  { %v5837_v14 = vld [vmem:[#allocation36_spill] sm:$0xff] }
 0x232   :  { %2983 = vpow2.f32 %v2520_v1  ;;  %v5838_v1 = vld [vmem:[#allocation38_spill] sm:$0xff] }
 0x23b   :  { %v2982_v2 = vpop.eup %2981 }
 0x23c   :  { %v881_v56 = vmul.f32 %v2982_v2, %v2980_v18  ;;  %v5839_v2 = vld [vmem:[#allocation31_spill] sm:$0xff] }
 0x23e   :  { %v4278_v23 = vadd.f32 %v881_v56, %v880_v34 }
 0x23f   :  { %v2984_v7 = vpop.eup %2983 }
 0x240   :  { %v877_v21 = vadd.f32 1.0, %v2984_v7  ;;  %2985 = vtanh.f32 %v4278_v23 }
 0x242   :  { %2987 = vrcp.f32 %v877_v21 }
 0x24d   :  { %v2986_v25 = vpop.eup %2985 }
 0x24f   :  { %v2988_v4 = vpop.eup %2987 }
 0x250   :  { %v4281_v41 = vmul.f32 %v2988_v4, %v2986_v25  ;;  %v5841_v25 = vld [vmem:[#allocation48_spill] sm:$0xff] }
 0x252   :  { %2743 = vmatmul.mubr.f32.vlgmr.msra.gmra.mxu1 %v4281_v41  ;;  %1036 = vmatmul.mubr.f32.vlgmr.msra.gmra.mxu0 %v4281_v41 }
 0x253   :  { %1043 = vmatpush1.msra.mxu1 %v4288_v16  ;;  %1106 = vmatprep.mubr.f32.mxu1 %v5725_v0 }
 0x254   :  { %1044 = vmatprep.subr.mxu1 %v3509_v8  ;;  %2746 = vmatpush3.msra.mxu0 %v3947_v57  ;;  %v5803_v8 = vld [vmem:[#allocation40_spill] sm:$0xff] }
 0x255   :  { %1045 = vmatpush1.msra.mxu1 %v3523_v10  ;;  %2747 = vmatprep.subr.mxu0 %v5725_v0  ;;  %v5804_v10 = vld [vmem:[#allocation39_spill] sm:$0xff] }
 0x256   :  { %1046 = vmatprep.subr.mxu1 %v3540_v13  ;;  %2748 = vmatpush3.msra.mxu0 %v3954_v11  ;;  %v4356_v13 = vld [vmem:[%s5543_s3 + $0x1e8] sm:$0xff] }
 0x257   :  { %1047 = vmatpush1.msra.mxu1 %v3552_v15  ;;  %2749 = vmatprep.subr.mxu0 %v5725_v0  ;;  %5805 = vst [vmem:[#allocation35_spill] sm:$0xff] %v4356_v13  ;;  %v4362_v15 = vld [vmem:[%s5543_s3 + $0x1e0] sm:$0xff] }
 0x258   :  { %1048 = vmatprep.subr.mxu1 %v3562_v17  ;;  %2750 = vmatpush3.msra.mxu0 %v3961_v3  ;;  %5806 = vst [vmem:[#allocation37_spill] sm:$0xff] %v4362_v15  ;;  %v5807_v17 = vld [vmem:[#allocation41_spill] sm:$0xff] }
 0x259   :  { %1049 = vmatpush1.msra.mxu1 %v3576_v19  ;;  %2751 = vmatprep.subr.mxu0 %v5725_v0  ;;  %v4369_v19 = vld [vmem:[%s5543_s3 + $0x1c8] sm:$0xff] }
 0x25a   :  { %1050 = vmatprep.subr.mxu1 %v3593_v22  ;;  %2752 = vmatpush3.msra.mxu0 %v3968_v47  ;;  %5808 = vst [vmem:[#allocation2_spill] sm:$0xff] %v4369_v19  ;;  %v4377_v22 = vld [vmem:[%s5543_s3 + $0x1c0] sm:$0xff] }
 0x25b   :  { %1051 = vmatpush1.msra.mxu1 %v3605_v24  ;;  %2753 = vmatprep.subr.mxu0 %v5725_v0  ;;  %5809 = vst [vmem:[#allocation4_spill] sm:$0xff] %v4377_v22  ;;  %v4384_v24 = vld [vmem:[%s5543_s3 + $0x1a8] sm:$0xff] }
 0x25c   :  { %1052 = vmatprep.subr.mxu1 %v3615_v26  ;;  %2754 = vmatpush3.msra.mxu0 %v3975_v29  ;;  %5810 = vst [vmem:[#allocation5_spill] sm:$0xff] %v4384_v24  ;;  %v4390_v26 = vld [vmem:[%s5543_s3 + $0x1f8] sm:$0xff] }
 0x25d   :  { %1053 = vmatpush1.msra.mxu1 %v3629_v28  ;;  %2755 = vmatprep.subr.mxu0 %v5725_v0  ;;  %5811 = vst [vmem:[#allocation6_spill] sm:$0xff] %v4390_v26  ;;  %v4396_v28 = vld [vmem:[%s5543_s3 + $0x1a0] sm:$0xff] }
 0x25e   :  { %1054 = vmatprep.subr.mxu1 %v3646_v31  ;;  %2756 = vmatpush3.msra.mxu0 %v3982_v63  ;;  %5812 = vst [vmem:[#allocation7_spill] sm:$0xff] %v4396_v28  ;;  %v4402_v31 = vld [vmem:[%s5543_s3 + $0x188] sm:$0xff] }
 0x25f   :  { %1055 = vmatpush1.msra.mxu1 %v3658_v33  ;;  %2757 = vmatprep.subr.mxu0 %v5725_v0  ;;  %5813 = vst [vmem:[#allocation3_spill] sm:$0xff] %v4402_v31  ;;  %v4408_v33 = vld [vmem:[%s5543_s3 + $0x180] sm:$0xff] }
 0x260   :  { %1056 = vmatprep.subr.mxu1 %v3668_v35  ;;  %2758 = vmatpush3.msra.mxu0 %v3989_v61  ;;  %5814 = vst [vmem:[#allocation8_spill] sm:$0xff] %v4408_v33  ;;  %v4414_v35 = vld [vmem:[%s5543_s3 + $0x168] sm:$0xff] }
 0x261   :  { %1057 = vmatpush1.msra.mxu1 %v3682_v37  ;;  %2759 = vmatprep.subr.mxu0 %v5725_v0  ;;  %5815 = vst [vmem:[#allocation9_spill] sm:$0xff] %v4414_v35  ;;  %v4420_v37 = vld [vmem:[%s5543_s3 + $0x160] sm:$0xff] }
 0x262   :  { %1058 = vmatprep.subr.mxu1 %v3699_v40  ;;  %2760 = vmatpush3.msra.mxu0 %v3996_v59  ;;  %5816 = vst [vmem:[#allocation10_spill] sm:$0xff] %v4420_v37  ;;  %v4426_v40 = vld [vmem:[%s5543_s3 + $0x148] sm:$0xff] }
 0x263   :  { %1059 = vmatpush1.msra.mxu1 %v3711_v42  ;;  %2761 = vmatprep.subr.mxu0 %v5725_v0  ;;  %5817 = vst [vmem:[#allocation11_spill] sm:$0xff] %v4426_v40  ;;  %v4432_v42 = vld [vmem:[%s5543_s3 + $0x140] sm:$0xff] }
 0x264   :  { %1060 = vmatprep.subr.mxu1 %v3721_v44  ;;  %2762 = vmatpush3.msra.mxu0 %v4001_v54  ;;  %5818 = vst [vmem:[#allocation12_spill] sm:$0xff] %v4432_v42  ;;  %v4438_v44 = vld [vmem:[%s5543_s3 + $0x128] sm:$0xff] }
 0x265   :  { %1061 = vmatpush1.msra.mxu1 %v3735_v46  ;;  %2763 = vmatprep.subr.mxu0 %v5725_v0  ;;  %5819 = vst [vmem:[#allocation13_spill] sm:$0xff] %v4438_v44  ;;  %v4444_v46 = vld [vmem:[%s5543_s3 + $0x120] sm:$0xff] }
 0x266   :  { %1062 = vmatprep.subr.mxu1 %v3752_v49  ;;  %2764 = vmatpush3.msra.mxu0 %v4010_v52  ;;  %5820 = vst [vmem:[#allocation14_spill] sm:$0xff] %v4444_v46  ;;  %v4450_v49 = vld [vmem:[%s5543_s3 + $0x108] sm:$0xff] }
 0x267   :  { %1063 = vmatpush1.msra.mxu1 %v3764_v51  ;;  %2765 = vmatprep.subr.mxu0 %v5725_v0  ;;  %5821 = vst [vmem:[#allocation15_spill] sm:$0xff] %v4450_v49  ;;  %v4456_v51 = vld [vmem:[%s5543_s3 + $0x100] sm:$0xff] }
 0x268   :  { %1064 = vmatprep.subr.mxu1 %v3774_v53  ;;  %2766 = vmatpush3.msra.mxu0 %v4017_v50  ;;  %5822 = vst [vmem:[#allocation16_spill] sm:$0xff] %v4456_v51  ;;  %v4462_v53 = vld [vmem:[%s5543_s3 + $0xe8] sm:$0xff] }
 0x269   :  { %1065 = vmatpush1.msra.mxu1 %v3788_v55  ;;  %2767 = vmatprep.subr.mxu0 %v5725_v0  ;;  %5823 = vst [vmem:[#allocation17_spill] sm:$0xff] %v4462_v53  ;;  %v4468_v55 = vld [vmem:[%s5543_s3 + $0xe0] sm:$0xff] }
 0x26a   :  { %1066 = vmatprep.subr.mxu1 %v3805_v58  ;;  %2768 = vmatpush3.msra.mxu0 %v4024_v48  ;;  %5824 = vst [vmem:[#allocation18_spill] sm:$0xff] %v4468_v55  ;;  %v5825_v58 = vld [vmem:[#allocation21_spill] sm:$0xff] }
 0x26b   :  { %1067 = vmatpush1.msra.mxu1 %v3817_v60  ;;  %2769 = vmatprep.subr.mxu0 %v5725_v0  ;;  %v5826_v60 = vld [vmem:[#allocation22_spill] sm:$0xff] }
 0x26c   :  { %1068 = vmatprep.subr.mxu1 %v3827_v62  ;;  %2770 = vmatpush3.msra.mxu0 %v4031_v45  ;;  %v5827_v62 = vld [vmem:[#allocation23_spill] sm:$0xff] }
 0x26d   :  { %1069 = vmatpush1.msra.mxu1 %v5756_v6  ;;  %2771 = vmatprep.subr.mxu0 %v5725_v0  ;;  %v5828_v6 = vld [vmem:[#allocation24_spill] sm:$0xff] }
 0x26e   :  { %1070 = vmatprep.subr.mxu1 %v5757_v20  ;;  %2772 = vmatpush3.msra.mxu0 %v4038_v43  ;;  %v5829_v20 = vld [vmem:[#allocation25_spill] sm:$0xff] }
 0x26f   :  { %1071 = vmatpush1.msra.mxu1 %v5758_v36  ;;  %2773 = vmatprep.subr.mxu0 %v5725_v0  ;;  %v5830_v36 = vld [vmem:[#allocation26_spill] sm:$0xff] }
 0x270   :  { %1072 = vmatprep.subr.mxu1 %v5759_v9  ;;  %2774 = vmatpush3.msra.mxu0 %v5803_v8  ;;  %v5831_v9 = vld [vmem:[#allocation27_spill] sm:$0xff] }
 0x271   :  { %1073 = vmatpush1.msra.mxu1 %v5804_v10  ;;  %2775 = vmatprep.subr.mxu0 %v5725_v0 }
 0x272   :  { %1107 = vmatmul.mubr.f32.vlgmr.msra.gmra.mxu1 %v4281_v41  ;;  %1227 = vmatprep.subr.mxu1 %v4356_v13  ;;  %v5842_v41 = vld [vmem:[#allocation46_spill] sm:$0xff] }
 0x273   :  { %1228 = vmatpush1.msra.mxu1 %v4362_v15  ;;  %2776 = vmatpush3.msra.mxu0 %v5807_v17 }
 0x274   :  { %1229 = vmatprep.subr.mxu1 %v4369_v19  ;;  %2777 = vmatprep.mubr.msk.f32.mxu0 %vm3233_vm0, %v5725_v0 }
 0x275   :  { %1230 = vmatpush1.msra.mxu1 %v4377_v22  ;;  %1291 = vmatprep.mubr.f32.mxu1 %v5725_v0 }
 0x276   :  { %1231 = vmatprep.subr.mxu1 %v4384_v24  ;;  %1298 = vmatprep.subr.mxu0 %v4390_v26 }
 0x277   :  { %1232 = vmatpush1.msra.mxu1 %v4396_v28 }
 0x278   :  { %1233 = vmatprep.subr.mxu1 %v4402_v31 }
 0x279   :  { %1234 = vmatpush1.msra.mxu1 %v4408_v33 }
 0x27a   :  { %1235 = vmatprep.subr.mxu1 %v4414_v35 }
 0x27b   :  { %1236 = vmatpush1.msra.mxu1 %v4420_v37 }
 0x27c   :  { %1237 = vmatprep.subr.mxu1 %v4426_v40 }
 0x27d   :  { %1238 = vmatpush1.msra.mxu1 %v4432_v42 }
 0x27e   :  { %1239 = vmatprep.subr.mxu1 %v4438_v44 }
 0x27f   :  { %1240 = vmatpush1.msra.mxu1 %v4444_v46 }
 0x280   :  { %1241 = vmatprep.subr.mxu1 %v4450_v49 }
 0x281   :  { %1242 = vmatpush1.msra.mxu1 %v4456_v51 }
 0x282   :  { %1243 = vmatprep.subr.mxu1 %v4462_v53 }
 0x283   :  { %1244 = vmatpush1.msra.mxu1 %v4468_v55 }
 0x284   :  { %1245 = vmatprep.subr.mxu1 %v5825_v58 }
 0x285   :  { %1246 = vmatpush1.msra.mxu1 %v5826_v60 }
 0x286   :  { %1247 = vmatprep.subr.mxu1 %v5827_v62 }
 0x287   :  { %1248 = vmatpush1.msra.mxu1 %v5828_v6 }
 0x288   :  { %1249 = vmatprep.subr.mxu1 %v5829_v20 }
 0x289   :  { %1250 = vmatpush1.msra.mxu1 %v5830_v36 }
 0x28a   :  { %1251 = vmatprep.subr.mxu1 %v5831_v9 }
 0x28b   :  { %1252 = vmatpush1.msra.mxu1 %v5832_v27  ;;  %v5843_v27 = vld [vmem:[#allocation47_spill] sm:$0xff] }
 0x28c   :  { %1253 = vmatprep.subr.mxu1 %v5833_v12 }
 0x28d   :  { %1254 = vmatpush1.msra.mxu1 %v5834_v32 }
 0x28e   :  { %1255 = vmatprep.subr.mxu1 %v5835_v5  ;;  %v5844_v5 = vld [vmem:[#allocation49_spill] sm:$0xff] }
 0x28f   :  { %1256 = vmatpush1.msra.mxu1 %v5836_v30 }
 0x290   :  { %1257 = vmatprep.subr.mxu1 %v5837_v14 }
 0x291   :  { %1258 = vmatpush1.msra.mxu1 %v5838_v1 }
 0x292   :  { %2780 = vmatprep.subr.mxu1 %v5725_v0 }
 0x312   :  { %v951_v38 = vpop.f32.mrf.mxu1  ;;  %v1037_v18 = vpop.f32.mrf.mxu0 }
 0x313   :  { %v4487_v34 = vadd.f32 %v5839_v2, %v951_v38  ;;  %v1113_v10 = vadd.f32 %v1037_v18, %v5842_v41 }
 0x314   :  { %v2744_v56 = vpop.f32.mrf.mxu1  ;;  %v1039_v7 = vpop.f32.mrf.mxu0 }
 0x315   :  { %5840 = vst [vmem:[#allocation19_spill] sm:$0xff] %v4487_v34  ;;  %v955_v21 = vmul.f32 %v4266_v39, %v4487_v34  ;;  %v1114_v4 = vadd.f32 %v1039_v7, %v5841_v25  ;;  %v2521_v60 = vmul.f32 -1.442695, %v1113_v10  ;;  %v4796_v34 = vld [vmem:[%s5543_s3 + $0x40] sm:$0xff] }
 0x316   :  { %5856 = vst [vmem:[#allocation24_spill] sm:$0xff] %v4796_v34 }
 0x317   :  { %956 = vadd.xlane.f32.xlu0 %v955_v21  ;;  %v2522_v58 = vmul.f32 -1.442695, %v1114_v4 }
 0x319   :  { %2989 = vpow2.f32 %v2522_v58 }
 0x31a   :  { %2991 = vpow2.f32 %v2521_v60  ;;  %v4515_v60 = vld [vmem:[%s5543_s3 + $0x1d0] sm:$0xff] }
 0x326   :  { %v2990_v62 = vpop.eup %2989 }
 0x327   :  { %v2992_v6 = vpop.eup %2991  ;;  %v1126_v20 = vadd.f32 1.0, %v2990_v62  ;;  %v4522_v62 = vld [vmem:[%s5543_s3 + $0x1b8] sm:$0xff] }
 0x328   :  { %v1120_v36 = vadd.f32 1.0, %v2992_v6  ;;  %v4536_v6 = vld [vmem:[%s5543_s3 + $0x198] sm:$0xff] }
 0x329   :  { %2993 = vrcp.f32 %v1126_v20  ;;  %v4550_v20 = vld [vmem:[%s5543_s3 + $0x178] sm:$0xff] }
 0x32a   :  { %2995 = vrcp.f32 %v1120_v36  ;;  %v4564_v36 = vld [vmem:[%s5543_s3 + $0x158] sm:$0xff] }
 0x332   :  { %v1108_v9 = vpop.f32.mrf.mxu1 }
 0x333   :  { %v1115_v12 = vadd.f32 %v1108_v9, %v5843_v27  ;;  %v4578_v9 = vld [vmem:[%s5543_s3 + $0x138] sm:$0xff] }
 0x334   :  { %v1110_v32 = vpop.f32.mrf.mxu1  ;;  %v4592_v27 = vld [vmem:[%s5543_s3 + $0x118] sm:$0xff] }
 0x335   :  { %2997 = vtanh.f32 %v1115_v12  ;;  %v1116_v30 = vadd.f32 %v1110_v32, %v5844_v5  ;;  %v4606_v12 = vld [vmem:[%s5543_s3 + $0xf8] sm:$0xff] }
 0x336   :  { %v2994_v1 = vpop.eup %2993  ;;  %v4620_v32 = vld [vmem:[%s5543_s3 + $0xd8] sm:$0xff] }
 0x337   :  { %v2523_v14 = vmul.f32 -1.442695, %v1116_v30  ;;  %v2996_v38 = vpop.eup %2995  ;;  %v1136_v56 = vmul.f32 %v2994_v1, %v4278_v23  ;;  %v4508_v23 = vld [vmem:[%s5543_s3 + $0x1d8] sm:$0xff] }
 0x338   :  { %v4634_v5 = vld [vmem:[%s5543_s3 + $0xb8] sm:$0xff] }
 0x339   :  { %2999 = vpow2.f32 %v2523_v14  ;;  %v4648_v30 = vld [vmem:[%s5543_s3 + $0x98] sm:$0xff] }
 0x33a   :  { %v4662_v14 = vld [vmem:[%s5543_s3 + $0x78] sm:$0xff] }
 0x33b   :  { %v4676_v1 = vld [vmem:[%s5543_s3 + $0x58] sm:$0xff] }
 0x342   :  { %v2998_v18 = vpop.eup %2997 }
 0x343   :  { %v1137_v7 = vmul.f32 %v2998_v18, %v2996_v38  ;;  %v4690_v38 = vld [vmem:[%s5543_s3 + $0x38] sm:$0xff] }
 0x344   :  { %v4704_v18 = vld [vmem:[%s5543_s3 + $0x18] sm:$0xff] }
 0x345   :  { %v4496_v21 = vadd.f32 %v1137_v7, %v1136_v56  ;;  %5845 = vst [vmem:[#allocation20_spill] sm:$0xff] %v4704_v18  ;;  %v4754_v56 = vld [vmem:[%s5543_s3 + $0xa8] sm:$0xff]  ;;  %v4760_v7 = vld [vmem:[%s5543_s3 + $0xa0] sm:$0xff] }
 0x346   :  { %v3000_v25 = vpop.eup %2999  ;;  %5849 = vst [vmem:[#allocation45_spill] sm:$0xff] %v4754_v56  ;;  %5850 = vst [vmem:[#allocation40_spill] sm:$0xff] %v4760_v7 }
 0x347   :  { %v1133_v4 = vadd.f32 1.0, %v3000_v25  ;;  %3001 = vtanh.f32 %v4496_v21  ;;  %v4766_v25 = vld [vmem:[%s5543_s3 + $0x88] sm:$0xff] }
 0x348   :  { %5851 = vst [vmem:[#allocation39_spill] sm:$0xff] %v4766_v25 }
 0x349   :  { %3003 = vrcp.f32 %v1133_v4  ;;  %v4772_v4 = vld [vmem:[%s5543_s3 + $0x80] sm:$0xff] }
 0x34a   :  { %5852 = vst [vmem:[#allocation41_spill] sm:$0xff] %v4772_v4 }
 0x354   :  { %v3002_v41 = vpop.eup %3001 }
 0x356   :  { %v3004_v10 = vpop.eup %3003 }
 0x357   :  { %v4499_v58 = vmul.f32 %v3004_v10, %v3002_v41  ;;  %v4778_v41 = vld [vmem:[%s5543_s3 + $0x68] sm:$0xff]  ;;  %v4784_v10 = vld [vmem:[%s5543_s3 + $0x60] sm:$0xff] }
 0x358   :  { %5853 = vst [vmem:[#allocation21_spill] sm:$0xff] %v4778_v41  ;;  %5854 = vst [vmem:[#allocation22_spill] sm:$0xff] %v4784_v10 }
 0x359   :  { %2778 = vmatmul.mubr.f32.vlgmr.msra.gmra.mxu0 %v4499_v58  ;;  %1292 = vmatmul.mubr.f32.vlgmr.msra.gmra.mxu1 %v4499_v58 }
 0x35a   :  { %1299 = vmatpush1.msra.mxu0 %v4288_v16  ;;  %1362 = vmatprep.mubr.f32.mxu0 %v5725_v0 }
 0x35b   :  { %1300 = vmatprep.subr.mxu0 %v4508_v23  ;;  %2781 = vmatpush3.msra.mxu1 %v3947_v57  ;;  %v4529_v57 = vld [vmem:[%s5543_s3 + $0x1b0] sm:$0xff] }
 0x35c   :  { %1301 = vmatpush1.msra.mxu0 %v4515_v60  ;;  %2782 = vmatprep.subr.mxu1 %v5725_v0 }
 0x35d   :  { %1302 = vmatprep.subr.mxu0 %v4522_v62  ;;  %2783 = vmatpush3.msra.mxu1 %v3954_v11  ;;  %v4543_v11 = vld [vmem:[%s5543_s3 + $0x190] sm:$0xff] }
 0x35e   :  { %1303 = vmatpush1.msra.mxu0 %v4529_v57  ;;  %2784 = vmatprep.subr.mxu1 %v5725_v0 }
 0x35f   :  { %1304 = vmatprep.subr.mxu0 %v4536_v6  ;;  %2785 = vmatpush3.msra.mxu1 %v3961_v3  ;;  %v4557_v3 = vld [vmem:[%s5543_s3 + $0x170] sm:$0xff] }
 0x360   :  { %1305 = vmatpush1.msra.mxu0 %v4543_v11  ;;  %2786 = vmatprep.subr.mxu1 %v5725_v0 }
 0x361   :  { %1306 = vmatprep.subr.mxu0 %v4550_v20  ;;  %2787 = vmatpush3.msra.mxu1 %v3968_v47  ;;  %v4571_v47 = vld [vmem:[%s5543_s3 + $0x150] sm:$0xff] }
 0x362   :  { %1307 = vmatpush1.msra.mxu0 %v4557_v3  ;;  %2788 = vmatprep.subr.mxu1 %v5725_v0 }
 0x363   :  { %1308 = vmatprep.subr.mxu0 %v4564_v36  ;;  %2789 = vmatpush3.msra.mxu1 %v3975_v29  ;;  %v4585_v29 = vld [vmem:[%s5543_s3 + $0x130] sm:$0xff] }
 0x364   :  { %1309 = vmatpush1.msra.mxu0 %v4571_v47  ;;  %2790 = vmatprep.subr.mxu1 %v5725_v0 }
 0x365   :  { %1310 = vmatprep.subr.mxu0 %v4578_v9  ;;  %2791 = vmatpush3.msra.mxu1 %v3982_v63  ;;  %v4599_v63 = vld [vmem:[%s5543_s3 + $0x110] sm:$0xff] }
 0x366   :  { %1311 = vmatpush1.msra.mxu0 %v4585_v29  ;;  %2792 = vmatprep.subr.mxu1 %v5725_v0 }
 0x367   :  { %1312 = vmatprep.subr.mxu0 %v4592_v27  ;;  %2793 = vmatpush3.msra.mxu1 %v3989_v61  ;;  %v4613_v61 = vld [vmem:[%s5543_s3 + $0xf0] sm:$0xff] }
 0x368   :  { %1313 = vmatpush1.msra.mxu0 %v4599_v63  ;;  %2794 = vmatprep.subr.mxu1 %v5725_v0 }
 0x369   :  { %1314 = vmatprep.subr.mxu0 %v4606_v12  ;;  %2795 = vmatpush3.msra.mxu1 %v3996_v59  ;;  %v4627_v59 = vld [vmem:[%s5543_s3 + $0xd0] sm:$0xff] }
 0x36a   :  { %1315 = vmatpush1.msra.mxu0 %v4613_v61  ;;  %2796 = vmatprep.subr.mxu1 %v5725_v0 }
 0x36b   :  { %1316 = vmatprep.subr.mxu0 %v4620_v32  ;;  %2797 = vmatpush3.msra.mxu1 %v4001_v54  ;;  %v4641_v54 = vld [vmem:[%s5543_s3 + $0xb0] sm:$0xff] }
 0x36c   :  { %1317 = vmatpush1.msra.mxu0 %v4627_v59  ;;  %2798 = vmatprep.subr.mxu1 %v5725_v0 }
 0x36d   :  { %1318 = vmatprep.subr.mxu0 %v4634_v5  ;;  %2799 = vmatpush3.msra.mxu1 %v4010_v52  ;;  %v4655_v52 = vld [vmem:[%s5543_s3 + $0x90] sm:$0xff] }
 0x36e   :  { %1319 = vmatpush1.msra.mxu0 %v4641_v54  ;;  %2800 = vmatprep.subr.mxu1 %v5725_v0 }
 0x36f   :  { %1320 = vmatprep.subr.mxu0 %v4648_v30  ;;  %2801 = vmatpush3.msra.mxu1 %v4017_v50  ;;  %v4669_v50 = vld [vmem:[%s5543_s3 + $0x70] sm:$0xff] }
 0x370   :  { %1321 = vmatpush1.msra.mxu0 %v4655_v52  ;;  %2802 = vmatprep.subr.mxu1 %v5725_v0 }
 0x371   :  { %1322 = vmatprep.subr.mxu0 %v4662_v14  ;;  %2803 = vmatpush3.msra.mxu1 %v4024_v48  ;;  %v4683_v48 = vld [vmem:[%s5543_s3 + $0x50] sm:$0xff] }
 0x372   :  { %1323 = vmatpush1.msra.mxu0 %v4669_v50  ;;  %2804 = vmatprep.subr.mxu1 %v5725_v0 }
 0x373   :  { %1324 = vmatprep.subr.mxu0 %v4676_v1  ;;  %2805 = vmatpush3.msra.mxu1 %v4031_v45  ;;  %v4697_v45 = vld [vmem:[%s5543_s3 + $0x30] sm:$0xff] }
 0x374   :  { %1325 = vmatpush1.msra.mxu0 %v4683_v48  ;;  %2806 = vmatprep.subr.mxu1 %v5725_v0 }
 0x375   :  { %1326 = vmatprep.subr.mxu0 %v4690_v38  ;;  %2807 = vmatpush3.msra.mxu1 %v4038_v43  ;;  %v4711_v43 = vld [vmem:[%s5543_s3 + $0x10] sm:$0xff] }
 0x376   :  { %1327 = vmatpush1.msra.mxu0 %v4697_v45  ;;  %2808 = vmatprep.subr.mxu1 %v5725_v0  ;;  %5846 = vst [vmem:[#allocation44_spill] sm:$0xff] %v4711_v43 }
 0x377   :  { %1328 = vmatprep.subr.mxu0 %v4704_v18  ;;  %2809 = vmatpush3.msra.mxu1 %v5803_v8  ;;  %v4742_v8 = vld [vmem:[%s5543_s3 + $0xc8] sm:$0xff] }
 0x378   :  { %1329 = vmatpush1.msra.mxu0 %v4711_v43  ;;  %2810 = vmatprep.subr.mxu1 %v5725_v0  ;;  %5847 = vst [vmem:[#allocation42_spill] sm:$0xff] %v4742_v8 }
 0x379   :  { %1363 = vmatmul.mubr.f32.vlgmr.msra.gmra.mxu0 %v4499_v58  ;;  %1483 = vmatprep.subr.mxu0 %v4356_v13  ;;  %v4790_v58 = vld [vmem:[%s5543_s3 + $0x48] sm:$0xff] }
 0x37a   :  { %1484 = vmatpush1.msra.mxu0 %v4362_v15  ;;  %2811 = vmatpush3.msra.mxu1 %v5807_v17  ;;  %v4748_v17 = vld [vmem:[%s5543_s3 + $0xc0] sm:$0xff]  ;;  %5855 = vst [vmem:[#allocation23_spill] sm:$0xff] %v4790_v58 }
 0x37b   :  { %1485 = vmatprep.subr.mxu0 %v4369_v19  ;;  %2812 = vmatprep.mubr.msk.f32.mxu1 %vm3233_vm0, %v5725_v0  ;;  %5848 = vst [vmem:[#allocation43_spill] sm:$0xff] %v4748_v17 }
 0x37c   :  { %1486 = vmatpush1.msra.mxu0 %v4377_v22  ;;  %1547 = vmatprep.mubr.f32.mxu0 %v5725_v0 }
 0x37d   :  { %1487 = vmatprep.subr.mxu0 %v4384_v24  ;;  %1554 = vmatprep.subr.mxu1 %v4390_v26 }
 0x37e   :  { %1488 = vmatpush1.msra.mxu0 %v4396_v28 }
 0x37f   :  { %1489 = vmatprep.subr.mxu0 %v4402_v31 }
 0x380   :  { %1490 = vmatpush1.msra.mxu0 %v4408_v33 }
 0x381   :  { %1491 = vmatprep.subr.mxu0 %v4414_v35 }
 0x382   :  { %1492 = vmatpush1.msra.mxu0 %v4420_v37 }
 0x383   :  { %1493 = vmatprep.subr.mxu0 %v4426_v40 }
 0x384   :  { %1494 = vmatpush1.msra.mxu0 %v4432_v42 }
 0x385   :  { %1495 = vmatprep.subr.mxu0 %v4438_v44 }
 0x386   :  { %1496 = vmatpush1.msra.mxu0 %v4444_v46 }
 0x387   :  { %1497 = vmatprep.subr.mxu0 %v4450_v49 }
 0x388   :  { %1498 = vmatpush1.msra.mxu0 %v4456_v51 }
 0x389   :  { %1499 = vmatprep.subr.mxu0 %v4462_v53 }
 0x38a   :  { %1500 = vmatpush1.msra.mxu0 %v4468_v55 }
 0x38b   :  { %1501 = vmatprep.subr.mxu0 %v4742_v8  ;;  %v5863_v8 = vld [vmem:[#allocation50_spill] sm:$0xff] }
 0x38c   :  { %1502 = vmatpush1.msra.mxu0 %v4748_v17 }
 0x38d   :  { %1503 = vmatprep.subr.mxu0 %v4754_v56 }
 0x38e   :  { %1504 = vmatpush1.msra.mxu0 %v4760_v7 }
 0x38f   :  { %1505 = vmatprep.subr.mxu0 %v4766_v25 }
 0x390   :  { %1506 = vmatpush1.msra.mxu0 %v4772_v4 }
 0x391   :  { %1507 = vmatprep.subr.mxu0 %v4778_v41  ;;  %v4802_v41 = vld [vmem:[%s5543_s3 + $0x28] sm:$0xff] }
 0x392   :  { %1508 = vmatpush1.msra.mxu0 %v4784_v10  ;;  %5857 = vst [vmem:[#allocation25_spill] sm:$0xff] %v4802_v41  ;;  %v4808_v10 = vld [vmem:[%s5543_s3 + $0x20] sm:$0xff] }
 0x393   :  { %1509 = vmatprep.subr.mxu0 %v4790_v58  ;;  %5858 = vst [vmem:[#allocation26_spill] sm:$0xff] %v4808_v10  ;;  %v4814_v58 = vld [vmem:[%s5543_s3 + $0x8] sm:$0xff] }
 0x394   :  { %1510 = vmatpush1.msra.mxu0 %v4796_v34  ;;  %5859 = vst [vmem:[#allocation27_spill] sm:$0xff] %v4814_v58  ;;  %v4820_v34 = vld [vmem:[%s5543_s3] sm:$0xff] }
 0x395   :  { %1511 = vmatprep.subr.mxu0 %v4802_v41  ;;  %5860 = vst [vmem:[#allocation28_spill] sm:$0xff] %v4820_v34 }
 0x396   :  { %1512 = vmatpush1.msra.mxu0 %v4808_v10 }
 0x397   :  { %1513 = vmatprep.subr.mxu0 %v4814_v58  ;;  %v5862_v58 = vld [vmem:[#allocation52_spill] sm:$0xff] }
 0x398   :  { %1514 = vmatpush1.msra.mxu0 %v4820_v34 }
 0x399   :  { %2815 = vmatprep.subr.mxu0 %v5725_v0 }
 0x419   :  { %v1207_v41 = vpop.f32.mrf.mxu0  ;;  %v1293_v4 = vpop.f32.mrf.mxu1 }
 0x41a   :  { %v4825_v10 = vadd.f32 %v5839_v2, %v1207_v41  ;;  %v1369_v55 = vadd.f32 %v1293_v4, %v5863_v8 }
 0x41b   :  { %v2779_v25 = vpop.f32.mrf.mxu0  ;;  %v1295_v7 = vpop.f32.mrf.mxu1 }
 0x41c   :  { %5861 = vst [vmem:[#allocation29_spill] sm:$0xff] %v4825_v10  ;;  %v1211_v56 = vmul.f32 %v4266_v39, %v4825_v10  ;;  %v1370_v17 = vadd.f32 %v1295_v7, %v5862_v58  ;;  %v2524_v51 = vmul.f32 -1.442695, %v1369_v55  ;;  %v5864_v25 = vld [vmem:[#allocation51_spill] sm:$0xff]  ;;  %v5865_v10 = vld [vmem:[#allocation53_spill] sm:$0xff]  ;;  %v4874_v58 = vld [vmem:[%s5545_s5 + $0x60] sm:$0xff] }
 0x41e   :  { %1212 = vadd.xlane.f32.xlu1 %v1211_v56  ;;  %v2525_v53 = vmul.f32 -1.442695, %v1370_v17 }
 0x420   :  { %3005 = vpow2.f32 %v2525_v53 }
 0x421   :  { %3007 = vpow2.f32 %v2524_v51 }
 0x42d   :  { %v3006_v34 = vpop.eup %3005 }
 0x42e   :  { %v3008_v49 = vpop.eup %3007  ;;  %v1382_v46 = vadd.f32 1.0, %v3006_v34 }
 0x42f   :  { %v1376_v44 = vadd.f32 1.0, %v3008_v49 }
 0x430   :  { %3009 = vrcp.f32 %v1382_v46 }
 0x431   :  { %3011 = vrcp.f32 %v1376_v44 }
 0x439   :  { %v1364_v41 = vpop.f32.mrf.mxu0 }
 0x43a   :  { %v1371_v2 = vadd.f32 %v1364_v41, %v5864_v25  ;;  %v4883_v41 = vld [vmem:[%s5545_s5 + $0x58] sm:$0xff]  ;;  %v4892_v25 = vld [vmem:[%s5545_s5 + $0x50] sm:$0xff] }
 0x43b   :  { %v1366_v42 = vpop.f32.mrf.mxu0 }
 0x43c   :  { %3013 = vtanh.f32 %v1371_v2  ;;  %v1372_v7 = vadd.f32 %v1366_v42, %v5865_v10  ;;  %v4847_v42 = vld [vmem:[%s5545_s5 + $0x78] sm:$0xff]  ;;  %v4865_v10 = vld [vmem:[%s5545_s5 + $0x68] sm:$0xff] }
 0x43d   :  { %v3010_v8 = vpop.eup %3009 }
 0x43e   :  { %v2526_v56 = vmul.f32 -1.442695, %v1372_v7  ;;  %v3012_v17 = vpop.eup %3011  ;;  %v1392_v51 = vmul.f32 %v3010_v8, %v4496_v21  ;;  %v4856_v21 = vld [vmem:[%s5545_s5 + $0x70] sm:$0xff]  ;;  %v4901_v7 = vld [vmem:[%s5545_s5 + $0x48] sm:$0xff]  ;;  %v4919_v8 = vld [vmem:[%s5545_s5 + $0x38] sm:$0xff] }
 0x440   :  { %3015 = vpow2.f32 %v2526_v56  ;;  %v4910_v56 = vld [vmem:[%s5545_s5 + $0x40] sm:$0xff] }
 0x449   :  { %v3014_v55 = vpop.eup %3013 }
 0x44a   :  { %v1393_v53 = vmul.f32 %v3014_v55, %v3012_v17  ;;  %v4928_v17 = vld [vmem:[%s5545_s5 + $0x30] sm:$0xff]  ;;  %v4937_v55 = vld [vmem:[%s5545_s5 + $0x28] sm:$0xff] }
 0x44c   :  { %v4834_v4 = vadd.f32 %v1393_v53, %v1392_v51  ;;  %v4946_v51 = vld [vmem:[%s5545_s5 + $0x20] sm:$0xff]  ;;  %v4955_v53 = vld [vmem:[%s5545_s5 + $0x18] sm:$0xff] }
 0x44d   :  { %v3016_v49 = vpop.eup %3015 }
 0x44e   :  { %v1389_v34 = vadd.f32 1.0, %v3016_v49  ;;  %3017 = vtanh.f32 %v4834_v4  ;;  %v4964_v49 = vld [vmem:[%s5545_s5 + $0x10] sm:$0xff] }
 0x450   :  { %3019 = vrcp.f32 %v1389_v34  ;;  %v4973_v34 = vld [vmem:[%s5545_s5 + $0x8] sm:$0xff] }
 0x451   :  { %5866 = vst [vmem:[#allocation30_spill] sm:$0xff] %v4973_v34 }
 0x45b   :  { %v3018_v44 = vpop.eup %3017 }
 0x45d   :  { %v3020_v46 = vpop.eup %3019 }
 0x45e   :  { %v4837_v2 = vmul.f32 %v3020_v46, %v3018_v44  ;;  %v4984_v44 = vld [vmem:[%s5545_s5] sm:$0xff]  ;;  %v5868_v46 = vld [vmem:[#allocation12_spill] sm:$0xff] }
 0x45f   :  { %5867 = vst [vmem:[#allocation32_spill] sm:$0xff] %v4984_v44 }
 0x460   :  { %2813 = vmatmul.mubr.f32.vlgmr.msra.gmra.mxu1 %v4837_v2  ;;  %1548 = vmatmul.mubr.f32.vlgmr.msra.gmra.mxu0 %v4837_v2 }
 0x461   :  { %1555 = vmatpush1.msra.mxu1 %v4288_v16  ;;  %1618 = vmatprep.mubr.f32.mxu1 %v5725_v0 }
 0x462   :  { %1556 = vmatprep.subr.mxu1 %v4508_v23  ;;  %2816 = vmatpush3.msra.mxu0 %v4847_v42 }
 0x463   :  { %1557 = vmatpush1.msra.mxu1 %v4515_v60  ;;  %2817 = vmatprep.subr.mxu0 %v5725_v0 }
 0x464   :  { %1558 = vmatprep.subr.mxu1 %v4522_v62  ;;  %2818 = vmatpush3.msra.mxu0 %v4856_v21 }
 0x465   :  { %1559 = vmatpush1.msra.mxu1 %v4529_v57  ;;  %2819 = vmatprep.subr.mxu0 %v5725_v0 }
 0x466   :  { %1560 = vmatprep.subr.mxu1 %v4536_v6  ;;  %2820 = vmatpush3.msra.mxu0 %v4865_v10 }
 0x467   :  { %1561 = vmatpush1.msra.mxu1 %v4543_v11  ;;  %2821 = vmatprep.subr.mxu0 %v5725_v0 }
 0x468   :  { %1562 = vmatprep.subr.mxu1 %v4550_v20  ;;  %2822 = vmatpush3.msra.mxu0 %v4874_v58 }
 0x469   :  { %1563 = vmatpush1.msra.mxu1 %v4557_v3  ;;  %2823 = vmatprep.subr.mxu0 %v5725_v0 }
 0x46a   :  { %1564 = vmatprep.subr.mxu1 %v4564_v36  ;;  %2824 = vmatpush3.msra.mxu0 %v4883_v41 }
 0x46b   :  { %1565 = vmatpush1.msra.mxu1 %v4571_v47  ;;  %2825 = vmatprep.subr.mxu0 %v5725_v0 }
 0x46c   :  { %1566 = vmatprep.subr.mxu1 %v4578_v9  ;;  %2826 = vmatpush3.msra.mxu0 %v4892_v25 }
 0x46d   :  { %1567 = vmatpush1.msra.mxu1 %v4585_v29  ;;  %2827 = vmatprep.subr.mxu0 %v5725_v0 }
 0x46e   :  { %1568 = vmatprep.subr.mxu1 %v4592_v27  ;;  %2828 = vmatpush3.msra.mxu0 %v4901_v7 }
 0x46f   :  { %1569 = vmatpush1.msra.mxu1 %v4599_v63  ;;  %2829 = vmatprep.subr.mxu0 %v5725_v0 }
 0x470   :  { %1570 = vmatprep.subr.mxu1 %v4606_v12  ;;  %2830 = vmatpush3.msra.mxu0 %v4910_v56 }
 0x471   :  { %1571 = vmatpush1.msra.mxu1 %v4613_v61  ;;  %2831 = vmatprep.subr.mxu0 %v5725_v0 }
 0x472   :  { %1572 = vmatprep.subr.mxu1 %v4620_v32  ;;  %2832 = vmatpush3.msra.mxu0 %v4919_v8 }
 0x473   :  { %1573 = vmatpush1.msra.mxu1 %v4627_v59  ;;  %2833 = vmatprep.subr.mxu0 %v5725_v0 }
 0x474   :  { %1574 = vmatprep.subr.mxu1 %v4634_v5  ;;  %2834 = vmatpush3.msra.mxu0 %v4928_v17 }
 0x475   :  { %1575 = vmatpush1.msra.mxu1 %v4641_v54  ;;  %2835 = vmatprep.subr.mxu0 %v5725_v0 }
 0x476   :  { %1576 = vmatprep.subr.mxu1 %v4648_v30  ;;  %2836 = vmatpush3.msra.mxu0 %v4937_v55 }
 0x477   :  { %1577 = vmatpush1.msra.mxu1 %v4655_v52  ;;  %2837 = vmatprep.subr.mxu0 %v5725_v0 }
 0x478   :  { %1578 = vmatprep.subr.mxu1 %v4662_v14  ;;  %2838 = vmatpush3.msra.mxu0 %v4946_v51 }
 0x479   :  { %1579 = vmatpush1.msra.mxu1 %v4669_v50  ;;  %2839 = vmatprep.subr.mxu0 %v5725_v0 }
 0x47a   :  { %1580 = vmatprep.subr.mxu1 %v4676_v1  ;;  %2840 = vmatpush3.msra.mxu0 %v4955_v53 }
 0x47b   :  { %1581 = vmatpush1.msra.mxu1 %v4683_v48  ;;  %2841 = vmatprep.subr.mxu0 %v5725_v0 }
 0x47c   :  { %1582 = vmatprep.subr.mxu1 %v4690_v38  ;;  %2842 = vmatpush3.msra.mxu0 %v4964_v49 }
 0x47d   :  { %1583 = vmatpush1.msra.mxu1 %v4697_v45  ;;  %2843 = vmatprep.subr.mxu0 %v5725_v0 }
 0x47e   :  { %1584 = vmatprep.subr.mxu1 %v4704_v18  ;;  %2844 = vmatpush3.msra.mxu0 %v4973_v34 }
 0x47f   :  { %1585 = vmatpush1.msra.mxu1 %v4711_v43  ;;  %2845 = vmatprep.subr.mxu0 %v5725_v0 }
 0x480   :  { %1619 = vmatmul.mubr.f32.vlgmr.msra.gmra.mxu1 %v4837_v2  ;;  %1739 = vmatprep.subr.mxu1 %v4356_v13  ;;  %v5869_v2 = vld [vmem:[#allocation13_spill] sm:$0xff] }
 0x481   :  { %1740 = vmatpush1.msra.mxu1 %v4362_v15  ;;  %2846 = vmatpush3.msra.mxu0 %v4984_v44 }
 0x482   :  { %1741 = vmatprep.subr.mxu1 %v4369_v19  ;;  %2847 = vmatprep.mubr.msk.f32.mxu0 %vm3233_vm0, %v5725_v0 }
 0x483   :  { %1742 = vmatpush1.msra.mxu1 %v4377_v22  ;;  %1803 = vmatprep.mubr.f32.mxu1 %v5725_v0  ;;  %v5870_v22 = vld [vmem:[#allocation14_spill] sm:$0xff] }
 0x484   :  { %1743 = vmatprep.subr.mxu1 %v4384_v24  ;;  %1810 = vmatprep.subr.mxu0 %v4390_v26  ;;  %v5871_v24 = vld [vmem:[#allocation15_spill] sm:$0xff]  ;;  %v5872_v26 = vld [vmem:[#allocation16_spill] sm:$0xff] }
 0x485   :  { %1744 = vmatpush1.msra.mxu1 %v4396_v28  ;;  %v5873_v28 = vld [vmem:[#allocation17_spill] sm:$0xff] }
 0x486   :  { %1745 = vmatprep.subr.mxu1 %v4402_v31  ;;  %v5874_v31 = vld [vmem:[#allocation18_spill] sm:$0xff] }
 0x487   :  { %1746 = vmatpush1.msra.mxu1 %v4408_v33  ;;  %v5875_v33 = vld [vmem:[#allocation42_spill] sm:$0xff] }
 0x488   :  { %1747 = vmatprep.subr.mxu1 %v4414_v35  ;;  %v5876_v35 = vld [vmem:[#allocation43_spill] sm:$0xff] }
 0x489   :  { %1748 = vmatpush1.msra.mxu1 %v4420_v37  ;;  %v5877_v37 = vld [vmem:[#allocation45_spill] sm:$0xff] }
 0x48a   :  { %1749 = vmatprep.subr.mxu1 %v4426_v40  ;;  %v5878_v40 = vld [vmem:[#allocation40_spill] sm:$0xff] }
 0x48b   :  { %1750 = vmatpush1.msra.mxu1 %v5868_v46  ;;  %v5879_v46 = vld [vmem:[#allocation39_spill] sm:$0xff] }
 0x48c   :  { %1751 = vmatprep.subr.mxu1 %v5869_v2  ;;  %v5880_v2 = vld [vmem:[#allocation41_spill] sm:$0xff] }
 0x48d   :  { %1752 = vmatpush1.msra.mxu1 %v5870_v22  ;;  %v5881_v22 = vld [vmem:[#allocation21_spill] sm:$0xff] }
 0x48e   :  { %1753 = vmatprep.subr.mxu1 %v5871_v24  ;;  %v5882_v24 = vld [vmem:[#allocation22_spill] sm:$0xff] }
 0x48f   :  { %1754 = vmatpush1.msra.mxu1 %v5872_v26  ;;  %v5883_v26 = vld [vmem:[#allocation23_spill] sm:$0xff] }
 0x490   :  { %1755 = vmatprep.subr.mxu1 %v5873_v28  ;;  %v5884_v28 = vld [vmem:[#allocation24_spill] sm:$0xff] }
 0x491   :  { %1756 = vmatpush1.msra.mxu1 %v5874_v31  ;;  %v5885_v31 = vld [vmem:[#allocation25_spill] sm:$0xff] }
 0x492   :  { %1757 = vmatprep.subr.mxu1 %v5875_v33  ;;  %v5886_v33 = vld [vmem:[#allocation26_spill] sm:$0xff] }
 0x493   :  { %1758 = vmatpush1.msra.mxu1 %v5876_v35  ;;  %v5887_v35 = vld [vmem:[#allocation27_spill] sm:$0xff] }
 0x494   :  { %1759 = vmatprep.subr.mxu1 %v5877_v37  ;;  %v5888_v37 = vld [vmem:[#allocation28_spill] sm:$0xff] }
 0x495   :  { %1760 = vmatpush1.msra.mxu1 %v5878_v40  ;;  %v5889_v40 = vld [vmem:[#allocation31_spill] sm:$0xff] }
 0x496   :  { %1761 = vmatprep.subr.mxu1 %v5879_v46 }
 0x497   :  { %1762 = vmatpush1.msra.mxu1 %v5880_v2 }
 0x498   :  { %1763 = vmatprep.subr.mxu1 %v5881_v22 }
 0x499   :  { %1764 = vmatpush1.msra.mxu1 %v5882_v24 }
 0x49a   :  { %1765 = vmatprep.subr.mxu1 %v5883_v26  ;;  %v5891_v26 = vld [vmem:[#allocation56_spill] sm:$0xff] }
 0x49b   :  { %1766 = vmatpush1.msra.mxu1 %v5884_v28 }
 0x49c   :  { %1767 = vmatprep.subr.mxu1 %v5885_v31 }
 0x49d   :  { %1768 = vmatpush1.msra.mxu1 %v5886_v33  ;;  %v5892_v33 = vld [vmem:[#allocation54_spill] sm:$0xff] }
 0x49e   :  { %1769 = vmatprep.subr.mxu1 %v5887_v35 }
 0x49f   :  { %1770 = vmatpush1.msra.mxu1 %v5888_v37 }
 0x4a0   :  { %2850 = vmatprep.subr.mxu1 %v5725_v0 }
 0x520   :  { %v1463_v46 = vpop.f32.mrf.mxu1  ;;  %v1549_v2 = vpop.f32.mrf.mxu0 }
 0x521   :  { %v5023_v22 = vadd.f32 %v5889_v40, %v1463_v46  ;;  %v1625_v44 = vadd.f32 %v1549_v2, %v5892_v33 }
 0x522   :  { %v2814_v24 = vpop.f32.mrf.mxu1  ;;  %v1551_v19 = vpop.f32.mrf.mxu0 }
 0x523   :  { %5890 = vst [vmem:[#allocation34_spill] sm:$0xff] %v5023_v22  ;;  %v1467_v28 = vmul.f32 %v4266_v39, %v5023_v22  ;;  %v1626_v31 = vadd.f32 %v1551_v19, %v5891_v26  ;;  %v2527_v15 = vmul.f32 -1.442695, %v1625_v44  ;;  %v5893_v24 = vld [vmem:[#allocation55_spill] sm:$0xff]  ;;  %v5894_v22 = vld [vmem:[#allocation57_spill] sm:$0xff] }
 0x525   :  { %1468 = vadd.xlane.f32.xlu1 %v1467_v28  ;;  %v2528_v35 = vmul.f32 -1.442695, %v1626_v31 }
 0x527   :  { %3021 = vpow2.f32 %v2528_v35 }
 0x528   :  { %3023 = vpow2.f32 %v2527_v15 }
 0x534   :  { %v3022_v37 = vpop.eup %3021 }
 0x535   :  { %v3024_v13 = vpop.eup %3023  ;;  %v1638_v43 = vadd.f32 1.0, %v3022_v37 }
 0x536   :  { %v1632_v34 = vadd.f32 1.0, %v3024_v13 }
 0x537   :  { %3025 = vrcp.f32 %v1638_v43 }
 0x538   :  { %3027 = vrcp.f32 %v1632_v34 }
 0x540   :  { %v1620_v40 = vpop.f32.mrf.mxu1 }
 0x541   :  { %v1627_v46 = vadd.f32 %v1620_v40, %v5893_v24  ;;  %v5899_v40 = vld [vmem:[#allocation37_spill] sm:$0xff]  ;;  %v5900_v24 = vld [vmem:[#allocation32_spill] sm:$0xff] }
 0x542   :  { %v1622_v18 = vpop.f32.mrf.mxu1 }
 0x543   :  { %3029 = vtanh.f32 %v1627_v46  ;;  %v1628_v19 = vadd.f32 %v1622_v18, %v5894_v22  ;;  %v5896_v22 = vld [vmem:[#allocation30_spill] sm:$0xff]  ;;  %v5897_v18 = vld [vmem:[#allocation44_spill] sm:$0xff] }
 0x544   :  { %v3026_v28 = vpop.eup %3025  ;;  %v5901_v46 = vld [vmem:[#allocation2_spill] sm:$0xff] }
 0x545   :  { %v2529_v26 = vmul.f32 -1.442695, %v1628_v19  ;;  %v3028_v31 = vpop.eup %3027  ;;  %v1648_v15 = vmul.f32 %v3026_v28, %v4834_v4  ;;  %v5898_v4 = vld [vmem:[#allocation35_spill] sm:$0xff]  ;;  %v5902_v19 = vld [vmem:[#allocation4_spill] sm:$0xff]  ;;  %v5904_v28 = vld [vmem:[#allocation6_spill] sm:$0xff] }
 0x547   :  { %3031 = vpow2.f32 %v2529_v26  ;;  %v5903_v26 = vld [vmem:[#allocation5_spill] sm:$0xff] }
 0x550   :  { %v3030_v33 = vpop.eup %3029 }
 0x551   :  { %v1649_v35 = vmul.f32 %v3030_v33, %v3028_v31  ;;  %v5905_v31 = vld [vmem:[#allocation7_spill] sm:$0xff] }
 0x552   :  { %v5906_v33 = vld [vmem:[#allocation3_spill] sm:$0xff] }
 0x553   :  { %v5032_v44 = vadd.f32 %v1649_v35, %v1648_v15  ;;  %v5907_v15 = vld [vmem:[#allocation8_spill] sm:$0xff]  ;;  %v5908_v35 = vld [vmem:[#allocation9_spill] sm:$0xff] }
 0x554   :  { %v3032_v13 = vpop.eup %3031 }
 0x555   :  { %v1645_v37 = vadd.f32 1.0, %v3032_v13  ;;  %3033 = vtanh.f32 %v5032_v44  ;;  %v5909_v13 = vld [vmem:[#allocation10_spill] sm:$0xff] }
 0x557   :  { %3035 = vrcp.f32 %v1645_v37  ;;  %v5910_v37 = vld [vmem:[#allocation11_spill] sm:$0xff] }
 0x562   :  { %v3034_v43 = vpop.eup %3033 }
 0x564   :  { %v3036_v34 = vpop.eup %3035 }
 0x565   :  { %v5035_v2 = vmul.f32 %v3036_v34, %v3034_v43  ;;  %v5911_v43 = vld [vmem:[#allocation12_spill] sm:$0xff]  ;;  %v5912_v34 = vld [vmem:[#allocation13_spill] sm:$0xff] }
 0x567   :  { %2848 = vmatmul.mubr.f32.vlgmr.msra.gmra.mxu0 %v5035_v2  ;;  %1804 = vmatmul.mubr.f32.vlgmr.msra.gmra.mxu1 %v5035_v2 }
 0x568   :  { %1811 = vmatpush1.msra.mxu0 %v4288_v16  ;;  %1874 = vmatprep.mubr.f32.mxu0 %v5725_v0  ;;  %v5895_v16 = vld [vmem:[#allocation20_spill] sm:$0xff] }
 0x569   :  { %1812 = vmatprep.subr.mxu0 %v4508_v23  ;;  %2851 = vmatpush3.msra.mxu1 %v4847_v42 }
 0x56a   :  { %1813 = vmatpush1.msra.mxu0 %v4515_v60  ;;  %2852 = vmatprep.subr.mxu1 %v5725_v0 }
 0x56b   :  { %1814 = vmatprep.subr.mxu0 %v4522_v62  ;;  %2853 = vmatpush3.msra.mxu1 %v4856_v21 }
 0x56c   :  { %1815 = vmatpush1.msra.mxu0 %v4529_v57  ;;  %2854 = vmatprep.subr.mxu1 %v5725_v0 }
 0x56d   :  { %1816 = vmatprep.subr.mxu0 %v4536_v6  ;;  %2855 = vmatpush3.msra.mxu1 %v4865_v10 }
 0x56e   :  { %1817 = vmatpush1.msra.mxu0 %v4543_v11  ;;  %2856 = vmatprep.subr.mxu1 %v5725_v0 }
 0x56f   :  { %1818 = vmatprep.subr.mxu0 %v4550_v20  ;;  %2857 = vmatpush3.msra.mxu1 %v4874_v58 }
 0x570   :  { %1819 = vmatpush1.msra.mxu0 %v4557_v3  ;;  %2858 = vmatprep.subr.mxu1 %v5725_v0 }
 0x571   :  { %1820 = vmatprep.subr.mxu0 %v4564_v36  ;;  %2859 = vmatpush3.msra.mxu1 %v4883_v41 }
 0x572   :  { %1821 = vmatpush1.msra.mxu0 %v4571_v47  ;;  %2860 = vmatprep.subr.mxu1 %v5725_v0 }
 0x573   :  { %1822 = vmatprep.subr.mxu0 %v4578_v9  ;;  %2861 = vmatpush3.msra.mxu1 %v4892_v25 }
 0x574   :  { %1823 = vmatpush1.msra.mxu0 %v4585_v29  ;;  %2862 = vmatprep.subr.mxu1 %v5725_v0 }
 0x575   :  { %1824 = vmatprep.subr.mxu0 %v4592_v27  ;;  %2863 = vmatpush3.msra.mxu1 %v4901_v7 }
 0x576   :  { %1825 = vmatpush1.msra.mxu0 %v4599_v63  ;;  %2864 = vmatprep.subr.mxu1 %v5725_v0 }
 0x577   :  { %1826 = vmatprep.subr.mxu0 %v4606_v12  ;;  %2865 = vmatpush3.msra.mxu1 %v4910_v56 }
 0x578   :  { %1827 = vmatpush1.msra.mxu0 %v4613_v61  ;;  %2866 = vmatprep.subr.mxu1 %v5725_v0 }
 0x579   :  { %1828 = vmatprep.subr.mxu0 %v4620_v32  ;;  %2867 = vmatpush3.msra.mxu1 %v4919_v8 }
 0x57a   :  { %1829 = vmatpush1.msra.mxu0 %v4627_v59  ;;  %2868 = vmatprep.subr.mxu1 %v5725_v0 }
 0x57b   :  { %1830 = vmatprep.subr.mxu0 %v4634_v5  ;;  %2869 = vmatpush3.msra.mxu1 %v4928_v17 }
 0x57c   :  { %1831 = vmatpush1.msra.mxu0 %v4641_v54  ;;  %2870 = vmatprep.subr.mxu1 %v5725_v0 }
 0x57d   :  { %1832 = vmatprep.subr.mxu0 %v4648_v30  ;;  %2871 = vmatpush3.msra.mxu1 %v4937_v55 }
 0x57e   :  { %1833 = vmatpush1.msra.mxu0 %v4655_v52  ;;  %2872 = vmatprep.subr.mxu1 %v5725_v0 }
 0x57f   :  { %1834 = vmatprep.subr.mxu0 %v4662_v14  ;;  %2873 = vmatpush3.msra.mxu1 %v4946_v51 }
 0x580   :  { %1835 = vmatpush1.msra.mxu0 %v4669_v50  ;;  %2874 = vmatprep.subr.mxu1 %v5725_v0 }
 0x581   :  { %1836 = vmatprep.subr.mxu0 %v4676_v1  ;;  %2875 = vmatpush3.msra.mxu1 %v4955_v53 }
 0x582   :  { %1837 = vmatpush1.msra.mxu0 %v4683_v48  ;;  %2876 = vmatprep.subr.mxu1 %v5725_v0 }
 0x583   :  { %1838 = vmatprep.subr.mxu0 %v4690_v38  ;;  %2877 = vmatpush3.msra.mxu1 %v4964_v49 }
 0x584   :  { %1839 = vmatpush1.msra.mxu0 %v4697_v45  ;;  %2878 = vmatprep.subr.mxu1 %v5725_v0 }
 0x585   :  { %1840 = vmatprep.subr.mxu0 %v5895_v16  ;;  %2879 = vmatpush3.msra.mxu1 %v5896_v22 }
 0x586   :  { %1841 = vmatpush1.msra.mxu0 %v5897_v18  ;;  %2880 = vmatprep.subr.mxu1 %v5725_v0 }
 0x587   :  { %1875 = vmatmul.mubr.f32.vlgmr.msra.gmra.mxu0 %v5035_v2  ;;  %1995 = vmatprep.subr.mxu0 %v5898_v4  ;;  %v5913_v2 = vld [vmem:[#allocation14_spill] sm:$0xff]  ;;  %v5914_v4 = vld [vmem:[#allocation15_spill] sm:$0xff] }
 0x588   :  { %1996 = vmatpush1.msra.mxu0 %v5899_v40  ;;  %2881 = vmatpush3.msra.mxu1 %v5900_v24  ;;  %v5915_v40 = vld [vmem:[#allocation16_spill] sm:$0xff] }
 0x589   :  { %1997 = vmatprep.subr.mxu0 %v5901_v46  ;;  %2882 = vmatprep.mubr.msk.f32.mxu1 %vm3233_vm0, %v5725_v0  ;;  %v5916_v46 = vld [vmem:[#allocation17_spill] sm:$0xff] }
 0x58a   :  { %1998 = vmatpush1.msra.mxu0 %v5902_v19  ;;  %2059 = vmatprep.mubr.f32.mxu0 %v5725_v0  ;;  %v5917_v19 = vld [vmem:[#allocation18_spill] sm:$0xff] }
 0x58b   :  { %1999 = vmatprep.subr.mxu0 %v5903_v26  ;;  %2066 = vmatprep.subr.mxu1 %v5904_v28  ;;  %v5918_v26 = vld [vmem:[#allocation42_spill] sm:$0xff]  ;;  %v5919_v28 = vld [vmem:[#allocation43_spill] sm:$0xff] }
 0x58c   :  { %2000 = vmatpush1.msra.mxu0 %v5905_v31  ;;  %v5920_v31 = vld [vmem:[#allocation45_spill] sm:$0xff] }
 0x58d   :  { %2001 = vmatprep.subr.mxu0 %v5906_v33  ;;  %v5921_v33 = vld [vmem:[#allocation40_spill] sm:$0xff] }
 0x58e   :  { %2002 = vmatpush1.msra.mxu0 %v5907_v15  ;;  %v5922_v15 = vld [vmem:[#allocation39_spill] sm:$0xff] }
 0x58f   :  { %2003 = vmatprep.subr.mxu0 %v5908_v35  ;;  %v5923_v35 = vld [vmem:[#allocation41_spill] sm:$0xff] }
 0x590   :  { %2004 = vmatpush1.msra.mxu0 %v5909_v13  ;;  %v5924_v13 = vld [vmem:[#allocation21_spill] sm:$0xff] }
 0x591   :  { %2005 = vmatprep.subr.mxu0 %v5910_v37  ;;  %v5925_v37 = vld [vmem:[#allocation22_spill] sm:$0xff] }
 0x592   :  { %2006 = vmatpush1.msra.mxu0 %v5911_v43  ;;  %v5926_v43 = vld [vmem:[#allocation23_spill] sm:$0xff] }
 0x593   :  { %2007 = vmatprep.subr.mxu0 %v5912_v34  ;;  %v5927_v34 = vld [vmem:[#allocation24_spill] sm:$0xff] }
 0x594   :  { %2008 = vmatpush1.msra.mxu0 %v5913_v2  ;;  %v5928_v2 = vld [vmem:[#allocation25_spill] sm:$0xff] }
 0x595   :  { %2009 = vmatprep.subr.mxu0 %v5914_v4  ;;  %v5929_v4 = vld [vmem:[#allocation26_spill] sm:$0xff] }
 0x596   :  { %2010 = vmatpush1.msra.mxu0 %v5915_v40  ;;  %v5930_v40 = vld [vmem:[#allocation27_spill] sm:$0xff] }
 0x597   :  { %2011 = vmatprep.subr.mxu0 %v5916_v46  ;;  %v5931_v46 = vld [vmem:[#allocation28_spill] sm:$0xff] }
 0x598   :  { %2012 = vmatpush1.msra.mxu0 %v5917_v19 }
 0x599   :  { %2013 = vmatprep.subr.mxu0 %v5918_v26 }
 0x59a   :  { %2014 = vmatpush1.msra.mxu0 %v5919_v28 }
 0x59b   :  { %2015 = vmatprep.subr.mxu0 %v5920_v31 }
 0x59c   :  { %2016 = vmatpush1.msra.mxu0 %v5921_v33 }
 0x59d   :  { %2017 = vmatprep.subr.mxu0 %v5922_v15 }
 0x59e   :  { %2018 = vmatpush1.msra.mxu0 %v5923_v35 }
 0x59f   :  { %2019 = vmatprep.subr.mxu0 %v5924_v13 }
 0x5a0   :  { %2020 = vmatpush1.msra.mxu0 %v5925_v37  ;;  %v5143_v37 = vld [vmem:[%s5547_s6] ss:$0 sm:$0xff] }
 0x5a1   :  { %2021 = vmatprep.subr.mxu0 %v5926_v43  ;;  %5932 = vst [vmem:[#allocation36_spill] sm:$0xff] %v5143_v37 }
 0x5a2   :  { %2022 = vmatpush1.msra.mxu0 %v5927_v34 }
 0x5a3   :  { %2023 = vmatprep.subr.mxu0 %v5928_v2 }
 0x5a4   :  { %2024 = vmatpush1.msra.mxu0 %v5929_v4 }
 0x5a5   :  { %2025 = vmatprep.subr.mxu0 %v5930_v40  ;;  %v5934_v40 = vld [vmem:[#allocation60_spill] sm:$0xff] }
 0x5a6   :  { %2026 = vmatpush1.msra.mxu0 %v5931_v46  ;;  %v5935_v46 = vld [vmem:[#allocation58_spill] sm:$0xff] }
 0x5a7   :  { %2885 = vmatprep.subr.mxu0 %v5725_v0 }
 0x627   :  { %v1719_v19 = vpop.f32.mrf.mxu0  ;;  %v1805_v35 = vpop.f32.mrf.mxu1 }
 0x628   :  { %v5146_v43 = vadd.f32 %v5143_v37, %v1719_v19  ;;  %v1881_v15 = vadd.f32 %v1805_v35, %v5935_v46  ;;  %v5950_v46 = vld [vmem:[#allocation24_spill] sm:$0xff] }
 0x629   :  { %v2849_v34 = vpop.f32.mrf.mxu0  ;;  %v1807_v2 = vpop.f32.mrf.mxu1 }
 0x62a   :  { %5933 = vst [vmem:[#allocation38_spill] sm:$0xff] %v5146_v43  ;;  %v1723_v4 = vmul.f32 %v4266_v39, %v5146_v43  ;;  %v1882_v13 = vadd.f32 %v1807_v2, %v5934_v40  ;;  %v2530_v31 = vmul.f32 -1.442695, %v1881_v15  ;;  %v5936_v34 = vld [vmem:[#allocation59_spill] sm:$0xff]  ;;  %v5937_v43 = vld [vmem:[#allocation61_spill] sm:$0xff] }
 0x62c   :  { %1724 = vadd.xlane.f32.xlu0 %v1723_v4  ;;  %v2531_v33 = vmul.f32 -1.442695, %v1882_v13 }
 0x62e   :  { %3037 = vpow2.f32 %v2531_v33 }
 0x62f   :  { %3039 = vpow2.f32 %v2530_v31 }
 0x63b   :  { %v3038_v28 = vpop.eup %3037 }
 0x63c   :  { %v3040_v26 = vpop.eup %3039  ;;  %v1894_v24 = vadd.f32 1.0, %v3038_v28 }
 0x63d   :  { %v1888_v18 = vadd.f32 1.0, %v3040_v26 }
 0x63e   :  { %3041 = vrcp.f32 %v1894_v24 }
 0x63f   :  { %3043 = vrcp.f32 %v1888_v18 }
 0x647   :  { %v1876_v19 = vpop.f32.mrf.mxu0 }
 0x648   :  { %v1883_v37 = vadd.f32 %v1876_v19, %v5936_v34  ;;  %v5951_v19 = vld [vmem:[#allocation25_spill] sm:$0xff]  ;;  %v5952_v34 = vld [vmem:[#allocation26_spill] sm:$0xff] }
 0x649   :  { %v1878_v22 = vpop.f32.mrf.mxu0 }
 0x64a   :  { %3045 = vtanh.f32 %v1883_v37  ;;  %v1884_v2 = vadd.f32 %v1878_v22, %v5937_v43  ;;  %v5948_v22 = vld [vmem:[#allocation22_spill] sm:$0xff]  ;;  %v5949_v43 = vld [vmem:[#allocation23_spill] sm:$0xff] }
 0x64b   :  { %v3042_v35 = vpop.eup %3041 }
 0x64c   :  { %v2532_v4 = vmul.f32 -1.442695, %v1884_v2  ;;  %v3044_v13 = vpop.eup %3043  ;;  %v1904_v31 = vmul.f32 %v3042_v35, %v5032_v44  ;;  %v5165_v44 = vld [vmem:[%s5543_s3 + $0x1f0] sm:$0xff]  ;;  %v5953_v2 = vld [vmem:[#allocation27_spill] sm:$0xff] }
 0x64e   :  { %3047 = vpow2.f32 %v2532_v4  ;;  %v5954_v4 = vld [vmem:[#allocation28_spill] sm:$0xff] }
 0x657   :  { %v3046_v15 = vpop.eup %3045 }
 0x658   :  { %v1905_v33 = vmul.f32 %v3046_v15, %v3044_v13  ;;  %v5955_v15 = vld [vmem:[#allocation36_spill] sm:$0xff] }
 0x65a   :  { %v5155_v40 = vadd.f32 %v1905_v33, %v1904_v31 }
 0x65b   :  { %v3048_v26 = vpop.eup %3047 }
 0x65c   :  { %v1901_v28 = vadd.f32 1.0, %v3048_v26  ;;  %3049 = vtanh.f32 %v5155_v40 }
 0x65e   :  { %3051 = vrcp.f32 %v1901_v28 }
 0x669   :  { %v3050_v18 = vpop.eup %3049 }
 0x66b   :  { %v3052_v24 = vpop.eup %3051 }
 0x66c   :  { %v5158_v37 = vmul.f32 %v3052_v24, %v3050_v18  ;;  %v5956_v18 = vld [vmem:[#allocation64_spill] sm:$0xff] }
 0x66e   :  { %2883 = vmatmul.mubr.f32.vlgmr.msra.gmra.mxu1 %v5158_v37  ;;  %2060 = vmatmul.mubr.f32.vlgmr.msra.gmra.mxu0 %v5158_v37 }
 0x66f   :  { %2067 = vmatpush1.msra.mxu1 %v5165_v44  ;;  %2130 = vmatprep.mubr.f32.mxu1 %v5725_v0 }
 0x670   :  { %2068 = vmatprep.subr.mxu1 %v4508_v23  ;;  %2886 = vmatpush3.msra.mxu0 %v4847_v42  ;;  %v5938_v23 = vld [vmem:[#allocation30_spill] sm:$0xff] }
 0x671   :  { %2069 = vmatpush1.msra.mxu1 %v4515_v60  ;;  %2887 = vmatprep.subr.mxu0 %v5725_v0  ;;  %v5939_v60 = vld [vmem:[#allocation44_spill] sm:$0xff] }
 0x672   :  { %2070 = vmatprep.subr.mxu1 %v4522_v62  ;;  %2888 = vmatpush3.msra.mxu0 %v4856_v21  ;;  %v3183_v62 = vld [vmem:[%s5543_s3 + $0x1e8] sm:$0xff] }
 0x673   :  { %2071 = vmatpush1.msra.mxu1 %v4529_v57  ;;  %2889 = vmatprep.subr.mxu0 %v5725_v0  ;;  %v3184_v57 = vld [vmem:[%s5543_s3 + $0x1e0] sm:$0xff] }
 0x674   :  { %2072 = vmatprep.subr.mxu1 %v4536_v6  ;;  %2890 = vmatpush3.msra.mxu0 %v4865_v10  ;;  %v5940_v6 = vld [vmem:[#allocation32_spill] sm:$0xff] }
 0x675   :  { %2073 = vmatpush1.msra.mxu1 %v4543_v11  ;;  %2891 = vmatprep.subr.mxu0 %v5725_v0  ;;  %v3185_v11 = vld [vmem:[%s5543_s3 + $0x1c8] sm:$0xff] }
 0x676   :  { %2074 = vmatprep.subr.mxu1 %v4550_v20  ;;  %2892 = vmatpush3.msra.mxu0 %v4874_v58  ;;  %v3186_v20 = vld [vmem:[%s5543_s3 + $0x1c0] sm:$0xff] }
 0x677   :  { %2075 = vmatpush1.msra.mxu1 %v4557_v3  ;;  %2893 = vmatprep.subr.mxu0 %v5725_v0  ;;  %v3187_v3 = vld [vmem:[%s5543_s3 + $0x1a8] sm:$0xff] }
 0x678   :  { %2076 = vmatprep.subr.mxu1 %v4564_v36  ;;  %2894 = vmatpush3.msra.mxu0 %v4883_v41  ;;  %v3188_v36 = vld [vmem:[%s5543_s3 + $0x1f8] sm:$0xff] }
 0x679   :  { %2077 = vmatpush1.msra.mxu1 %v4571_v47  ;;  %2895 = vmatprep.subr.mxu0 %v5725_v0  ;;  %v3189_v47 = vld [vmem:[%s5543_s3 + $0x1a0] sm:$0xff] }
 0x67a   :  { %2078 = vmatprep.subr.mxu1 %v4578_v9  ;;  %2896 = vmatpush3.msra.mxu0 %v4892_v25  ;;  %v3190_v9 = vld [vmem:[%s5543_s3 + $0x188] sm:$0xff] }
 0x67b   :  { %2079 = vmatpush1.msra.mxu1 %v4585_v29  ;;  %2897 = vmatprep.subr.mxu0 %v5725_v0  ;;  %v3191_v29 = vld [vmem:[%s5543_s3 + $0x180] sm:$0xff] }
 0x67c   :  { %2080 = vmatprep.subr.mxu1 %v4592_v27  ;;  %2898 = vmatpush3.msra.mxu0 %v4901_v7  ;;  %v3192_v27 = vld [vmem:[%s5543_s3 + $0x168] sm:$0xff] }
 0x67d   :  { %2081 = vmatpush1.msra.mxu1 %v4599_v63  ;;  %2899 = vmatprep.subr.mxu0 %v5725_v0  ;;  %v3193_v63 = vld [vmem:[%s5543_s3 + $0x160] sm:$0xff] }
 0x67e   :  { %2082 = vmatprep.subr.mxu1 %v4606_v12  ;;  %2900 = vmatpush3.msra.mxu0 %v4910_v56  ;;  %v3194_v12 = vld [vmem:[%s5543_s3 + $0x148] sm:$0xff] }
 0x67f   :  { %2083 = vmatpush1.msra.mxu1 %v4613_v61  ;;  %2901 = vmatprep.subr.mxu0 %v5725_v0  ;;  %v3195_v61 = vld [vmem:[%s5543_s3 + $0x140] sm:$0xff] }
 0x680   :  { %2084 = vmatprep.subr.mxu1 %v4620_v32  ;;  %2902 = vmatpush3.msra.mxu0 %v4919_v8  ;;  %v3196_v32 = vld [vmem:[%s5543_s3 + $0x128] sm:$0xff] }
 0x681   :  { %2085 = vmatpush1.msra.mxu1 %v4627_v59  ;;  %2903 = vmatprep.subr.mxu0 %v5725_v0  ;;  %v3197_v59 = vld [vmem:[%s5543_s3 + $0x120] sm:$0xff] }
 0x682   :  { %2086 = vmatprep.subr.mxu1 %v4634_v5  ;;  %2904 = vmatpush3.msra.mxu0 %v4928_v17  ;;  %v3198_v5 = vld [vmem:[%s5543_s3 + $0x108] sm:$0xff] }
 0x683   :  { %2087 = vmatpush1.msra.mxu1 %v4641_v54  ;;  %2905 = vmatprep.subr.mxu0 %v5725_v0  ;;  %v3199_v54 = vld [vmem:[%s5543_s3 + $0x100] sm:$0xff] }
 0x684   :  { %2088 = vmatprep.subr.mxu1 %v4648_v30  ;;  %2906 = vmatpush3.msra.mxu0 %v4937_v55  ;;  %v3200_v30 = vld [vmem:[%s5543_s3 + $0xe8] sm:$0xff] }
 0x685   :  { %2089 = vmatpush1.msra.mxu1 %v4655_v52  ;;  %2907 = vmatprep.subr.mxu0 %v5725_v0  ;;  %v3201_v52 = vld [vmem:[%s5543_s3 + $0xe0] sm:$0xff] }
 0x686   :  { %2090 = vmatprep.subr.mxu1 %v4662_v14  ;;  %2908 = vmatpush3.msra.mxu0 %v4946_v51  ;;  %v5941_v14 = vld [vmem:[#allocation42_spill] sm:$0xff] }
 0x687   :  { %2091 = vmatpush1.msra.mxu1 %v4669_v50  ;;  %2909 = vmatprep.subr.mxu0 %v5725_v0  ;;  %v5942_v50 = vld [vmem:[#allocation43_spill] sm:$0xff] }
 0x688   :  { %2092 = vmatprep.subr.mxu1 %v4676_v1  ;;  %2910 = vmatpush3.msra.mxu0 %v4955_v53  ;;  %v5943_v1 = vld [vmem:[#allocation45_spill] sm:$0xff] }
 0x689   :  { %2093 = vmatpush1.msra.mxu1 %v4683_v48  ;;  %2911 = vmatprep.subr.mxu0 %v5725_v0  ;;  %v5944_v48 = vld [vmem:[#allocation40_spill] sm:$0xff] }
 0x68a   :  { %2094 = vmatprep.subr.mxu1 %v4690_v38  ;;  %2912 = vmatpush3.msra.mxu0 %v4964_v49  ;;  %v5945_v38 = vld [vmem:[#allocation39_spill] sm:$0xff] }
 0x68b   :  { %2095 = vmatpush1.msra.mxu1 %v4697_v45  ;;  %2913 = vmatprep.subr.mxu0 %v5725_v0  ;;  %v5946_v45 = vld [vmem:[#allocation41_spill] sm:$0xff] }
 0x68c   :  { %2096 = vmatprep.subr.mxu1 %v5895_v16  ;;  %2914 = vmatpush3.msra.mxu0 %v5938_v23  ;;  %v5947_v16 = vld [vmem:[#allocation21_spill] sm:$0xff] }
 0x68d   :  { %2097 = vmatpush1.msra.mxu1 %v5939_v60  ;;  %2915 = vmatprep.subr.mxu0 %v5725_v0 }
 0x68e   :  { %2131 = vmatmul.mubr.f32.vlgmr.msra.gmra.mxu1 %v5158_v37  ;;  %2251 = vmatprep.subr.mxu1 %v3183_v62  ;;  %v5957_v37 = vld [vmem:[#allocation62_spill] sm:$0xff] }
 0x68f   :  { %2252 = vmatpush1.msra.mxu1 %v3184_v57  ;;  %2916 = vmatpush3.msra.mxu0 %v5940_v6 }
 0x690   :  { %2253 = vmatprep.subr.mxu1 %v3185_v11  ;;  %2917 = vmatprep.mubr.msk.f32.mxu0 %vm3233_vm0, %v5725_v0 }
 0x691   :  { %2254 = vmatpush1.msra.mxu1 %v3186_v20  ;;  %2315 = vmatprep.mubr.f32.mxu1 %v5725_v0 }
 0x692   :  { %2255 = vmatprep.subr.mxu1 %v3187_v3  ;;  %2322 = vmatprep.subr.mxu0 %v3188_v36 }
 0x693   :  { %2256 = vmatpush1.msra.mxu1 %v3189_v47 }
 0x694   :  { %2257 = vmatprep.subr.mxu1 %v3190_v9  ;;  %v5958_v9 = vld [vmem:[#allocation63_spill] sm:$0xff] }
 0x695   :  { %2258 = vmatpush1.msra.mxu1 %v3191_v29 }
 0x696   :  { %2259 = vmatprep.subr.mxu1 %v3192_v27 }
 0x697   :  { %2260 = vmatpush1.msra.mxu1 %v3193_v63  ;;  %v5959_v63 = vld [vmem:[#allocation65_spill] sm:$0xff] }
 0x698   :  { %2261 = vmatprep.subr.mxu1 %v3194_v12 }
 0x699   :  { %2262 = vmatpush1.msra.mxu1 %v3195_v61 }
 0x69a   :  { %2263 = vmatprep.subr.mxu1 %v3196_v32 }
 0x69b   :  { %2264 = vmatpush1.msra.mxu1 %v3197_v59 }
 0x69c   :  { %2265 = vmatprep.subr.mxu1 %v3198_v5 }
 0x69d   :  { %2266 = vmatpush1.msra.mxu1 %v3199_v54 }
 0x69e   :  { %2267 = vmatprep.subr.mxu1 %v3200_v30 }
 0x69f   :  { %2268 = vmatpush1.msra.mxu1 %v3201_v52 }
 0x6a0   :  { %2269 = vmatprep.subr.mxu1 %v5941_v14 }
 0x6a1   :  { %2270 = vmatpush1.msra.mxu1 %v5942_v50 }
 0x6a2   :  { %2271 = vmatprep.subr.mxu1 %v5943_v1 }
 0x6a3   :  { %2272 = vmatpush1.msra.mxu1 %v5944_v48 }
 0x6a4   :  { %2273 = vmatprep.subr.mxu1 %v5945_v38 }
 0x6a5   :  { %2274 = vmatpush1.msra.mxu1 %v5946_v45  ;;  %v3203_v45 = vld [vmem:[%s5543_s3 + $0x1d0] sm:$0xff] }
 0x6a6   :  { %2275 = vmatprep.subr.mxu1 %v5947_v16  ;;  %v3205_v16 = vld [vmem:[%s5543_s3 + $0x1b0] sm:$0xff] }
 0x6a7   :  { %2276 = vmatpush1.msra.mxu1 %v5948_v22  ;;  %v3207_v22 = vld [vmem:[%s5543_s3 + $0x190] sm:$0xff] }
 0x6a8   :  { %2277 = vmatprep.subr.mxu1 %v5949_v43  ;;  %v3209_v43 = vld [vmem:[%s5543_s3 + $0x170] sm:$0xff] }
 0x6a9   :  { %2278 = vmatpush1.msra.mxu1 %v5950_v46  ;;  %v3211_v46 = vld [vmem:[%s5543_s3 + $0x150] sm:$0xff] }
 0x6aa   :  { %2279 = vmatprep.subr.mxu1 %v5951_v19  ;;  %v3213_v19 = vld [vmem:[%s5543_s3 + $0x130] sm:$0xff] }
 0x6ab   :  { %2280 = vmatpush1.msra.mxu1 %v5952_v34  ;;  %v3215_v34 = vld [vmem:[%s5543_s3 + $0x110] sm:$0xff] }
 0x6ac   :  { %2281 = vmatprep.subr.mxu1 %v5953_v2  ;;  %v3217_v2 = vld [vmem:[%s5543_s3 + $0xf0] sm:$0xff] }
 0x6ad   :  { %2282 = vmatpush1.msra.mxu1 %v5954_v4  ;;  %v3219_v4 = vld [vmem:[%s5543_s3 + $0xd0] sm:$0xff] }
 0x6ae   :  { %2920 = vmatprep.subr.mxu1 %v5725_v0 }
 0x72e   :  { %v1975_v35 = vpop.f32.mrf.mxu1  ;;  %v2061_v13 = vpop.f32.mrf.mxu0 }
 0x72f   :  { %v5307_v31 = vadd.f32 %v5955_v15, %v1975_v35  ;;  %v2137_v60 = vadd.f32 %v2061_v13, %v5957_v37  ;;  %v3221_v35 = vld [vmem:[%s5543_s3 + $0xb0] sm:$0xff] }
 0x730   :  { %v2884_v33 = vpop.f32.mrf.mxu1  ;;  %v2063_v26 = vpop.f32.mrf.mxu0  ;;  %v3223_v13 = vld [vmem:[%s5543_s3 + $0x90] sm:$0xff] }
 0x731   :  { %v1979_v28 = vmul.f32 %v4266_v39, %v5307_v31  ;;  %v2138_v24 = vadd.f32 %v2063_v26, %v5956_v18  ;;  %v2533_v57 = vmul.f32 -1.442695, %v2137_v60  ;;  %v3225_v33 = vld [vmem:[%s5543_s3 + $0x70] sm:$0xff]  ;;  %v1213_v60 = vpop.xlane.xlu1 %1212 }
 0x732   :  { %v3227_v26 = vld [vmem:[%s5543_s3 + $0x50] sm:$0xff] }
 0x733   :  { %1980 = vadd.xlane.f32.xlu1 %v1979_v28  ;;  %v2534_v62 = vmul.f32 -1.442695, %v2138_v24  ;;  %v3229_v28 = vld [vmem:[%s5543_s3 + $0x30] sm:$0xff] }
 0x734   :  { %v3231_v18 = vld [vmem:[%s5543_s3 + $0x10] sm:$0xff] }
 0x735   :  { %3053 = vpow2.f32 %v2534_v62 }
 0x736   :  { %3055 = vpow2.f32 %v2533_v57  ;;  %v1214_v57 = vmul.f32 0.015625, %v1213_v60 }
 0x742   :  { %v3054_v11 = vpop.eup %3053 }
 0x743   :  { %v3056_v20 = vpop.eup %3055  ;;  %v2150_v3 = vadd.f32 1.0, %v3054_v11 }
 0x744   :  { %v2144_v36 = vadd.f32 1.0, %v3056_v20 }
 0x745   :  { %3057 = vrcp.f32 %v2150_v3 }
 0x746   :  { %3059 = vrcp.f32 %v2144_v36 }
 0x74e   :  { %v2132_v47 = vpop.f32.mrf.mxu1 }
 0x74f   :  { %v2139_v29 = vadd.f32 %v2132_v47, %v5958_v9 }
 0x750   :  { %v2134_v27 = vpop.f32.mrf.mxu1 }
 0x751   :  { %3061 = vtanh.f32 %v2139_v29  ;;  %v2140_v12 = vadd.f32 %v2134_v27, %v5959_v63 }
 0x752   :  { %v3058_v32 = vpop.eup %3057 }
 0x753   :  { %v2535_v61 = vmul.f32 -1.442695, %v2140_v12  ;;  %v3060_v59 = vpop.eup %3059  ;;  %v2160_v54 = vmul.f32 %v3058_v32, %v5155_v40  ;;  %v3202_v40 = vld [vmem:[%s5543_s3 + $0x1d8] sm:$0xff]  ;;  %v5962_v12 = vld [vmem:[#allocation68_spill] sm:$0xff]  ;;  %v5963_v32 = vld [vmem:[#allocation66_spill] sm:$0xff] }
 0x755   :  { %3063 = vpow2.f32 %v2535_v61 }
 0x75e   :  { %v3062_v5 = vpop.eup %3061 }
 0x75f   :  { %v2161_v30 = vmul.f32 %v3062_v5, %v3060_v59  ;;  %v5964_v5 = vld [vmem:[#allocation38_spill] sm:$0xff] }
 0x761   :  { %v5316_v52 = vadd.f32 %v2161_v30, %v2160_v54 }
 0x762   :  { %v3064_v14 = vpop.eup %3063 }
 0x763   :  { %v2157_v50 = vadd.f32 1.0, %v3064_v14  ;;  %3065 = vtanh.f32 %v5316_v52 }
 0x765   :  { %3067 = vrcp.f32 %v2157_v50 }
 0x770   :  { %v3066_v1 = vpop.eup %3065 }
 0x772   :  { %v3068_v48 = vpop.eup %3067 }
 0x773   :  { %v5319_v38 = vmul.f32 %v3068_v48, %v3066_v1 }
 0x775   :  { %2918 = vmatmul.mubr.f32.vlgmr.msra.gmra.mxu0 %v5319_v38  ;;  %2316 = vmatmul.mubr.f32.vlgmr.msra.gmra.mxu1 %v5319_v38 }
 0x776   :  { %2323 = vmatpush1.msra.mxu0 %v5165_v44  ;;  %2386 = vmatprep.mubr.f32.mxu0 %v5725_v0  ;;  %v3204_v44 = vld [vmem:[%s5543_s3 + $0x1b8] sm:$0xff] }
 0x777   :  { %2324 = vmatprep.subr.mxu0 %v3202_v40  ;;  %2921 = vmatpush3.msra.mxu1 %v4847_v42  ;;  %v3206_v42 = vld [vmem:[%s5543_s3 + $0x198] sm:$0xff] }
 0x778   :  { %2325 = vmatpush1.msra.mxu0 %v3203_v45  ;;  %2922 = vmatprep.subr.mxu1 %v5725_v0 }
 0x779   :  { %2326 = vmatprep.subr.mxu0 %v3204_v44  ;;  %2923 = vmatpush3.msra.mxu1 %v4856_v21  ;;  %v3208_v21 = vld [vmem:[%s5543_s3 + $0x178] sm:$0xff] }
 0x77a   :  { %2327 = vmatpush1.msra.mxu0 %v3205_v16  ;;  %2924 = vmatprep.subr.mxu1 %v5725_v0 }
 0x77b   :  { %2328 = vmatprep.subr.mxu0 %v3206_v42  ;;  %2925 = vmatpush3.msra.mxu1 %v4865_v10  ;;  %v3210_v10 = vld [vmem:[%s5543_s3 + $0x158] sm:$0xff] }
 0x77c   :  { %2329 = vmatpush1.msra.mxu0 %v3207_v22  ;;  %2926 = vmatprep.subr.mxu1 %v5725_v0 }
 0x77d   :  { %2330 = vmatprep.subr.mxu0 %v3208_v21  ;;  %2927 = vmatpush3.msra.mxu1 %v4874_v58  ;;  %v3212_v58 = vld [vmem:[%s5543_s3 + $0x138] sm:$0xff]  ;;  %v5965_v21 = vld [vmem:[#allocation67_spill] sm:$0xff] }
 0x77e   :  { %2331 = vmatpush1.msra.mxu0 %v3209_v43  ;;  %2928 = vmatprep.subr.mxu1 %v5725_v0 }
 0x77f   :  { %2332 = vmatprep.subr.mxu0 %v3210_v10  ;;  %2929 = vmatpush3.msra.mxu1 %v4883_v41  ;;  %v3214_v41 = vld [vmem:[%s5543_s3 + $0x118] sm:$0xff] }
 0x780   :  { %2333 = vmatpush1.msra.mxu0 %v3211_v46  ;;  %2930 = vmatprep.subr.mxu1 %v5725_v0  ;;  %v5966_v46 = vld [vmem:[#allocation69_spill] sm:$0xff] }
 0x781   :  { %2334 = vmatprep.subr.mxu0 %v3212_v58  ;;  %2931 = vmatpush3.msra.mxu1 %v4892_v25  ;;  %v3216_v25 = vld [vmem:[%s5543_s3 + $0xf8] sm:$0xff] }
 0x782   :  { %2335 = vmatpush1.msra.mxu0 %v3213_v19  ;;  %2932 = vmatprep.subr.mxu1 %v5725_v0 }
 0x783   :  { %2336 = vmatprep.subr.mxu0 %v3214_v41  ;;  %2933 = vmatpush3.msra.mxu1 %v4901_v7  ;;  %v3218_v7 = vld [vmem:[%s5543_s3 + $0xd8] sm:$0xff] }
 0x784   :  { %2337 = vmatpush1.msra.mxu0 %v3215_v34  ;;  %2934 = vmatprep.subr.mxu1 %v5725_v0 }
 0x785   :  { %2338 = vmatprep.subr.mxu0 %v3216_v25  ;;  %2935 = vmatpush3.msra.mxu1 %v4910_v56  ;;  %v3220_v56 = vld [vmem:[%s5543_s3 + $0xb8] sm:$0xff] }
 0x786   :  { %2339 = vmatpush1.msra.mxu0 %v3217_v2  ;;  %2936 = vmatprep.subr.mxu1 %v5725_v0 }
 0x787   :  { %2340 = vmatprep.subr.mxu0 %v3218_v7  ;;  %2937 = vmatpush3.msra.mxu1 %v4919_v8  ;;  %v3222_v8 = vld [vmem:[%s5543_s3 + $0x98] sm:$0xff] }
 0x788   :  { %2341 = vmatpush1.msra.mxu0 %v3219_v4  ;;  %2938 = vmatprep.subr.mxu1 %v5725_v0 }
 0x789   :  { %2342 = vmatprep.subr.mxu0 %v3220_v56  ;;  %2939 = vmatpush3.msra.mxu1 %v4928_v17  ;;  %v3224_v17 = vld [vmem:[%s5543_s3 + $0x78] sm:$0xff] }
 0x78a   :  { %2343 = vmatpush1.msra.mxu0 %v3221_v35  ;;  %2940 = vmatprep.subr.mxu1 %v5725_v0 }
 0x78b   :  { %2344 = vmatprep.subr.mxu0 %v3222_v8  ;;  %2941 = vmatpush3.msra.mxu1 %v4937_v55  ;;  %v3226_v55 = vld [vmem:[%s5543_s3 + $0x58] sm:$0xff] }
 0x78c   :  { %2345 = vmatpush1.msra.mxu0 %v3223_v13  ;;  %2942 = vmatprep.subr.mxu1 %v5725_v0 }
 0x78d   :  { %2346 = vmatprep.subr.mxu0 %v3224_v17  ;;  %2943 = vmatpush3.msra.mxu1 %v4946_v51  ;;  %v3228_v51 = vld [vmem:[%s5543_s3 + $0x38] sm:$0xff] }
 0x78e   :  { %2347 = vmatpush1.msra.mxu0 %v3225_v33  ;;  %2944 = vmatprep.subr.mxu1 %v5725_v0 }
 0x78f   :  { %2348 = vmatprep.subr.mxu0 %v3226_v55  ;;  %2945 = vmatpush3.msra.mxu1 %v4955_v53  ;;  %v3230_v53 = vld [vmem:[%s5543_s3 + $0x18] sm:$0xff] }
 0x790   :  { %2349 = vmatpush1.msra.mxu0 %v3227_v26  ;;  %2946 = vmatprep.subr.mxu1 %v5725_v0 }
 0x791   :  { %2350 = vmatprep.subr.mxu0 %v3228_v51  ;;  %2947 = vmatpush3.msra.mxu1 %v4964_v49  ;;  %v689_v49 = vpop.xlane.xlu0 %688 }
 0x792   :  { %2351 = vmatpush1.msra.mxu0 %v3229_v28  ;;  %2948 = vmatprep.subr.mxu1 %v5725_v0  ;;  %v690_v24 = vmul.f32 0.015625, %v689_v49 }
 0x793   :  { %2352 = vmatprep.subr.mxu0 %v3230_v53  ;;  %2949 = vmatpush3.msra.mxu1 %v5938_v23  ;;  %v5960_v23 = vld [vmem:[#allocation33_spill] sm:$0xff] }
 0x794   :  { %2353 = vmatpush1.msra.mxu0 %v3231_v18  ;;  %2950 = vmatprep.subr.mxu1 %v5725_v0  ;;  %v5452_v62 = vsub.f32 %v5960_v23, %v690_v24 }
 0x795   :  { %2387 = vmatmul.mubr.f32.vlgmr.msra.gmra.mxu0 %v5319_v38  ;;  %2951 = vmatpush3.msra.mxu1 %v5940_v6  ;;  %v5449_v37 = vpop.xlane.xlu0 %956  ;;  %v5961_v6 = vld [vmem:[#allocation29_spill] sm:$0xff] }
 0x796   :  { %2952 = vmatprep.mubr.msk.f32.mxu1 %vm3233_vm0, %v5725_v0  ;;  %v5456_v29 = vsub.f32 %v5961_v6, %v1214_v57  ;;  %v692_v63 = vmul.f32 %v4266_v39, %v5452_v62 }
 0x798   :  { %v693_v30 = vmul.f32 %v692_v63, %v692_v63  ;;  %v1216_v14 = vmul.f32 %v4266_v39, %v5456_v29 }
 0x799   :  { %v1725_v11 = vpop.xlane.xlu0 %1724 }
 0x79a   :  { %v1726_v0 = vmul.f32 0.015625, %v1725_v11  ;;  %v1217_v48 = vmul.f32 %v1216_v14, %v1216_v14 }
 0x79c   :  { %v5464_v54 = vsub.f32 %v5964_v5, %v1726_v0  ;;  %v1469_v5 = vpop.xlane.xlu1 %1468 }
 0x79e   :  { %v1728_v38 = vmul.f32 %v4266_v39, %v5464_v54 }
 0x7a0   :  { %v1729_v40 = vmul.f32 %v1728_v38, %v1728_v38 }
 0x835   :  { %v2231_v20 = vpop.f32.mrf.mxu0  ;;  %v2317_v3 = vpop.f32.mrf.mxu1 }
 0x836   :  { %v2232_v36 = vadd.f32 %v5955_v15, %v2231_v20  ;;  %v2393_v59 = vadd.f32 %v2317_v3, %v5963_v32  ;;  %v5480_v3 = vld [vmem:[%s5548_s7] ss:$0 sm:$0xff] }
 0x837   :  { %v2919_v47 = vpop.f32.mrf.mxu0  ;;  %v2319_v9 = vpop.f32.mrf.mxu1 }
 0x838   :  { %v2235_v27 = vmul.f32 %v4266_v39, %v2232_v36  ;;  %v2394_v61 = vadd.f32 %v2319_v9, %v5962_v12  ;;  %v2536_v1 = vmul.f32 -1.442695, %v2393_v59  ;;  %v5486_v47 = vld [vmem:[%s5549_s8] ss:$0 sm:$0xff] }
 0x83a   :  { %2236 = vadd.xlane.f32.xlu0 %v2235_v27  ;;  %v2537_v50 = vmul.f32 -1.442695, %v2394_v61 }
 0x83c   :  { %3069 = vpow2.f32 %v2537_v50  ;;  %v1470_v50 = vmul.f32 0.015625, %v1469_v5 }
 0x83d   :  { %3071 = vpow2.f32 %v2536_v1  ;;  %v1981_v1 = vpop.xlane.xlu1 %1980 }
 0x83e   :  { %694 = vadd.xlane.f32.xlu0 %v693_v30  ;;  %v5967_v30 = vld [vmem:[#allocation19_spill] sm:$0xff] }
 0x842   :  { %1218 = vadd.xlane.f32.xlu0 %v1217_v48 }
 0x846   :  { %1730 = vadd.xlane.f32.xlu0 %v1729_v40  ;;  %v5968_v40 = vld [vmem:[#allocation34_spill] sm:$0xff] }
 0x849   :  { %v3070_v45 = vpop.eup %3069 }
 0x84a   :  { %v3072_v44 = vpop.eup %3071  ;;  %v2406_v16 = vadd.f32 1.0, %v3070_v45  ;;  %v1471_v45 = vsub.f32 %v5968_v40, %v1470_v50 }
 0x84b   :  { %v2400_v42 = vadd.f32 1.0, %v3072_v44  ;;  %v1982_v44 = vmul.f32 0.015625, %v1981_v1 }
 0x84c   :  { %3073 = vrcp.f32 %v2406_v16 }
 0x84d   :  { %3075 = vrcp.f32 %v2400_v42 }
 0x855   :  { %v2388_v22 = vpop.f32.mrf.mxu0 }
 0x856   :  { %v2395_v43 = vadd.f32 %v2388_v22, %v5965_v21  ;;  %v1983_v22 = vsub.f32 %v5307_v31, %v1982_v44  ;;  %v1472_v21 = vmul.f32 %v4266_v39, %v1471_v45 }
 0x857   :  { %v2390_v10 = vpop.f32.mrf.mxu0 }
 0x858   :  { %3077 = vtanh.f32 %v2395_v43  ;;  %v2396_v58 = vadd.f32 %v2390_v10, %v5966_v46  ;;  %v1473_v43 = vmul.f32 %v1472_v21, %v1472_v21  ;;  %v1984_v10 = vmul.f32 %v4266_v39, %v1983_v22 }
 0x859   :  { %v3074_v41 = vpop.eup %3073 }
 0x85a   :  { %v2538_v19 = vmul.f32 -1.442695, %v2396_v58  ;;  %v3076_v34 = vpop.eup %3075  ;;  %v2416_v2 = vmul.f32 %v3074_v41, %v5316_v52 }
 0x85c   :  { %3079 = vpow2.f32 %v2538_v19 }
 0x865   :  { %v3078_v25 = vpop.eup %3077 }
 0x866   :  { %v2417_v7 = vmul.f32 %v3078_v25, %v3076_v34 }
 0x868   :  { %v2418_v4 = vadd.f32 %v2417_v7, %v2416_v2 }
 0x869   :  { %v3080_v56 = vpop.eup %3079 }
 0x86a   :  { %v2413_v35 = vadd.f32 1.0, %v3080_v56  ;;  %3081 = vtanh.f32 %v2418_v4 }
 0x86c   :  { %3083 = vrcp.f32 %v2413_v35 }
 0x877   :  { %v3082_v8 = vpop.eup %3081 }
 0x879   :  { %v3084_v13 = vpop.eup %3083 }
 0x87a   :  { %v2420_v17 = vmul.f32 %v3084_v13, %v3082_v8 }
 0x87c   :  { %2953 = vmatmul.mubr.f32.vlgmr.msra.gmra.mxu1 %v2420_v17 }
 0x8c3   :  { %v2237_v33 = vpop.xlane.xlu0 %2236 }
 0x8c4   :  { %v2238_v55 = vmul.f32 0.015625, %v2237_v33 }
 0x8c6   :  { %v5473_v26 = vsub.f32 %v2232_v36, %v2238_v55 }
 0x8c7   :  { %v695_v51 = vpop.xlane.xlu0 %694 }
 0x8c8   :  { %v696_v28 = vmul.f32 0.015625, %v695_v51  ;;  %v2240_v53 = vmul.f32 %v4266_v39, %v5473_v26 }
 0x8ca   :  { %v697_v52 = vadd.f32 1e-05, %v696_v28  ;;  %v2241_v18 = vmul.f32 %v2240_v53, %v2240_v53 }
 0x8cb   :  { %v1219_v49 = vpop.xlane.xlu0 %1218 }
 0x8cc   :  { %3085 = vrsqrt.f32 %v697_v52  ;;  %v1220_v24 = vmul.f32 0.015625, %v1219_v49  ;;  %2242 = vadd.xlane.f32.xlu0 %v2241_v18 }
 0x8ce   :  { %v1221_v60 = vadd.f32 1e-05, %v1220_v24 }
 0x8cf   :  { %v1731_v23 = vpop.xlane.xlu0 %1730 }
 0x8d0   :  { %3087 = vrsqrt.f32 %v1221_v60  ;;  %v1732_v57 = vmul.f32 0.015625, %v1731_v23 }
 0x8d2   :  { %v1733_v11 = vadd.f32 1e-05, %v1732_v57 }
 0x8d4   :  { %3089 = vrsqrt.f32 %v1733_v11 }
 0x8d9   :  { %v3086_v20 = vpop.eup %3085 }
 0x8da   :  { %v699_v36 = vmul.f32 %v3086_v20, %v5452_v62 }
 0x8dc   :  { %v706_v9 = vmul.f32 %v5480_v3, %v699_v36 }
 0x8dd   :  { %v3088_v6 = vpop.eup %3087 }
 0x8de   :  { %v713_v0 = vadd.f32 %v5486_v47, %v706_v9  ;;  %v1223_v27 = vmul.f32 %v3088_v6, %v5456_v29  ;;  %v958_v29 = vmul.f32 0.015625, %v5449_v37 }
 0x8e0   :  { %714 = vst [vmem:[%s5550_s9] sm:$0xff] %v713_v0  ;;  %v1224_v63 = vmul.f32 %v5480_v3, %v1223_v27  ;;  %v959_v14 = vsub.f32 %v5967_v30, %v958_v29 }
 0x8e1   :  { %v3090_v12 = vpop.eup %3089 }
 0x8e2   :  { %v1225_v62 = vadd.f32 %v5486_v47, %v1224_v63  ;;  %v1735_v61 = vmul.f32 %v3090_v12, %v5464_v54  ;;  %v960_v42 = vmul.f32 %v4266_v39, %v959_v14 }
 0x8e4   :  { %1226 = vst [vmem:[%s5550_s9 + $0x10] sm:$0xff] %v1225_v62  ;;  %v1736_v32 = vmul.f32 %v5480_v3, %v1735_v61  ;;  %v961_v37 = vmul.f32 %v960_v42, %v960_v42 }
 0x8e6   :  { %v1737_v59 = vadd.f32 %v5486_v47, %v1736_v32 }
 0x8e8   :  { %1738 = vst [vmem:[%s5550_s9 + $0x20] sm:$0xff] %v1737_v59 }
 0x93c   :  { %v2487_v54 = vpop.f32.mrf.mxu1 }
 0x93d   :  { %v2488_v48 = vadd.f32 %v5955_v15, %v2487_v54  ;;  %v1985_v15 = vmul.f32 %v1984_v10, %v1984_v10 }
 0x93e   :  { %v2954_v38 = vpop.f32.mrf.mxu1 }
 0x93f   :  { %v2491_v16 = vmul.f32 %v4266_v39, %v2488_v48 }
 0x941   :  { %2492 = vadd.xlane.f32.xlu1 %v2491_v16 }
 0x945   :  { %962 = vadd.xlane.f32.xlu1 %v961_v37 }
 0x949   :  { %1474 = vadd.xlane.f32.xlu1 %v1473_v43 }
 0x94d   :  { %1986 = vadd.xlane.f32.xlu1 %v1985_v15 }
 0x955   :  { %v2243_v46 = vpop.xlane.xlu0 %2242 }
 0x956   :  { %v2244_v58 = vmul.f32 0.015625, %v2243_v46 }
 0x958   :  { %v2245_v19 = vadd.f32 1e-05, %v2244_v58 }
 0x95a   :  { %3091 = vrsqrt.f32 %v2245_v19 }
 0x967   :  { %v3092_v41 = vpop.eup %3091 }
 0x968   :  { %v2247_v34 = vmul.f32 %v3092_v41, %v5473_v26 }
 0x96a   :  { %v2248_v25 = vmul.f32 %v5480_v3, %v2247_v34 }
 0x96c   :  { %v2249_v31 = vadd.f32 %v5486_v47, %v2248_v25 }
 0x96e   :  { %2250 = vst [vmem:[%s5550_s9 + $0x30] sm:$0xff] %v2249_v31 }
 0x9ca   :  { %v2493_v2 = vpop.xlane.xlu1 %2492 }
 0x9cb   :  { %v2494_v7 = vmul.f32 0.015625, %v2493_v2 }
 0x9cd   :  { %v2495_v4 = vsub.f32 %v2488_v48, %v2494_v7 }
 0x9ce   :  { %v963_v56 = vpop.xlane.xlu1 %962 }
 0x9cf   :  { %v964_v35 = vmul.f32 0.015625, %v963_v56  ;;  %v2496_v8 = vmul.f32 %v4266_v39, %v2495_v4 }
 0x9d1   :  { %v965_v13 = vadd.f32 1e-05, %v964_v35  ;;  %v2497_v17 = vmul.f32 %v2496_v8, %v2496_v8 }
 0x9d2   :  { %v1475_v33 = vpop.xlane.xlu1 %1474 }
 0x9d3   :  { %3093 = vrsqrt.f32 %v965_v13  ;;  %v1476_v55 = vmul.f32 0.015625, %v1475_v33  ;;  %2498 = vadd.xlane.f32.xlu1 %v2497_v17 }
 0x9d5   :  { %v1477_v26 = vadd.f32 1e-05, %v1476_v55 }
 0x9d6   :  { %v1987_v51 = vpop.xlane.xlu1 %1986 }
 0x9d7   :  { %3095 = vrsqrt.f32 %v1477_v26  ;;  %v1988_v28 = vmul.f32 0.015625, %v1987_v51 }
 0x9d9   :  { %v1989_v53 = vadd.f32 1e-05, %v1988_v28 }
 0x9db   :  { %3097 = vrsqrt.f32 %v1989_v53 }
 0x9e0   :  { %v3094_v52 = vpop.eup %3093 }
 0x9e1   :  { %v967_v18 = vmul.f32 %v3094_v52, %v959_v14 }
 0x9e3   :  { %v968_v49 = vmul.f32 %v5480_v3, %v967_v18 }
 0x9e4   :  { %v3096_v24 = vpop.eup %3095 }
 0x9e5   :  { %v969_v60 = vadd.f32 %v5486_v47, %v968_v49  ;;  %v1479_v39 = vmul.f32 %v3096_v24, %v1471_v45 }
 0x9e7   :  { %970 = vst [vmem:[%s5550_s9 + $0x8] sm:$0xff] %v969_v60  ;;  %v1480_v23 = vmul.f32 %v5480_v3, %v1479_v39 }
 0x9e8   :  { %v3098_v57 = vpop.eup %3097 }
 0x9e9   :  { %v1481_v11 = vadd.f32 %v5486_v47, %v1480_v23  ;;  %v1991_v20 = vmul.f32 %v3098_v57, %v1983_v22 }
 0x9eb   :  { %1482 = vst [vmem:[%s5550_s9 + $0x18] sm:$0xff] %v1481_v11  ;;  %v1992_v36 = vmul.f32 %v5480_v3, %v1991_v20 }
 0x9ed   :  { %v1993_v9 = vadd.f32 %v5486_v47, %v1992_v36 }
 0x9ef   :  { %1994 = vst [vmem:[%s5550_s9 + $0x28] sm:$0xff] %v1993_v9 }
 0xa5c   :  { %v2499_v6 = vpop.xlane.xlu1 %2498 }
 0xa5d   :  { %v2500_v0 = vmul.f32 0.015625, %v2499_v6 }
 0xa5f   :  { %v2501_v27 = vadd.f32 1e-05, %v2500_v0 }
 0xa61   :  { %3099 = vrsqrt.f32 %v2501_v27 }
 0xa6e   :  { %v3100_v63 = vpop.eup %3099 }
 0xa6f   :  { %v2503_v12 = vmul.f32 %v3100_v63, %v2495_v4 }
 0xa71   :  { %v2504_v62 = vmul.f32 %v5480_v3, %v2503_v12 }
 0xa73   :  { %v2505_v61 = vadd.f32 %v5486_v47, %v2504_v62 }
 0xa75   :  { %2506 = vst [vmem:[%s5550_s9 + $0x38] sm:$0xff] %v2505_v61 }

</bundles_post_ra>
